<compile_context>
chip_gen: v6e
topology: v6e:2x2x1
jax: 0.10.0
libtpu: 0.0.40
codegen_flags: <defaults>
</compile_context>

<pallas_src>
import functools

import jax
import jax.numpy as jnp
from jax.experimental import pallas as pl
from jax.experimental.pallas import tpu as pltpu

BN_EPS = 1e-5
LANE = 128


def matching_kernel(
    xu_ref, xi_ref,
    # user tower (BN already folded into w1/b1)
    uw1_ref, ub1_ref, uw2_ref, ub2_ref, uw3_ref, ub3_ref,
    # item tower
    iw1_ref, ib1_ref, iw2_ref, ib2_ref, iw3_ref, ib3_ref,
    out_ref,
):
    """One batch tile: two MatchingDense towers + SimilarityModule."""

    def tower(x, w1_ref, b1_ref, w2_ref, b2_ref, w3_ref, b3_ref):
        # d1: emb_out -> 1024, relu   (bf16 MXU, f32 accumulate)
        h = jnp.dot(x.astype(jnp.bfloat16), w1_ref[...],
                    preferred_element_type=jnp.float32) + b1_ref[...]
        h = jnp.maximum(h, 0.0)
        # d2: 1024 -> 512, relu
        h = jnp.dot(h.astype(jnp.bfloat16), w2_ref[...],
                    preferred_element_type=jnp.float32) + b2_ref[...]
        h = jnp.maximum(h, 0.0)
        # d3: 512 -> 128 (64 real outputs + zero pad), no activation
        h = jnp.dot(h.astype(jnp.bfloat16), w3_ref[...],
                    preferred_element_type=jnp.float32) + b3_ref[...]
        return h

    x1 = tower(xu_ref[...], uw1_ref, ub1_ref, uw2_ref, ub2_ref, uw3_ref, ub3_ref)
    x2 = tower(xi_ref[...], iw1_ref, ib1_ref, iw2_ref, ib2_ref, iw3_ref, ib3_ref)

    # SimilarityModule: z = sum(x1 * x2, dim=1); s = sigmoid(z)
    z = jnp.sum(x1 * x2, axis=1, keepdims=True)      # (TB, 1)
    s = jax.nn.sigmoid(z)                            # (TB, 1), f32
    s_row = jnp.transpose(s)                         # (1, TB): batch on lanes
    out_ref[...] = s_row[None, :, :]                 # lane-dense (1, 1, TB) store


def _fold_tower_params(x, params):
    """Fold training-mode BatchNorm1d (batch stats over the full batch) into the
    first linear layer, cast matmul weights to bf16, pad d3 out to 128 lanes."""
    gamma, beta, w1, b1, w2, b2, w3, b3 = params
    mean = jnp.mean(x, axis=0, keepdims=True)
    var = jnp.mean(jnp.square(x - mean), axis=0, keepdims=True)  # biased, like BN
    inv = jax.lax.rsqrt(var + BN_EPS)
    scale = gamma * inv                       # (1, E)
    shift = beta - mean * scale               # (1, E)
    w1f = scale.reshape(-1, 1) * w1           # (E, 1024): BN scale on w1 rows
    b1f = b1 + shift @ w1                     # (1, 1024)
    pad = (-w3.shape[1]) % LANE
    w3p = jnp.pad(w3, ((0, 0), (0, pad)))
    b3p = jnp.pad(b3, ((0, 0), (0, pad)))
    return (w1f.astype(jnp.bfloat16), b1f.astype(jnp.float32),
            w2.astype(jnp.bfloat16), b2.astype(jnp.float32),
            w3p.astype(jnp.bfloat16), b3p.astype(jnp.float32))


@functools.partial(jax.jit, static_argnames=("tile_b",))
def matching_net(x_user, x_item, user_params, item_params, tile_b=128):
    B = x_user.shape[0]

    # Fold BN (using full-batch statistics) + cast/pad weights in the wrapper.
    up = _fold_tower_params(x_user, user_params)
    ip = _fold_tower_params(x_item, item_params)

    # Batch tiling: TB rows per grid step (multiple of 8 sublanes).
    tb = min(tile_b, ((B + 7) // 8) * 8)
    bp = ((B + tb - 1) // tb) * tb
    if bp != B:
        x_user = jnp.pad(x_user, ((0, bp - B), (0, 0)))
        x_item = jnp.pad(x_item, ((0, bp - B), (0, 0)))
    num_tiles = bp // tb

    def batch_spec(a):
        return pl.BlockSpec((tb, a.shape[1]), lambda i: (i, 0))

    def resident_spec(a):
        # Constant block index -> weight/bias stays VMEM-resident across steps.
        return pl.BlockSpec(a.shape, lambda i: (0, 0))

    args = [x_user, x_item, *up, *ip]
    in_specs = [batch_spec(x_user), batch_spec(x_item)]
    in_specs += [resident_spec(a) for a in (*up, *ip)]

    scores = pl.pallas_call(
        matching_kernel,
        out_shape=jax.ShapeDtypeStruct((num_tiles, 1, tb), jnp.float32),
        grid=(num_tiles,),
        in_specs=in_specs,
        out_specs=pl.BlockSpec((1, 1, tb), lambda i: (i, 0, 0)),
        compiler_params=pltpu.CompilerParams(
            dimension_semantics=("parallel",),   # megacore split on v7x
            vmem_limit_bytes=48 << 20,
        ),
    )(*args)

    # (num_tiles, 1, TB) lane-dense slab -> (B, 1)
    return scores.reshape(-1, 1)[:B]


def matching_net_reference(x_user, x_item, user_params, item_params):
    """Pure-JAX f32 reference matching the PyTorch forward (training-mode BN)."""
    def tower(x, params):
        gamma, beta, w1, b1, w2, b2, w3, b3 = params
        mean = jnp.mean(x, axis=0, keepdims=True)
        var = jnp.mean(jnp.square(x - mean), axis=0, keepdims=True)
        h = gamma * (x - mean) * jax.lax.rsqrt(var + BN_EPS) + beta
        h = jnp.maximum(h @ w1 + b1, 0.0)
        h = jnp.maximum(h @ w2 + b2, 0.0)
        return h @ w3 + b3
    x1 = tower(x_user, user_params)
    x2 = tower(x_item, item_params)
    return jax.nn.sigmoid(jnp.sum(x1 * x2, axis=1, keepdims=True))


def init_tower_params(key, emb_out):
    """Deterministic init for one MatchingDense tower. Weights are [in, out]."""
    ks = jax.random.split(key, 6)
    gamma = jnp.ones((1, emb_out), jnp.float32)       # BN weight
    beta = jnp.zeros((1, emb_out), jnp.float32)       # BN bias
    w1 = 0.05 * jax.random.normal(ks[0], (emb_out, 1024), jnp.float32)
    b1 = 0.01 * jax.random.normal(ks[1], (1, 1024), jnp.float32)
    w2 = 0.05 * jax.random.normal(ks[2], (1024, 512), jnp.float32)
    b2 = 0.01 * jax.random.normal(ks[3], (1, 512), jnp.float32)
    w3 = 0.05 * jax.random.normal(ks[4], (512, 64), jnp.float32)
    b3 = 0.01 * jax.random.normal(ks[5], (1, 64), jnp.float32)
    return (gamma, beta, w1, b1, w2, b2, w3, b3)


if __name__ == "__main__":
    key = jax.random.PRNGKey(0)
    k_xu, k_xi, k_u, k_i = jax.random.split(key, 4)

    B = 8                 # batch
    EMB_SIZE = 16         # embedding size per feature
    FEATURE_COUNT = 8     # simulated sparse feature count
    EMB_OUT = FEATURE_COUNT * EMB_SIZE  # 128 = MatchingDense input width

    # Simulated EmbeddingSumConcat outputs for the user and item towers.
    x_user = jax.random.normal(k_xu, (B, EMB_OUT), jnp.float32)
    x_item = jax.random.normal(k_xi, (B, EMB_OUT), jnp.float32)

    user_params = init_tower_params(k_u, EMB_OUT)
    item_params = init_tower_params(k_i, EMB_OUT)

    score = matching_net(x_user, x_item, user_params, item_params)
    score = jax.block_until_ready(score)

    assert score.shape == (B, 1)
    assert bool(jnp.all(jnp.isfinite(score)))

    # Tolerance check vs f32 reference (bf16 matmuls -> loose tolerance).
    ref = matching_net_reference(x_user, x_item, user_params, item_params)
    max_err = float(jnp.max(jnp.abs(score - ref)))
    assert max_err < 5e-2, f"max |diff| vs reference = {max_err}"

    print("KERNEL_OK")
</pallas_src>

<mosaic_0001>
module attributes {stable_mosaic.version = 11 : i64} {
  func.func @matching_kernel(%arg0: i32, %arg1: memref<8x128xf32, #tpu.memory_space<vmem>>, %arg2: memref<8x128xf32, #tpu.memory_space<vmem>>, %arg3: memref<128x1024xbf16, #tpu.memory_space<vmem>>, %arg4: memref<1x1024xf32, #tpu.memory_space<vmem>>, %arg5: memref<1024x512xbf16, #tpu.memory_space<vmem>>, %arg6: memref<1x512xf32, #tpu.memory_space<vmem>>, %arg7: memref<512x128xbf16, #tpu.memory_space<vmem>>, %arg8: memref<1x128xf32, #tpu.memory_space<vmem>>, %arg9: memref<128x1024xbf16, #tpu.memory_space<vmem>>, %arg10: memref<1x1024xf32, #tpu.memory_space<vmem>>, %arg11: memref<1024x512xbf16, #tpu.memory_space<vmem>>, %arg12: memref<1x512xf32, #tpu.memory_space<vmem>>, %arg13: memref<512x128xbf16, #tpu.memory_space<vmem>>, %arg14: memref<1x128xf32, #tpu.memory_space<vmem>>, %arg15: memref<1x1x8xf32, #tpu.memory_space<vmem>>) attributes {dimension_semantics = [#tpu.dimension_semantics<parallel>], iteration_bounds = array<i64: 1>, scalar_prefetch = 0 : i64, scratch_operands = 0 : i64, tpu.core_type = #tpu.core_type<tc>, window_params = [{transform_indices = @transform_0, window_bounds = array<i64: 8, 128>}, {transform_indices = @transform_1, window_bounds = array<i64: 8, 128>}, {pipeline_mode = #tpu.pipeline_mode<synchronous>, transform_indices = @transform_2, window_bounds = array<i64: 128, 1024>}, {pipeline_mode = #tpu.pipeline_mode<synchronous>, transform_indices = @transform_3, window_bounds = array<i64: 1, 1024>}, {pipeline_mode = #tpu.pipeline_mode<synchronous>, transform_indices = @transform_4, window_bounds = array<i64: 1024, 512>}, {pipeline_mode = #tpu.pipeline_mode<synchronous>, transform_indices = @transform_5, window_bounds = array<i64: 1, 512>}, {pipeline_mode = #tpu.pipeline_mode<synchronous>, transform_indices = @transform_6, window_bounds = array<i64: 512, 128>}, {pipeline_mode = #tpu.pipeline_mode<synchronous>, transform_indices = @transform_7, window_bounds = array<i64: 1, 128>}, {pipeline_mode = #tpu.pipeline_mode<synchronous>, transform_indices = @transform_8, window_bounds = array<i64: 128, 1024>}, {pipeline_mode = #tpu.pipeline_mode<synchronous>, transform_indices = @transform_9, window_bounds = array<i64: 1, 1024>}, {pipeline_mode = #tpu.pipeline_mode<synchronous>, transform_indices = @transform_10, window_bounds = array<i64: 1024, 512>}, {pipeline_mode = #tpu.pipeline_mode<synchronous>, transform_indices = @transform_11, window_bounds = array<i64: 1, 512>}, {pipeline_mode = #tpu.pipeline_mode<synchronous>, transform_indices = @transform_12, window_bounds = array<i64: 512, 128>}, {pipeline_mode = #tpu.pipeline_mode<synchronous>, transform_indices = @transform_13, window_bounds = array<i64: 1, 128>}, {transform_indices = @transform_14, window_bounds = array<i64: 1, 1, 8>}]} {
    %c0 = arith.constant 0 : index
    %c0_0 = arith.constant 0 : index
    %0 = vector.load %arg1[%c0, %c0_0] : memref<8x128xf32, #tpu.memory_space<vmem>>, vector<8x128xf32>
    %1 = arith.truncf %0 : vector<8x128xf32> to vector<8x128xbf16>
    %c0_1 = arith.constant 0 : index
    %c0_2 = arith.constant 0 : index
    %2 = vector.load %arg3[%c0_1, %c0_2] : memref<128x1024xbf16, #tpu.memory_space<vmem>>, vector<128x1024xbf16>
    %cst = arith.constant dense<0.000000e+00> : vector<8x1024xf32>
    %3 = tpu.matmul %1, %2, %cst {dimension_numbers = #tpu.dot_dimension_numbers<[1], [0], [0], [1], [0, 0, 1, 1], [], []>} : vector<8x128xbf16>, vector<128x1024xbf16>, vector<8x1024xf32> -> vector<8x1024xf32>
    %c0_3 = arith.constant 0 : index
    %c0_4 = arith.constant 0 : index
    %4 = vector.load %arg4[%c0_3, %c0_4] : memref<1x1024xf32, #tpu.memory_space<vmem>>, vector<1x1024xf32>
    %5 = vector.broadcast %4 : vector<1x1024xf32> to vector<8x1024xf32>
    %6 = arith.addf %3, %5 : vector<8x1024xf32>
    %cst_5 = arith.constant 0.000000e+00 : f32
    %7 = vector.broadcast %cst_5 : f32 to vector<8x1024xf32>
    %8 = arith.maximumf %6, %7 : vector<8x1024xf32>
    %9 = arith.truncf %8 : vector<8x1024xf32> to vector<8x1024xbf16>
    %c0_6 = arith.constant 0 : index
    %c0_7 = arith.constant 0 : index
    %10 = vector.load %arg5[%c0_6, %c0_7] : memref<1024x512xbf16, #tpu.memory_space<vmem>>, vector<1024x512xbf16>
    %cst_8 = arith.constant dense<0.000000e+00> : vector<8x512xf32>
    %11 = tpu.matmul %9, %10, %cst_8 {dimension_numbers = #tpu.dot_dimension_numbers<[1], [0], [0], [1], [0, 0, 1, 1], [], []>} : vector<8x1024xbf16>, vector<1024x512xbf16>, vector<8x512xf32> -> vector<8x512xf32>
    %c0_9 = arith.constant 0 : index
    %c0_10 = arith.constant 0 : index
    %12 = vector.load %arg6[%c0_9, %c0_10] : memref<1x512xf32, #tpu.memory_space<vmem>>, vector<1x512xf32>
    %13 = vector.broadcast %12 : vector<1x512xf32> to vector<8x512xf32>
    %14 = arith.addf %11, %13 : vector<8x512xf32>
    %cst_11 = arith.constant 0.000000e+00 : f32
    %15 = vector.broadcast %cst_11 : f32 to vector<8x512xf32>
    %16 = arith.maximumf %14, %15 : vector<8x512xf32>
    %17 = arith.truncf %16 : vector<8x512xf32> to vector<8x512xbf16>
    %c0_12 = arith.constant 0 : index
    %c0_13 = arith.constant 0 : index
    %18 = vector.load %arg7[%c0_12, %c0_13] : memref<512x128xbf16, #tpu.memory_space<vmem>>, vector<512x128xbf16>
    %cst_14 = arith.constant dense<0.000000e+00> : vector<8x128xf32>
    %19 = tpu.matmul %17, %18, %cst_14 {dimension_numbers = #tpu.dot_dimension_numbers<[1], [0], [0], [1], [0, 0, 1, 1], [], []>} : vector<8x512xbf16>, vector<512x128xbf16>, vector<8x128xf32> -> vector<8x128xf32>
    %c0_15 = arith.constant 0 : index
    %c0_16 = arith.constant 0 : index
    %20 = vector.load %arg8[%c0_15, %c0_16] : memref<1x128xf32, #tpu.memory_space<vmem>>, vector<1x128xf32>
    %21 = vector.broadcast %20 : vector<1x128xf32> to vector<8x128xf32>
    %22 = arith.addf %19, %21 : vector<8x128xf32>
    %c0_17 = arith.constant 0 : index
    %c0_18 = arith.constant 0 : index
    %23 = vector.load %arg2[%c0_17, %c0_18] : memref<8x128xf32, #tpu.memory_space<vmem>>, vector<8x128xf32>
    %24 = arith.truncf %23 : vector<8x128xf32> to vector<8x128xbf16>
    %c0_19 = arith.constant 0 : index
    %c0_20 = arith.constant 0 : index
    %25 = vector.load %arg9[%c0_19, %c0_20] : memref<128x1024xbf16, #tpu.memory_space<vmem>>, vector<128x1024xbf16>
    %cst_21 = arith.constant dense<0.000000e+00> : vector<8x1024xf32>
    %26 = tpu.matmul %24, %25, %cst_21 {dimension_numbers = #tpu.dot_dimension_numbers<[1], [0], [0], [1], [0, 0, 1, 1], [], []>} : vector<8x128xbf16>, vector<128x1024xbf16>, vector<8x1024xf32> -> vector<8x1024xf32>
    %c0_22 = arith.constant 0 : index
    %c0_23 = arith.constant 0 : index
    %27 = vector.load %arg10[%c0_22, %c0_23] : memref<1x1024xf32, #tpu.memory_space<vmem>>, vector<1x1024xf32>
    %28 = vector.broadcast %27 : vector<1x1024xf32> to vector<8x1024xf32>
    %29 = arith.addf %26, %28 : vector<8x1024xf32>
    %cst_24 = arith.constant 0.000000e+00 : f32
    %30 = vector.broadcast %cst_24 : f32 to vector<8x1024xf32>
    %31 = arith.maximumf %29, %30 : vector<8x1024xf32>
    %32 = arith.truncf %31 : vector<8x1024xf32> to vector<8x1024xbf16>
    %c0_25 = arith.constant 0 : index
    %c0_26 = arith.constant 0 : index
    %33 = vector.load %arg11[%c0_25, %c0_26] : memref<1024x512xbf16, #tpu.memory_space<vmem>>, vector<1024x512xbf16>
    %cst_27 = arith.constant dense<0.000000e+00> : vector<8x512xf32>
    %34 = tpu.matmul %32, %33, %cst_27 {dimension_numbers = #tpu.dot_dimension_numbers<[1], [0], [0], [1], [0, 0, 1, 1], [], []>} : vector<8x1024xbf16>, vector<1024x512xbf16>, vector<8x512xf32> -> vector<8x512xf32>
    %c0_28 = arith.constant 0 : index
    %c0_29 = arith.constant 0 : index
    %35 = vector.load %arg12[%c0_28, %c0_29] : memref<1x512xf32, #tpu.memory_space<vmem>>, vector<1x512xf32>
    %36 = vector.broadcast %35 : vector<1x512xf32> to vector<8x512xf32>
    %37 = arith.addf %34, %36 : vector<8x512xf32>
    %cst_30 = arith.constant 0.000000e+00 : f32
    %38 = vector.broadcast %cst_30 : f32 to vector<8x512xf32>
    %39 = arith.maximumf %37, %38 : vector<8x512xf32>
    %40 = arith.truncf %39 : vector<8x512xf32> to vector<8x512xbf16>
    %c0_31 = arith.constant 0 : index
    %c0_32 = arith.constant 0 : index
    %41 = vector.load %arg13[%c0_31, %c0_32] : memref<512x128xbf16, #tpu.memory_space<vmem>>, vector<512x128xbf16>
    %cst_33 = arith.constant dense<0.000000e+00> : vector<8x128xf32>
    %42 = tpu.matmul %40, %41, %cst_33 {dimension_numbers = #tpu.dot_dimension_numbers<[1], [0], [0], [1], [0, 0, 1, 1], [], []>} : vector<8x512xbf16>, vector<512x128xbf16>, vector<8x128xf32> -> vector<8x128xf32>
    %c0_34 = arith.constant 0 : index
    %c0_35 = arith.constant 0 : index
    %43 = vector.load %arg14[%c0_34, %c0_35] : memref<1x128xf32, #tpu.memory_space<vmem>>, vector<1x128xf32>
    %44 = vector.broadcast %43 : vector<1x128xf32> to vector<8x128xf32>
    %45 = arith.addf %42, %44 : vector<8x128xf32>
    %46 = arith.mulf %22, %45 : vector<8x128xf32>
    %cst_36 = arith.constant dense<0.000000e+00> : vector<8xf32>
    %47 = vector.multi_reduction <add>, %46, %cst_36 [1] : vector<8x128xf32> to vector<8xf32>
    %48 = vector.shape_cast %47 : vector<8xf32> to vector<8x1xf32>
    %49 = arith.negf %48 : vector<8x1xf32>
    %50 = math.exp %49 : vector<8x1xf32>
    %cst_37 = arith.constant 1.000000e+00 : f32
    %51 = vector.broadcast %cst_37 : f32 to vector<8x1xf32>
    %52 = arith.addf %51, %50 : vector<8x1xf32>
    %53 = arith.divf %51, %52 : vector<8x1xf32>
    %54 = tpu.transpose %53, [1, 0] : vector<8x1xf32> -> vector<1x8xf32>
    %55 = vector.shape_cast %54 : vector<1x8xf32> to vector<1x1x8xf32>
    %c0_38 = arith.constant 0 : index
    %c0_39 = arith.constant 0 : index
    %c0_40 = arith.constant 0 : index
    %56 = vector.load %arg15[%c0_38, %c0_39, %c0_40] : memref<1x1x8xf32, #tpu.memory_space<vmem>>, vector<1x1x8xf32>
    tpu.vector_store %arg15[%c0_38, %c0_39, %c0_40], %55 {strides = array<i32>} : memref<1x1x8xf32, #tpu.memory_space<vmem>>, vector<1x1x8xf32>,
    return
  }
  func.func @transform_0(%arg0: i32) -> (i32, i32) {
    %c0_i32 = arith.constant 0 : i32
    %c0_i32_0 = arith.constant 0 : i32
    return %arg0, %c0_i32 : i32, i32
  }
  func.func @transform_1(%arg0: i32) -> (i32, i32) {
    %c0_i32 = arith.constant 0 : i32
    %c0_i32_0 = arith.constant 0 : i32
    return %arg0, %c0_i32 : i32, i32
  }
  func.func @transform_2(%arg0: i32) -> (i32, i32) {
    %c0_i32 = arith.constant 0 : i32
    %c0_i32_0 = arith.constant 0 : i32
    %c0_i32_1 = arith.constant 0 : i32
    return %c0_i32, %c0_i32_0 : i32, i32
  }
  func.func @transform_3(%arg0: i32) -> (i32, i32) {
    %c0_i32 = arith.constant 0 : i32
    %c0_i32_0 = arith.constant 0 : i32
    %c0_i32_1 = arith.constant 0 : i32
    return %c0_i32, %c0_i32_0 : i32, i32
  }
  func.func @transform_4(%arg0: i32) -> (i32, i32) {
    %c0_i32 = arith.constant 0 : i32
    %c0_i32_0 = arith.constant 0 : i32
    %c0_i32_1 = arith.constant 0 : i32
    return %c0_i32, %c0_i32_0 : i32, i32
  }
  func.func @transform_5(%arg0: i32) -> (i32, i32) {
    %c0_i32 = arith.constant 0 : i32
    %c0_i32_0 = arith.constant 0 : i32
    %c0_i32_1 = arith.constant 0 : i32
    return %c0_i32, %c0_i32_0 : i32, i32
  }
  func.func @transform_6(%arg0: i32) -> (i32, i32) {
    %c0_i32 = arith.constant 0 : i32
    %c0_i32_0 = arith.constant 0 : i32
    %c0_i32_1 = arith.constant 0 : i32
    return %c0_i32, %c0_i32_0 : i32, i32
  }
  func.func @transform_7(%arg0: i32) -> (i32, i32) {
    %c0_i32 = arith.constant 0 : i32
    %c0_i32_0 = arith.constant 0 : i32
    %c0_i32_1 = arith.constant 0 : i32
    return %c0_i32, %c0_i32_0 : i32, i32
  }
  func.func @transform_8(%arg0: i32) -> (i32, i32) {
    %c0_i32 = arith.constant 0 : i32
    %c0_i32_0 = arith.constant 0 : i32
    %c0_i32_1 = arith.constant 0 : i32
    return %c0_i32, %c0_i32_0 : i32, i32
  }
  func.func @transform_9(%arg0: i32) -> (i32, i32) {
    %c0_i32 = arith.constant 0 : i32
    %c0_i32_0 = arith.constant 0 : i32
    %c0_i32_1 = arith.constant 0 : i32
    return %c0_i32, %c0_i32_0 : i32, i32
  }
  func.func @transform_10(%arg0: i32) -> (i32, i32) {
    %c0_i32 = arith.constant 0 : i32
    %c0_i32_0 = arith.constant 0 : i32
    %c0_i32_1 = arith.constant 0 : i32
    return %c0_i32, %c0_i32_0 : i32, i32
  }
  func.func @transform_11(%arg0: i32) -> (i32, i32) {
    %c0_i32 = arith.constant 0 : i32
    %c0_i32_0 = arith.constant 0 : i32
    %c0_i32_1 = arith.constant 0 : i32
    return %c0_i32, %c0_i32_0 : i32, i32
  }
  func.func @transform_12(%arg0: i32) -> (i32, i32) {
    %c0_i32 = arith.constant 0 : i32
    %c0_i32_0 = arith.constant 0 : i32
    %c0_i32_1 = arith.constant 0 : i32
    return %c0_i32, %c0_i32_0 : i32, i32
  }
  func.func @transform_13(%arg0: i32) -> (i32, i32) {
    %c0_i32 = arith.constant 0 : i32
    %c0_i32_0 = arith.constant 0 : i32
    %c0_i32_1 = arith.constant 0 : i32
    return %c0_i32, %c0_i32_0 : i32, i32
  }
  func.func @transform_14(%arg0: i32) -> (i32, i32, i32) {
    %c0_i32 = arith.constant 0 : i32
    %c0_i32_0 = arith.constant 0 : i32
    %c0_i32_1 = arith.constant 0 : i32
    return %arg0, %c0_i32, %c0_i32_0 : i32, i32, i32
  }
}

</mosaic_0001>

<bundles_post_ra>
// kernel: matching_net.1
= control target key start
LH: loop header
LB: loop body
LE: loop exit
PB: predicated region body
PF: predicated region fallthrough
CT: control target
= control target key end

     0   :  { %v7452_v8 = vmov 0   ;;  %s9897_s0 = inlined_call_operand.vmem [shape: f32[8,128], index: 0, kind: input, shape index: {}]   ;;  %s9898_s1 = inlined_call_operand.vmem [shape: f32[8,128], index: 1, kind: input, shape index: {}]   ;;  %s9899_s2 = inlined_call_operand.vmem [shape: bf16[128,1024], index: 2, kind: input, shape index: {}]   ;;  %s9900_s3 = inlined_call_operand.vmem [shape: f32[1,1024], index: 3, kind: input, shape index: {}]   ;;  %s9901_s4 = inlined_call_operand.vmem [shape: bf16[1024,512], index: 4, kind: input, shape index: {}]   ;;  %s9902_s5 = inlined_call_operand.vmem [shape: f32[1,512], index: 5, kind: input, shape index: {}]   ;;  %s9903_s6 = inlined_call_operand.vmem [shape: bf16[512,128], index: 6, kind: input, shape index: {}]   ;;  %s9904_s7 = inlined_call_operand.vmem [shape: f32[1,128], index: 7, kind: input, shape index: {}]   ;;  %s9905_s8 = inlined_call_operand.vmem [shape: bf16[128,1024], index: 8, kind: input, shape index: {}]   ;;  %s9906_s9 = inlined_call_operand.vmem [shape: f32[1,1024], index: 9, kind: input, shape index: {}]   ;;  %s9907_s10 = inlined_call_operand.vmem [shape: bf16[1024,512], index: 10, kind: input, shape index: {}]   ;;  %s9908_s11 = inlined_call_operand.vmem [shape: f32[1,512], index: 11, kind: input, shape index: {}]   ;;  %s9909_s12 = inlined_call_operand.vmem [shape: bf16[512,128], index: 12, kind: input, shape index: {}]   ;;  %s9910_s13 = inlined_call_operand.vmem [shape: f32[1,128], index: 13, kind: input, shape index: {}]   ;;  %s9911_s14 = inlined_call_operand.hbm [shape: f32[1,1,8], index: 14, kind: output, shape index: {}]  }
   0x1   :  { %v107_v0 = vld [vmem:[%s9899_s2 + $0x1c0] sm:$0xff]  ;;  %v108_v2 = vld [vmem:[%s9899_s2 + $0x1c8] sm:$0xff]  ;;  %509 = vmatprep.mubr.bf16.mxu0 %v7452_v8  ;;  %550 = vmatprep.mubr.bf16.mxu1 %v7452_v8  ;;  %v109_v62 = vld [vmem:[%s9899_s2 + $0x1d0] sm:$0xff] }
   0x2   :  { %v111_v1 = vld [vmem:[%s9899_s2 + $0x1e0] sm:$0xff]  ;;  %v112_v4 = vld [vmem:[%s9899_s2 + $0x1e8] sm:$0xff] }
   0x3   :  { %v5853_v3 = vcombine.high %v107_v0, %v111_v1  ;;  %v5852_v5 = vcombine.low %v107_v0, %v111_v1  ;;  %v99_v6 = vld [vmem:[%s9899_s2 + $0x180] sm:$0xff]  ;;  %v5855_v9 = vcombine.high %v108_v2, %v112_v4  ;;  %v5854_v10 = vcombine.low %v108_v2, %v112_v4  ;;  %v100_v12 = vld [vmem:[%s9899_s2 + $0x188] sm:$0xff]  ;;  %v113_v0 = vld [vmem:[%s9899_s2 + $0x1f0] sm:$0xff] }
   0x4   :  { %v103_v7 = vld [vmem:[%s9899_s2 + $0x1a0] sm:$0xff]  ;;  %v104_v13 = vld [vmem:[%s9899_s2 + $0x1a8] sm:$0xff]  ;;  %v110_v1 = vld [vmem:[%s9899_s2 + $0x1d8] sm:$0xff] }
   0x5   :  { %v5845_v11 = vcombine.high %v99_v6, %v103_v7  ;;  %v91_v14 = vld [vmem:[%s9899_s2 + $0x140] sm:$0xff]  ;;  %477 = vmatprep.subr.bf16.mxu0 %v5853_v3  ;;  %v5847_v15 = vcombine.high %v100_v12, %v104_v13  ;;  %v92_v17 = vld [vmem:[%s9899_s2 + $0x148] sm:$0xff]  ;;  %518 = vmatprep.subr.bf16.mxu1 %v5855_v9  ;;  %v5844_v19 = vcombine.low %v99_v6, %v103_v7  ;;  %v114_v2 = vld [vmem:[%s9899_s2 + $0x1f8] sm:$0xff] }
   0x6   :  { %v95_v16 = vld [vmem:[%s9899_s2 + $0x160] sm:$0xff]  ;;  %v96_v18 = vld [vmem:[%s9899_s2 + $0x168] sm:$0xff]  ;;  %478 = vmatpush1.bf16.msra.mxu0 %v5852_v5  ;;  %519 = vmatpush1.bf16.msra.mxu1 %v5854_v10  ;;  %v5846_v20 = vcombine.low %v100_v12, %v104_v13  ;;  %v5857_v6 = vcombine.high %v109_v62, %v113_v0  ;;  %v101_v7 = vld [vmem:[%s9899_s2 + $0x190] sm:$0xff]  ;;  %v5859_v9 = vcombine.high %v110_v1, %v114_v2 }
   0x7   :  { %479 = vmatprep.subr.bf16.mxu0 %v5845_v11  ;;  %v5837_v21 = vcombine.high %v91_v14, %v95_v16  ;;  %520 = vmatprep.subr.bf16.mxu1 %v5847_v15  ;;  %v5839_v22 = vcombine.high %v92_v17, %v96_v18  ;;  %v83_v23 = vld [vmem:[%s9899_s2 + $0x100] sm:$0xff]  ;;  %v84_v25 = vld [vmem:[%s9899_s2 + $0x108] sm:$0xff]  ;;  %v5836_v27 = vcombine.low %v91_v14, %v95_v16  ;;  %v105_v10 = vld [vmem:[%s9899_s2 + $0x1b0] sm:$0xff] }
   0x8   :  { %v87_v24 = vld [vmem:[%s9899_s2 + $0x120] sm:$0xff]  ;;  %v88_v26 = vld [vmem:[%s9899_s2 + $0x128] sm:$0xff]  ;;  %v5838_v28 = vcombine.low %v92_v17, %v96_v18  ;;  %v102_v11 = vld [vmem:[%s9899_s2 + $0x198] sm:$0xff]  ;;  %v5856_v14 = vcombine.low %v109_v62, %v113_v0  ;;  %v5858_v15 = vcombine.low %v110_v1, %v114_v2  ;;  %v5849_v16 = vcombine.high %v101_v7, %v105_v10 }
   0x9   :  { %v5829_v29 = vcombine.high %v83_v23, %v87_v24  ;;  %v5831_v30 = vcombine.high %v84_v25, %v88_v26  ;;  %v75_v31 = vld [vmem:[%s9899_s2 + $0xc0] sm:$0xff]  ;;  %v76_v33 = vld [vmem:[%s9899_s2 + $0xc8] sm:$0xff]  ;;  %v5828_v35 = vcombine.low %v83_v23, %v87_v24  ;;  %v5830_v36 = vcombine.low %v84_v25, %v88_v26  ;;  %v106_v13 = vld [vmem:[%s9899_s2 + $0x1b8] sm:$0xff] }
   0xa   :  { %480 = vmatpush1.bf16.msra.mxu0 %v5844_v19  ;;  %521 = vmatpush1.bf16.msra.mxu1 %v5846_v20  ;;  %v79_v32 = vld [vmem:[%s9899_s2 + $0xe0] sm:$0xff]  ;;  %v80_v34 = vld [vmem:[%s9899_s2 + $0xe8] sm:$0xff]  ;;  %v93_v17 = vld [vmem:[%s9899_s2 + $0x150] sm:$0xff]  ;;  %v5851_v18 = vcombine.high %v102_v11, %v106_v13  ;;  %v5850_v23 = vcombine.low %v102_v11, %v106_v13 }
   0xb   :  { %481 = vmatprep.subr.bf16.mxu0 %v5837_v21  ;;  %522 = vmatprep.subr.bf16.mxu1 %v5839_v22  ;;  %v5821_v37 = vcombine.high %v75_v31, %v79_v32  ;;  %v5823_v38 = vcombine.high %v76_v33, %v80_v34  ;;  %v67_v39 = vld [vmem:[%s9899_s2 + $0x80] sm:$0xff]  ;;  %v68_v41 = vld [vmem:[%s9899_s2 + $0x88] sm:$0xff]  ;;  %v5820_v43 = vcombine.low %v75_v31, %v79_v32  ;;  %v97_v19 = vld [vmem:[%s9899_s2 + $0x170] sm:$0xff] }
   0xc   :  { %v71_v40 = vld [vmem:[%s9899_s2 + $0xa0] sm:$0xff]  ;;  %v72_v42 = vld [vmem:[%s9899_s2 + $0xa8] sm:$0xff]  ;;  %v5822_v44 = vcombine.low %v76_v33, %v80_v34  ;;  %v94_v20 = vld [vmem:[%s9899_s2 + $0x158] sm:$0xff]  ;;  %v5848_v22 = vcombine.low %v101_v7, %v105_v10  ;;  %v5841_v24 = vcombine.high %v93_v17, %v97_v19 }
   0xd   :  { %v5813_v45 = vcombine.high %v67_v39, %v71_v40  ;;  %v5815_v46 = vcombine.high %v68_v41, %v72_v42  ;;  %v59_v47 = vld [vmem:[%s9899_s2 + $0x40] sm:$0xff]  ;;  %v60_v49 = vld [vmem:[%s9899_s2 + $0x48] sm:$0xff]  ;;  %v5812_v51 = vcombine.low %v67_v39, %v71_v40  ;;  %v5814_v52 = vcombine.low %v68_v41, %v72_v42  ;;  %v98_v21 = vld [vmem:[%s9899_s2 + $0x178] sm:$0xff] }
   0xe   :  { %482 = vmatpush1.bf16.msra.mxu0 %v5836_v27  ;;  %523 = vmatpush1.bf16.msra.mxu1 %v5838_v28  ;;  %v63_v48 = vld [vmem:[%s9899_s2 + $0x60] sm:$0xff]  ;;  %v64_v50 = vld [vmem:[%s9899_s2 + $0x68] sm:$0xff]  ;;  %v85_v25 = vld [vmem:[%s9899_s2 + $0x110] sm:$0xff]  ;;  %v5843_v26 = vcombine.high %v94_v20, %v98_v21  ;;  %v5842_v31 = vcombine.low %v94_v20, %v98_v21 }
   0xf   :  { %483 = vmatprep.subr.bf16.mxu0 %v5829_v29  ;;  %524 = vmatprep.subr.bf16.mxu1 %v5831_v30  ;;  %v5805_v53 = vcombine.high %v59_v47, %v63_v48  ;;  %v51_v54 = vld [vmem:[%s9899_s2] sm:$0xff]  ;;  %v5807_v55 = vcombine.high %v60_v49, %v64_v50  ;;  %v52_v57 = vld [vmem:[%s9899_s2 + $0x8] sm:$0xff]  ;;  %v5804_v59 = vcombine.low %v59_v47, %v63_v48  ;;  %v89_v27 = vld [vmem:[%s9899_s2 + $0x130] sm:$0xff] }
  0x10   :  { %v55_v56 = vld [vmem:[%s9899_s2 + $0x20] sm:$0xff]  ;;  %v56_v58 = vld [vmem:[%s9899_s2 + $0x28] sm:$0xff]  ;;  %v5806_v60 = vcombine.low %v60_v49, %v64_v50  ;;  %v86_v28 = vld [vmem:[%s9899_s2 + $0x118] sm:$0xff]  ;;  %v5840_v30 = vcombine.low %v93_v17, %v97_v19  ;;  %v5833_v32 = vcombine.high %v85_v25, %v89_v27 }
  0x11   :  { %v5797_v61 = vcombine.high %v51_v54, %v55_v56  ;;  %v5799_v63 = vcombine.high %v52_v57, %v56_v58  ;;  %v5796_v3 = vcombine.low %v51_v54, %v55_v56  ;;  %v49_v4 = vld [vmem:[%s9897_s0] sm:$0xff]  ;;  %v5798_v5 = vcombine.low %v52_v57, %v56_v58  ;;  %v90_v29 = vld [vmem:[%s9899_s2 + $0x138] sm:$0xff]  ;;  %v77_v33 = vld [vmem:[%s9899_s2 + $0xd0] sm:$0xff] }
  0x12   :  { %484 = vmatpush1.bf16.msra.mxu0 %v5828_v35  ;;  %525 = vmatpush1.bf16.msra.mxu1 %v5830_v36  ;;  %v7651_v12 = vpack.c.bf16 %v49_v4, %v49_v4  ;;  %v5835_v34 = vcombine.high %v86_v28, %v90_v29  ;;  %v81_v35 = vld [vmem:[%s9899_s2 + $0xf0] sm:$0xff]  ;;  %v78_v36 = vld [vmem:[%s9899_s2 + $0xd8] sm:$0xff]  ;;  %v5834_v39 = vcombine.low %v86_v28, %v90_v29 }
  0x13   :  { %485 = vmatprep.subr.bf16.mxu0 %v5821_v37  ;;  %526 = vmatprep.subr.bf16.mxu1 %v5823_v38  ;;  %v82_v37 = vld [vmem:[%s9899_s2 + $0xf8] sm:$0xff]  ;;  %v5832_v38 = vcombine.low %v85_v25, %v89_v27  ;;  %v5825_v40 = vcombine.high %v77_v33, %v81_v35  ;;  %v69_v41 = vld [vmem:[%s9899_s2 + $0x90] sm:$0xff] }
  0x14   :  { %v5827_v42 = vcombine.high %v78_v36, %v82_v37  ;;  %v5826_v47 = vcombine.low %v78_v36, %v82_v37  ;;  %v61_v49 = vld [vmem:[%s9899_s2 + $0x50] sm:$0xff] }
  0x15   :  { %v53_v57 = vld [vmem:[%s9899_s2 + $0x10] sm:$0xff] }
  0x16   :  { %486 = vmatpush1.bf16.msra.mxu0 %v5820_v43  ;;  %527 = vmatpush1.bf16.msra.mxu1 %v5822_v44  ;;  %v73_v43 = vld [vmem:[%s9899_s2 + $0xb0] sm:$0xff]  ;;  %v70_v44 = vld [vmem:[%s9899_s2 + $0x98] sm:$0xff] }
  0x17   :  { %487 = vmatprep.subr.bf16.mxu0 %v5813_v45  ;;  %528 = vmatprep.subr.bf16.mxu1 %v5815_v46  ;;  %v74_v45 = vld [vmem:[%s9899_s2 + $0xb8] sm:$0xff]  ;;  %v5824_v46 = vcombine.low %v77_v33, %v81_v35  ;;  %v5817_v48 = vcombine.high %v69_v41, %v73_v43  ;;  %v5816_v54 = vcombine.low %v69_v41, %v73_v43  ;;  %v6596_v2 = vld [vmem:[%s9901_s4 + $0xe4] ss:$16 sps:$4 sm:$0xff]   ;;  %v6597_v7 = vld [vmem:[%s9901_s4 + $0x2e0] ss:$16 sps:$4 sm:$0xff]  }
  0x18   :  { %v5819_v50 = vcombine.high %v70_v44, %v74_v45  ;;  %v6599_v4 = vld [vmem:[%s9901_s4 + $0x2e4] ss:$16 sps:$4 sm:$0xff]   ;;  %v6600_v11 = vld [vmem:[%s9901_s4 + $0xc0] ss:$16 sps:$4 sm:$0xff]  }
  0x19   :  { %v6605_v10 = vld [vmem:[%s9901_s4 + $0x2c4] ss:$16 sps:$4 sm:$0xff]   ;;  %v6603_v13 = vld [vmem:[%s9901_s4 + $0x2c0] ss:$16 sps:$4 sm:$0xff]  }
  0x1a   :  { %488 = vmatpush1.bf16.msra.mxu0 %v5812_v51  ;;  %529 = vmatpush1.bf16.msra.mxu1 %v5814_v52  ;;  %v65_v51 = vld [vmem:[%s9899_s2 + $0x70] sm:$0xff]  ;;  %v62_v52 = vld [vmem:[%s9899_s2 + $0x58] sm:$0xff] }
  0x1b   :  { %489 = vmatprep.subr.bf16.mxu0 %v5805_v53  ;;  %530 = vmatprep.subr.bf16.mxu1 %v5807_v55  ;;  %v66_v53 = vld [vmem:[%s9899_s2 + $0x78] sm:$0xff]  ;;  %v5818_v55 = vcombine.low %v70_v44, %v74_v45  ;;  %v5809_v56 = vcombine.high %v61_v49, %v65_v51  ;;  %v5808_v62 = vcombine.low %v61_v49, %v65_v51  ;;  %v6609_v17 = vld [vmem:[%s9901_s4 + $0x2a0] ss:$16 sps:$4 sm:$0xff]   ;;  %v6620_v21 = vld [vmem:[%s9901_s4 + $0x64] ss:$16 sps:$4 sm:$0xff]  }
  0x1c   :  { %v5811_v58 = vcombine.high %v62_v52, %v66_v53  ;;  %v6612_v19 = vld [vmem:[%s9901_s4 + $0x80] ss:$16 sps:$4 sm:$0xff]   ;;  %v6626_v25 = vld [vmem:[%s9901_s4 + $0x44] ss:$16 sps:$4 sm:$0xff]  }
  0x1d   :  { %v6615_v20 = vld [vmem:[%s9901_s4 + $0x280] ss:$16 sps:$4 sm:$0xff]   ;;  %v6632_v29 = vld [vmem:[%s9901_s4 + $0x24] ss:$16 sps:$4 sm:$0xff]  }
  0x1e   :  { %490 = vmatpush1.bf16.msra.mxu0 %v5804_v59  ;;  %531 = vmatpush1.bf16.msra.mxu1 %v5806_v60  ;;  %v57_v59 = vld [vmem:[%s9899_s2 + $0x30] sm:$0xff]  ;;  %v54_v60 = vld [vmem:[%s9899_s2 + $0x18] sm:$0xff] }
  0x1f   :  { %491 = vmatprep.subr.bf16.mxu0 %v5797_v61  ;;  %532 = vmatprep.subr.bf16.mxu1 %v5799_v63  ;;  %v58_v61 = vld [vmem:[%s9899_s2 + $0x38] sm:$0xff]  ;;  %v5810_v63 = vcombine.low %v62_v52, %v66_v53  ;;  %v5801_v0 = vcombine.high %v53_v57, %v57_v59  ;;  %v6624_v27 = vld [vmem:[%s9901_s4 + $0x40] ss:$16 sps:$4 sm:$0xff]   ;;  %v6638_v33 = vld [vmem:[%s9901_s4 + $0x4] ss:$16 sps:$4 sm:$0xff]  }
  0x20   :  { %v5803_v1 = vcombine.high %v54_v60, %v58_v61  ;;  %v6627_v28 = vld [vmem:[%s9901_s4 + $0x240] ss:$16 sps:$4 sm:$0xff]   ;;  %v6644_v37 = vld [vmem:[%s9901_s4 + $0x1e4] ss:$16 sps:$4 sm:$0xff]  }
  0x21   :  { %v6636_v35 = vld [vmem:[%s9901_s4] ss:$16 sps:$4 sm:$0xff]   ;;  %v6650_v41 = vld [vmem:[%s9901_s4 + $0x1c4] ss:$16 sps:$4 sm:$0xff]  }
  0x22   :  { %492 = vmatpush1.bf16.msra.mxu0 %v5796_v3  ;;  %533 = vmatpush1.bf16.msra.mxu1 %v5798_v5  ;;  %v5800_v3 = vcombine.low %v53_v57, %v57_v59  ;;  %v5802_v5 = vcombine.low %v54_v60, %v58_v61  ;;  %v6639_v36 = vld [vmem:[%s9901_s4 + $0x200] ss:$16 sps:$4 sm:$0xff]   ;;  %v6656_v45 = vld [vmem:[%s9901_s4 + $0x1a4] ss:$16 sps:$4 sm:$0xff]  }
  0x23   :  { %559 = vmatprep.subr.bf16.mxu0 %v5857_v6  ;;  %600 = vmatprep.subr.bf16.mxu1 %v5859_v9  ;;  %v6594_v6 = vld [vmem:[%s9901_s4 + $0xe0] ss:$16 sps:$4 sm:$0xff]   ;;  %v6602_v9 = vld [vmem:[%s9901_s4 + $0xc4] ss:$16 sps:$4 sm:$0xff]  }
  0x24   :  { %v6648_v43 = vld [vmem:[%s9901_s4 + $0x1c0] ss:$16 sps:$4 sm:$0xff]   ;;  %v6662_v49 = vld [vmem:[%s9901_s4 + $0x184] ss:$16 sps:$4 sm:$0xff]  }
  0x25   :  { %510 = vmatmul.mubr.bf16.vlgmr.msra.gmra.mxu0 %v7651_v12  ;;  %551 = vmatmul.mubr.bf16.vlgmr.msra.gmra.mxu1 %v7651_v12  ;;  %v6651_v44 = vld [vmem:[%s9901_s4 + $0x3c0] ss:$16 sps:$4 sm:$0xff]   ;;  %v6668_v53 = vld [vmem:[%s9901_s4 + $0x164] ss:$16 sps:$4 sm:$0xff]  }
  0x26   :  { %560 = vmatpush1.bf16.msra.mxu0 %v5856_v14  ;;  %601 = vmatpush1.bf16.msra.mxu1 %v5858_v15  ;;  %v6608_v14 = vld [vmem:[%s9901_s4 + $0xa4] ss:$16 sps:$4 sm:$0xff]   ;;  %v6660_v51 = vld [vmem:[%s9901_s4 + $0x180] ss:$16 sps:$4 sm:$0xff]  }
  0x27   :  { %561 = vmatprep.subr.bf16.mxu0 %v5849_v16  ;;  %602 = vmatprep.subr.bf16.mxu1 %v5851_v18  ;;  %v6611_v15 = vld [vmem:[%s9901_s4 + $0x2a4] ss:$16 sps:$4 sm:$0xff]   ;;  %v6606_v16 = vld [vmem:[%s9901_s4 + $0xa0] ss:$16 sps:$4 sm:$0xff]  }
  0x28   :  { %591 = vmatprep.mubr.bf16.mxu0 %v7452_v8  ;;  %632 = vmatprep.mubr.bf16.mxu1 %v7452_v8  ;;  %v6617_v18 = vld [vmem:[%s9901_s4 + $0x284] ss:$16 sps:$4 sm:$0xff]   ;;  %v6663_v52 = vld [vmem:[%s9901_s4 + $0x380] ss:$16 sps:$4 sm:$0xff]  }
  0x29   :  { %v6674_v57 = vld [vmem:[%s9901_s4 + $0x144] ss:$16 sps:$4 sm:$0xff]   ;;  %v6672_v59 = vld [vmem:[%s9901_s4 + $0x140] ss:$16 sps:$4 sm:$0xff]  }
  0x2a   :  { %562 = vmatpush1.bf16.msra.mxu0 %v5848_v22  ;;  %603 = vmatpush1.bf16.msra.mxu1 %v5850_v23  ;;  %v6623_v22 = vld [vmem:[%s9901_s4 + $0x264] ss:$16 sps:$4 sm:$0xff]   ;;  %v6618_v23 = vld [vmem:[%s9901_s4 + $0x60] ss:$16 sps:$4 sm:$0xff]  }
  0x2b   :  { %563 = vmatprep.subr.bf16.mxu0 %v5841_v24  ;;  %604 = vmatprep.subr.bf16.mxu1 %v5843_v26  ;;  %v6621_v24 = vld [vmem:[%s9901_s4 + $0x260] ss:$16 sps:$4 sm:$0xff]   ;;  %v6629_v26 = vld [vmem:[%s9901_s4 + $0x244] ss:$16 sps:$4 sm:$0xff]  }
  0x2c   :  { %v6675_v60 = vld [vmem:[%s9901_s4 + $0x340] ss:$16 sps:$4 sm:$0xff]   ;;  %v6680_v61 = vld [vmem:[%s9901_s4 + $0x124] ss:$16 sps:$4 sm:$0xff]  }
  0x2e   :  { %564 = vmatpush1.bf16.msra.mxu0 %v5840_v30  ;;  %605 = vmatpush1.bf16.msra.mxu1 %v5842_v31  ;;  %v6635_v30 = vld [vmem:[%s9901_s4 + $0x224] ss:$16 sps:$4 sm:$0xff]   ;;  %v6630_v31 = vld [vmem:[%s9901_s4 + $0x20] ss:$16 sps:$4 sm:$0xff]  }
  0x2f   :  { %565 = vmatprep.subr.bf16.mxu0 %v5833_v32  ;;  %606 = vmatprep.subr.bf16.mxu1 %v5835_v34  ;;  %v6633_v32 = vld [vmem:[%s9901_s4 + $0x220] ss:$16 sps:$4 sm:$0xff]   ;;  %v6641_v34 = vld [vmem:[%s9901_s4 + $0x204] ss:$16 sps:$4 sm:$0xff]  }
  0x32   :  { %566 = vmatpush1.bf16.msra.mxu0 %v5832_v38  ;;  %607 = vmatpush1.bf16.msra.mxu1 %v5834_v39  ;;  %v6647_v38 = vld [vmem:[%s9901_s4 + $0x3e4] ss:$16 sps:$4 sm:$0xff]   ;;  %v6642_v39 = vld [vmem:[%s9901_s4 + $0x1e0] ss:$16 sps:$4 sm:$0xff]  }
  0x33   :  { %567 = vmatprep.subr.bf16.mxu0 %v5825_v40  ;;  %608 = vmatprep.subr.bf16.mxu1 %v5827_v42  ;;  %v6645_v40 = vld [vmem:[%s9901_s4 + $0x3e0] ss:$16 sps:$4 sm:$0xff]   ;;  %v6653_v42 = vld [vmem:[%s9901_s4 + $0x3c4] ss:$16 sps:$4 sm:$0xff]  }
  0x36   :  { %568 = vmatpush1.bf16.msra.mxu0 %v5824_v46  ;;  %609 = vmatpush1.bf16.msra.mxu1 %v5826_v47  ;;  %v6659_v46 = vld [vmem:[%s9901_s4 + $0x3a4] ss:$16 sps:$4 sm:$0xff]   ;;  %v6654_v47 = vld [vmem:[%s9901_s4 + $0x1a0] ss:$16 sps:$4 sm:$0xff]  }
  0x37   :  { %569 = vmatprep.subr.bf16.mxu0 %v5817_v48  ;;  %610 = vmatprep.subr.bf16.mxu1 %v5819_v50  ;;  %v6657_v48 = vld [vmem:[%s9901_s4 + $0x3a0] ss:$16 sps:$4 sm:$0xff]   ;;  %v6665_v50 = vld [vmem:[%s9901_s4 + $0x384] ss:$16 sps:$4 sm:$0xff]  }
  0x3a   :  { %570 = vmatpush1.bf16.msra.mxu0 %v5816_v54  ;;  %611 = vmatpush1.bf16.msra.mxu1 %v5818_v55  ;;  %v6671_v54 = vld [vmem:[%s9901_s4 + $0x364] ss:$16 sps:$4 sm:$0xff]   ;;  %v6666_v55 = vld [vmem:[%s9901_s4 + $0x160] ss:$16 sps:$4 sm:$0xff]  }
  0x3b   :  { %571 = vmatprep.subr.bf16.mxu0 %v5809_v56  ;;  %612 = vmatprep.subr.bf16.mxu1 %v5811_v58  ;;  %v6669_v56 = vld [vmem:[%s9901_s4 + $0x360] ss:$16 sps:$4 sm:$0xff]   ;;  %v6677_v58 = vld [vmem:[%s9901_s4 + $0x344] ss:$16 sps:$4 sm:$0xff]  }
  0x3e   :  { %572 = vmatpush1.bf16.msra.mxu0 %v5808_v62  ;;  %613 = vmatpush1.bf16.msra.mxu1 %v5810_v63  ;;  %v6683_v62 = vld [vmem:[%s9901_s4 + $0x324] ss:$16 sps:$4 sm:$0xff]   ;;  %v6678_v63 = vld [vmem:[%s9901_s4 + $0x120] ss:$16 sps:$4 sm:$0xff]  }
  0x3f   :  { %573 = vmatprep.subr.bf16.mxu0 %v5801_v0  ;;  %614 = vmatprep.subr.bf16.mxu1 %v5803_v1  ;;  %v6681_v0 = vld [vmem:[%s9901_s4 + $0x320] ss:$16 sps:$4 sm:$0xff]   ;;  %v6686_v1 = vld [vmem:[%s9901_s4 + $0x104] ss:$16 sps:$4 sm:$0xff]  }
  0x42   :  { %574 = vmatpush1.bf16.msra.mxu0 %v5800_v3  ;;  %615 = vmatpush1.bf16.msra.mxu1 %v5802_v5  ;;  %v6684_v3 = vld [vmem:[%s9901_s4 + $0x100] ss:$16 sps:$4 sm:$0xff]   ;;  %v6692_v5 = vld [vmem:[%s9901_s4 + $0x4e4] ss:$16 sps:$4 sm:$0xff]  }
  0x43   :  { %2215 = vmatprep.subr.bf16.mxu0 %v6596_v2  ;;  %2256 = vmatprep.subr.bf16.mxu1 %v6599_v4  ;;  %v6689_v2 = vld [vmem:[%s9901_s4 + $0x304] ss:$16 sps:$4 sm:$0xff]   ;;  %v6687_v4 = vld [vmem:[%s9901_s4 + $0x300] ss:$16 sps:$4 sm:$0xff]  }
  0x45   :  { %592 = vmatmul.mubr.bf16.vlgmr.msra.gmra.mxu0 %v7651_v12  ;;  %633 = vmatmul.mubr.bf16.vlgmr.msra.gmra.mxu1 %v7651_v12  ;;  %v6614_v12 = vld [vmem:[%s9901_s4 + $0x84] ss:$16 sps:$4 sm:$0xff]  }
  0x46   :  { %2216 = vmatpush1.bf16.msra.mxu0 %v6594_v6  ;;  %2257 = vmatpush1.bf16.msra.mxu1 %v6597_v7  ;;  %v6695_v6 = vld [vmem:[%s9901_s4 + $0x6e4] ss:$16 sps:$4 sm:$0xff]   ;;  %v117_v7 = vlaneseq }
  0x47   :  { %2217 = vmatprep.subr.bf16.mxu0 %v6602_v9  ;;  %2258 = vmatprep.subr.bf16.mxu1 %v6605_v10  ;;  %v7937_v10 = vld [vmem:[%s9900_s3] sm:$0xff] }
  0x48   :  { %v7932_v9 = vshrl.u32 %v117_v7, 7  ;;  %v6732_v7 = vld [vmem:[%s9901_s4 + $0x400] ss:$16 sps:$4 sm:$0xff]  }
  0x4a   :  { %2218 = vmatpush1.bf16.msra.mxu0 %v6600_v11  ;;  %2259 = vmatpush1.bf16.msra.mxu1 %v6603_v13  ;;  %v7940_v11 = vsub.s32 0, %v7932_v9  ;;  %v7943_v13 = vsub.s32 2, %v7932_v9 }
  0x4b   :  { %2219 = vmatprep.subr.bf16.mxu0 %v6608_v14  ;;  %2260 = vmatprep.subr.bf16.mxu1 %v6611_v15  ;;  %v7946_v14 = vsub.s32 1, %v7932_v9  ;;  %v7949_v15 = vsub.s32 3, %v7932_v9 }
  0x4e   :  { %2220 = vmatpush1.bf16.msra.mxu0 %v6606_v16  ;;  %2261 = vmatpush1.bf16.msra.mxu1 %v6609_v17  ;;  %v120_v16 = vrot.slane %v7937_v10, %v7940_v11  ;;  %v128_v17 = vrot.slane %v7937_v10, %v7943_v13 }
  0x4f   :  { %2221 = vmatprep.subr.bf16.mxu0 %v6614_v12  ;;  %2262 = vmatprep.subr.bf16.mxu1 %v6617_v18  ;;  %v124_v12 = vrot.slane %v7937_v10, %v7946_v14 }
  0x52   :  { %2222 = vmatpush1.bf16.msra.mxu0 %v6612_v19  ;;  %2263 = vmatpush1.bf16.msra.mxu1 %v6615_v20  ;;  %v132_v19 = vrot.slane %v7937_v10, %v7949_v15 }
  0x53   :  { %2223 = vmatprep.subr.bf16.mxu0 %v6620_v21  ;;  %2264 = vmatprep.subr.bf16.mxu1 %v6623_v22 }
  0x56   :  { %2224 = vmatpush1.bf16.msra.mxu0 %v6618_v23  ;;  %2265 = vmatpush1.bf16.msra.mxu1 %v6621_v24 }
  0x57   :  { %2225 = vmatprep.subr.bf16.mxu0 %v6626_v25  ;;  %2266 = vmatprep.subr.bf16.mxu1 %v6629_v26 }
  0x5a   :  { %2226 = vmatpush1.bf16.msra.mxu0 %v6624_v27  ;;  %2267 = vmatpush1.bf16.msra.mxu1 %v6627_v28 }
  0x5b   :  { %2227 = vmatprep.subr.bf16.mxu0 %v6632_v29  ;;  %2268 = vmatprep.subr.bf16.mxu1 %v6635_v30 }
  0x5e   :  { %2228 = vmatpush1.bf16.msra.mxu0 %v6630_v31  ;;  %2269 = vmatpush1.bf16.msra.mxu1 %v6633_v32  ;;  %v6690_v32 = vld [vmem:[%s9901_s4 + $0x4e0] ss:$16 sps:$4 sm:$0xff]  }
  0x5f   :  { %2229 = vmatprep.subr.bf16.mxu0 %v6638_v33  ;;  %2270 = vmatprep.subr.bf16.mxu1 %v6641_v34 }
  0x62   :  { %2230 = vmatpush1.bf16.msra.mxu0 %v6636_v35  ;;  %2271 = vmatpush1.bf16.msra.mxu1 %v6639_v36  ;;  %v6693_v35 = vld [vmem:[%s9901_s4 + $0x6e0] ss:$16 sps:$4 sm:$0xff]   ;;  %v6698_v36 = vld [vmem:[%s9901_s4 + $0x4c4] ss:$16 sps:$4 sm:$0xff]  }
  0x63   :  { %2231 = vmatprep.subr.bf16.mxu0 %v6644_v37  ;;  %2272 = vmatprep.subr.bf16.mxu1 %v6647_v38 }
  0x66   :  { %2232 = vmatpush2.bf16.msra.mxu0 %v6642_v39  ;;  %2273 = vmatpush2.bf16.msra.mxu1 %v6645_v40  ;;  %v6701_v40 = vld [vmem:[%s9901_s4 + $0x6c4] ss:$16 sps:$4 sm:$0xff]  }
  0x67   :  { %2233 = vmatprep.subr.bf16.mxu0 %v6650_v41  ;;  %2274 = vmatprep.subr.bf16.mxu1 %v6653_v42 }
  0x6a   :  { %2234 = vmatpush2.bf16.msra.mxu0 %v6648_v43  ;;  %2275 = vmatpush2.bf16.msra.mxu1 %v6651_v44  ;;  %v6696_v43 = vld [vmem:[%s9901_s4 + $0x4c0] ss:$16 sps:$4 sm:$0xff]  }
  0x6b   :  { %2235 = vmatprep.subr.bf16.mxu0 %v6656_v45  ;;  %2276 = vmatprep.subr.bf16.mxu1 %v6659_v46  ;;  %v6699_v44 = vld [vmem:[%s9901_s4 + $0x6c0] ss:$16 sps:$4 sm:$0xff]   ;;  %v6704_v45 = vld [vmem:[%s9901_s4 + $0x4a4] ss:$16 sps:$4 sm:$0xff]  }
  0x6c   :  { %v6707_v46 = vld [vmem:[%s9901_s4 + $0x6a4] ss:$16 sps:$4 sm:$0xff]  }
  0x6e   :  { %2236 = vmatpush2.bf16.msra.mxu0 %v6654_v47  ;;  %2277 = vmatpush2.bf16.msra.mxu1 %v6657_v48  ;;  %v6702_v47 = vld [vmem:[%s9901_s4 + $0x4a0] ss:$16 sps:$4 sm:$0xff]  }
  0x6f   :  { %2237 = vmatprep.subr.bf16.mxu0 %v6662_v49  ;;  %2278 = vmatprep.subr.bf16.mxu1 %v6665_v50  ;;  %v6705_v48 = vld [vmem:[%s9901_s4 + $0x6a0] ss:$16 sps:$4 sm:$0xff]   ;;  %v6710_v49 = vld [vmem:[%s9901_s4 + $0x484] ss:$16 sps:$4 sm:$0xff]  }
  0x70   :  { %v6708_v50 = vld [vmem:[%s9901_s4 + $0x480] ss:$16 sps:$4 sm:$0xff]  }
  0x72   :  { %2238 = vmatpush2.bf16.msra.mxu0 %v6660_v51  ;;  %2279 = vmatpush2.bf16.msra.mxu1 %v6663_v52  ;;  %v6713_v51 = vld [vmem:[%s9901_s4 + $0x684] ss:$16 sps:$4 sm:$0xff]   ;;  %v6711_v52 = vld [vmem:[%s9901_s4 + $0x680] ss:$16 sps:$4 sm:$0xff]  }
  0x73   :  { %2239 = vmatprep.subr.bf16.mxu0 %v6668_v53  ;;  %2280 = vmatprep.subr.bf16.mxu1 %v6671_v54  ;;  %v6716_v53 = vld [vmem:[%s9901_s4 + $0x464] ss:$16 sps:$4 sm:$0xff]   ;;  %v6714_v54 = vld [vmem:[%s9901_s4 + $0x460] ss:$16 sps:$4 sm:$0xff]  }
  0x76   :  { %2240 = vmatpush2.bf16.msra.mxu0 %v6666_v55  ;;  %2281 = vmatpush2.bf16.msra.mxu1 %v6669_v56  ;;  %v6719_v55 = vld [vmem:[%s9901_s4 + $0x664] ss:$16 sps:$4 sm:$0xff]   ;;  %v6717_v56 = vld [vmem:[%s9901_s4 + $0x660] ss:$16 sps:$4 sm:$0xff]  }
  0x77   :  { %2241 = vmatprep.subr.bf16.mxu0 %v6674_v57  ;;  %2282 = vmatprep.subr.bf16.mxu1 %v6677_v58  ;;  %v6722_v57 = vld [vmem:[%s9901_s4 + $0x444] ss:$16 sps:$4 sm:$0xff]   ;;  %v6720_v58 = vld [vmem:[%s9901_s4 + $0x440] ss:$16 sps:$4 sm:$0xff]  }
  0x7a   :  { %2242 = vmatpush2.bf16.msra.mxu0 %v6672_v59  ;;  %2283 = vmatpush2.bf16.msra.mxu1 %v6675_v60  ;;  %v6725_v59 = vld [vmem:[%s9901_s4 + $0x644] ss:$16 sps:$4 sm:$0xff]   ;;  %v139_v60 = vsub.s32 5, %v7932_v9 }
  0x7b   :  { %2243 = vmatprep.subr.bf16.mxu0 %v6680_v61  ;;  %2284 = vmatprep.subr.bf16.mxu1 %v6683_v62  ;;  %v6723_v61 = vld [vmem:[%s9901_s4 + $0x640] ss:$16 sps:$4 sm:$0xff]   ;;  %v6728_v62 = vld [vmem:[%s9901_s4 + $0x424] ss:$16 sps:$4 sm:$0xff]  }
  0x7e   :  { %2244 = vmatpush2.bf16.msra.mxu0 %v6678_v63  ;;  %2285 = vmatpush2.bf16.msra.mxu1 %v6681_v0  ;;  %v147_v63 = vsub.s32 7, %v7932_v9  ;;  %v6726_v0 = vld [vmem:[%s9901_s4 + $0x420] ss:$16 sps:$4 sm:$0xff]  }
  0x7f   :  { %2245 = vmatprep.subr.bf16.mxu0 %v6686_v1  ;;  %2286 = vmatprep.subr.bf16.mxu1 %v6689_v2  ;;  %v6731_v1 = vld [vmem:[%s9901_s4 + $0x624] ss:$16 sps:$4 sm:$0xff]   ;;  %v140_v2 = vrot.slane %v7937_v10, %v139_v60 }
  0x82   :  { %2246 = vmatpush2.bf16.msra.mxu0 %v6684_v3  ;;  %2287 = vmatpush2.bf16.msra.mxu1 %v6687_v4  ;;  %v6729_v3 = vld [vmem:[%s9901_s4 + $0x620] ss:$16 sps:$4 sm:$0xff]   ;;  %v6734_v4 = vld [vmem:[%s9901_s4 + $0x404] ss:$16 sps:$4 sm:$0xff]  }
  0x83   :  { %2297 = vmatprep.subr.bf16.mxu0 %v6692_v5  ;;  %2338 = vmatprep.subr.bf16.mxu1 %v6695_v6  ;;  %v148_v6 = vrot.slane %v7937_v10, %v147_v63 }
  0xe5   :  { %v511_v18 = vpop.f32.mrf.mxu0  ;;  %v552_v21 = vpop.f32.mrf.mxu1 }
  0xe6   :  { %v512_v20 = vadd.f32 %v511_v18, %v120_v16  ;;  %v553_v22 = vadd.f32 %v552_v21, %v128_v17  ;;  %v6737_v16 = vld [vmem:[%s9901_s4 + $0x604] ss:$16 sps:$4 sm:$0xff]  }
  0xe7   :  { %v513_v23 = vpop.f32.mrf.mxu0  ;;  %v554_v25 = vpop.f32.mrf.mxu1  ;;  %v6740_v21 = vld [vmem:[%s9901_s4 + $0x5e4] ss:$16 sps:$4 sm:$0xff]  }
  0xe8   :  { %v514_v24 = vadd.f32 %v513_v23, %v124_v12  ;;  %v641_v26 = vmax.f32 %v512_v20, 0.0  ;;  %v643_v27 = vmax.f32 %v553_v22, 0.0  ;;  %v555_v28 = vadd.f32 %v554_v25, %v132_v19  ;;  %v6735_v20 = vld [vmem:[%s9901_s4 + $0x600] ss:$16 sps:$4 sm:$0xff]   ;;  %v6743_v25 = vld [vmem:[%s9901_s4 + $0x7e4] ss:$16 sps:$4 sm:$0xff]  }
  0xe9   :  { %v515_v29 = vpop.f32.mrf.mxu0  ;;  %v556_v31 = vpop.f32.mrf.mxu1 }
  0xea   :  { %v642_v30 = vmax.f32 %v514_v24, 0.0  ;;  %v644_v33 = vmax.f32 %v555_v28, 0.0  ;;  %v7968_v37 = vpack.c.bf16 %v643_v27, %v643_v27  ;;  %v7975_v41 = vpack.c.bf16 %v641_v26, %v641_v26  ;;  %v6738_v24 = vld [vmem:[%s9901_s4 + $0x5e0] ss:$16 sps:$4 sm:$0xff]  }
  0xeb   :  { %v516_v34 = vpop.f32.mrf.mxu0  ;;  %v557_v39 = vpop.f32.mrf.mxu1 }
  0xec   :  { %v7970_v38 = vpack.c.bf16 %v642_v30, %v642_v30  ;;  %v7977_v42 = vpack.c.bf16 %v644_v33, %v644_v33  ;;  %v6746_v33 = vld [vmem:[%s9901_s4 + $0x5c4] ss:$16 sps:$4 sm:$0xff]   ;;  %v6747_v39 = vld [vmem:[%s9901_s4 + $0x7c0] ss:$16 sps:$4 sm:$0xff]  }
  0xee   :  { %2247 = vmatprep.mubr.bf16.mxu0 %v7970_v38  ;;  %2288 = vmatprep.mubr.bf16.mxu1 %v7977_v42 }
  0xef   :  { %2248 = vmatmul.mubr.bf16.vlgmr.msra.gmra.mxu0 %v7975_v41  ;;  %2289 = vmatmul.mubr.bf16.vlgmr.msra.gmra.mxu1 %v7968_v37 }
  0xf0   :  { %2298 = vmatpush1.bf16.msra.mxu0 %v6690_v32  ;;  %2339 = vmatpush1.bf16.msra.mxu1 %v6693_v35  ;;  %v6741_v32 = vld [vmem:[%s9901_s4 + $0x7e0] ss:$16 sps:$4 sm:$0xff]  }
  0xf1   :  { %2299 = vmatprep.subr.bf16.mxu0 %v6698_v36  ;;  %2340 = vmatprep.subr.bf16.mxu1 %v6701_v40  ;;  %v6744_v35 = vld [vmem:[%s9901_s4 + $0x5c0] ss:$16 sps:$4 sm:$0xff]   ;;  %v6749_v36 = vld [vmem:[%s9901_s4 + $0x7c4] ss:$16 sps:$4 sm:$0xff]  }
  0xf2   :  { %v6752_v40 = vld [vmem:[%s9901_s4 + $0x5a4] ss:$16 sps:$4 sm:$0xff]  }
  0xf4   :  { %2300 = vmatpush1.bf16.msra.mxu0 %v6696_v43  ;;  %2341 = vmatpush1.bf16.msra.mxu1 %v6699_v44  ;;  %v6750_v43 = vld [vmem:[%s9901_s4 + $0x5a0] ss:$16 sps:$4 sm:$0xff]   ;;  %v6755_v44 = vld [vmem:[%s9901_s4 + $0x7a4] ss:$16 sps:$4 sm:$0xff]  }
  0xf5   :  { %2301 = vmatprep.subr.bf16.mxu0 %v6704_v45  ;;  %2342 = vmatprep.subr.bf16.mxu1 %v6707_v46  ;;  %v6753_v45 = vld [vmem:[%s9901_s4 + $0x7a0] ss:$16 sps:$4 sm:$0xff]   ;;  %v6758_v46 = vld [vmem:[%s9901_s4 + $0x584] ss:$16 sps:$4 sm:$0xff]  }
  0xf8   :  { %2302 = vmatpush1.bf16.msra.mxu0 %v6702_v47  ;;  %2343 = vmatpush1.bf16.msra.mxu1 %v6705_v48  ;;  %v6756_v47 = vld [vmem:[%s9901_s4 + $0x580] ss:$16 sps:$4 sm:$0xff]   ;;  %v6761_v48 = vld [vmem:[%s9901_s4 + $0x784] ss:$16 sps:$4 sm:$0xff]  }
  0xf9   :  { %2303 = vmatprep.subr.bf16.mxu0 %v6710_v49  ;;  %2344 = vmatprep.subr.bf16.mxu1 %v6713_v51  ;;  %v6759_v49 = vld [vmem:[%s9901_s4 + $0x780] ss:$16 sps:$4 sm:$0xff]  }
  0xfa   :  { %v6762_v51 = vld [vmem:[%s9901_s4 + $0x560] ss:$16 sps:$4 sm:$0xff]  }
  0xfc   :  { %2304 = vmatpush1.bf16.msra.mxu0 %v6708_v50  ;;  %2345 = vmatpush1.bf16.msra.mxu1 %v6711_v52  ;;  %v6764_v50 = vld [vmem:[%s9901_s4 + $0x564] ss:$16 sps:$4 sm:$0xff]  }
  0xfd   :  { %2305 = vmatprep.subr.bf16.mxu0 %v6716_v53  ;;  %2346 = vmatprep.subr.bf16.mxu1 %v6719_v55  ;;  %v6767_v52 = vld [vmem:[%s9901_s4 + $0x764] ss:$16 sps:$4 sm:$0xff]   ;;  %v143_v53 = vsub.s32 6, %v7932_v9  ;;  %v135_v55 = vsub.s32 4, %v7932_v9 }
 0x100   :  { %2306 = vmatpush1.bf16.msra.mxu0 %v6714_v54  ;;  %2347 = vmatpush1.bf16.msra.mxu1 %v6717_v56  ;;  %v6765_v54 = vld [vmem:[%s9901_s4 + $0x760] ss:$16 sps:$4 sm:$0xff]   ;;  %v6770_v56 = vld [vmem:[%s9901_s4 + $0x544] ss:$16 sps:$4 sm:$0xff]  }
 0x101   :  { %2307 = vmatprep.subr.bf16.mxu0 %v6722_v57  ;;  %2348 = vmatprep.subr.bf16.mxu1 %v6725_v59  ;;  %v6768_v57 = vld [vmem:[%s9901_s4 + $0x540] ss:$16 sps:$4 sm:$0xff]   ;;  %v144_v59 = vrot.slane %v7937_v10, %v143_v53 }
 0x104   :  { %2308 = vmatpush1.bf16.msra.mxu0 %v6720_v58  ;;  %2349 = vmatpush1.bf16.msra.mxu1 %v6723_v61  ;;  %v6773_v58 = vld [vmem:[%s9901_s4 + $0x744] ss:$16 sps:$4 sm:$0xff]   ;;  %v136_v61 = vrot.slane %v7937_v10, %v135_v55 }
 0x105   :  { %2309 = vmatprep.subr.bf16.mxu0 %v6728_v62  ;;  %v8057_v5 = vpop.f32.mrf.mxu0  ;;  %2350 = vmatprep.subr.bf16.mxu1 %v6731_v1  ;;  %v8068_v17 = vpop.f32.mrf.mxu1  ;;  %v6771_v62 = vld [vmem:[%s9901_s4 + $0x740] ss:$16 sps:$4 sm:$0xff]  }
 0x106   :  { %v6774_v1 = vld [vmem:[%s9901_s4 + $0x520] ss:$16 sps:$4 sm:$0xff]   ;;  %v635_v10 = vadd.f32 %v8068_v17, %v144_v59 }
 0x107   :  { %v595_v12 = vpop.f32.mrf.mxu0  ;;  %v636_v19 = vpop.f32.mrf.mxu1 }
 0x108   :  { %2310 = vmatpush1.bf16.msra.mxu0 %v6726_v0  ;;  %v596_v18 = vadd.f32 %v595_v12, %v140_v2  ;;  %2351 = vmatpush1.bf16.msra.mxu1 %v6729_v3  ;;  %v637_v23 = vadd.f32 %v636_v19, %v148_v6  ;;  %v6776_v0 = vld [vmem:[%s9901_s4 + $0x524] ss:$16 sps:$4 sm:$0xff]   ;;  %v594_v3 = vadd.f32 %v8057_v5, %v136_v61  ;;  %v6783_v5 = vld [vmem:[%s9901_s4 + $0x700] ss:$16 sps:$4 sm:$0xff]   ;;  %v647_v17 = vmax.f32 %v635_v10, 0.0 }
 0x109   :  { %2311 = vmatprep.subr.bf16.mxu0 %v6734_v4  ;;  %v597_v22 = vpop.f32.mrf.mxu0  ;;  %2352 = vmatprep.subr.bf16.mxu1 %v6737_v16  ;;  %v638_v27 = vpop.f32.mrf.mxu1  ;;  %v6779_v2 = vld [vmem:[%s9901_s4 + $0x724] ss:$16 sps:$4 sm:$0xff]   ;;  %v6777_v4 = vld [vmem:[%s9901_s4 + $0x720] ss:$16 sps:$4 sm:$0xff]   ;;  %v6791_v19 = vld [vmem:[%s9901_s4 + $0x2ec] ss:$16 sps:$4 sm:$0xff]  }
 0x10a   :  { %v646_v26 = vmax.f32 %v596_v18, 0.0  ;;  %v648_v28 = vmax.f32 %v637_v23, 0.0  ;;  %v6782_v6 = vld [vmem:[%s9901_s4 + $0x504] ss:$16 sps:$4 sm:$0xff]   ;;  %v645_v12 = vmax.f32 %v594_v3, 0.0  ;;  %v8197_v22 = vpack.c.bf16 %v647_v17, %v647_v17 }
 0x10b   :  { %v598_v29 = vpop.f32.mrf.mxu0  ;;  %v639_v31 = vpop.f32.mrf.mxu1  ;;  %v6785_v16 = vld [vmem:[%s9901_s4 + $0x704] ss:$16 sps:$4 sm:$0xff]   ;;  %v6788_v18 = vld [vmem:[%s9901_s4 + $0xec] ss:$16 sps:$4 sm:$0xff]   ;;  %v6795_v27 = vld [vmem:[%s9901_s4 + $0x2c8] ss:$16 sps:$4 sm:$0xff]  }
 0x10c   :  { %2312 = vmatpush1.bf16.msra.mxu0 %v6732_v7  ;;  %v8082_v30 = vpack.c.bf16 %v646_v26, %v646_v26  ;;  %2353 = vmatpush1.bf16.msra.mxu1 %v6735_v20  ;;  %v8090_v34 = vpack.c.bf16 %v648_v28, %v648_v28  ;;  %v6780_v7 = vld [vmem:[%s9901_s4 + $0x500] ss:$16 sps:$4 sm:$0xff]   ;;  %v6786_v20 = vld [vmem:[%s9901_s4 + $0xe8] ss:$16 sps:$4 sm:$0xff]   ;;  %v6794_v23 = vld [vmem:[%s9901_s4 + $0xcc] ss:$16 sps:$4 sm:$0xff]  }
 0x10d   :  { %2313 = vmatprep.subr.bf16.mxu0 %v6740_v21  ;;  %2354 = vmatprep.subr.bf16.mxu1 %v6743_v25  ;;  %v6789_v21 = vld [vmem:[%s9901_s4 + $0x2e8] ss:$16 sps:$4 sm:$0xff]   ;;  %v6797_v25 = vld [vmem:[%s9901_s4 + $0x2cc] ss:$16 sps:$4 sm:$0xff]  }
 0x10e   :  { %2329 = vmatprep.mubr.bf16.mxu0 %v8082_v30  ;;  %2370 = vmatprep.mubr.bf16.mxu1 %v8090_v34  ;;  %v6792_v26 = vld [vmem:[%s9901_s4 + $0xc8] ss:$16 sps:$4 sm:$0xff]   ;;  %v6800_v28 = vld [vmem:[%s9901_s4 + $0xac] ss:$16 sps:$4 sm:$0xff]  }
 0x10f   :  { %v6803_v29 = vld [vmem:[%s9901_s4 + $0x2ac] ss:$16 sps:$4 sm:$0xff]   ;;  %v6798_v31 = vld [vmem:[%s9901_s4 + $0xa8] ss:$16 sps:$4 sm:$0xff]  }
 0x110   :  { %2314 = vmatpush2.bf16.msra.mxu0 %v6738_v24  ;;  %2355 = vmatpush2.bf16.msra.mxu1 %v6741_v32  ;;  %v8202_v24 = vpack.c.bf16 %v645_v12, %v645_v12  ;;  %v6801_v32 = vld [vmem:[%s9901_s4 + $0x2a8] ss:$16 sps:$4 sm:$0xff]  }
 0x111   :  { %2315 = vmatprep.subr.bf16.mxu0 %v6746_v33  ;;  %2356 = vmatprep.subr.bf16.mxu1 %v6749_v36  ;;  %v6806_v33 = vld [vmem:[%s9901_s4 + $0x8c] ss:$16 sps:$4 sm:$0xff]  }
 0x112   :  { %v6812_v36 = vld [vmem:[%s9901_s4 + $0x6c] ss:$16 sps:$4 sm:$0xff]  }
 0x114   :  { %2316 = vmatpush2.bf16.msra.mxu0 %v6744_v35  ;;  %2357 = vmatpush2.bf16.msra.mxu1 %v6747_v39  ;;  %v6807_v35 = vld [vmem:[%s9901_s4 + $0x288] ss:$16 sps:$4 sm:$0xff]   ;;  %v6815_v39 = vld [vmem:[%s9901_s4 + $0x26c] ss:$16 sps:$4 sm:$0xff]  }
 0x115   :  { %2317 = vmatprep.subr.bf16.mxu0 %v6752_v40  ;;  %2358 = vmatprep.subr.bf16.mxu1 %v6755_v44  ;;  %v6810_v40 = vld [vmem:[%s9901_s4 + $0x68] ss:$16 sps:$4 sm:$0xff]   ;;  %v6818_v44 = vld [vmem:[%s9901_s4 + $0x4c] ss:$16 sps:$4 sm:$0xff]  }
 0x118   :  { %2318 = vmatpush2.bf16.msra.mxu0 %v6750_v43  ;;  %2359 = vmatpush2.bf16.msra.mxu1 %v6753_v45  ;;  %v6813_v43 = vld [vmem:[%s9901_s4 + $0x268] ss:$16 sps:$4 sm:$0xff]   ;;  %v6821_v45 = vld [vmem:[%s9901_s4 + $0x24c] ss:$16 sps:$4 sm:$0xff]  }
 0x119   :  { %2319 = vmatprep.subr.bf16.mxu0 %v6758_v46  ;;  %2360 = vmatprep.subr.bf16.mxu1 %v6761_v48  ;;  %v6816_v46 = vld [vmem:[%s9901_s4 + $0x48] ss:$16 sps:$4 sm:$0xff]   ;;  %v6824_v48 = vld [vmem:[%s9901_s4 + $0x2c] ss:$16 sps:$4 sm:$0xff]  }
 0x11c   :  { %2320 = vmatpush2.bf16.msra.mxu0 %v6756_v47  ;;  %2361 = vmatpush2.bf16.msra.mxu1 %v6759_v49  ;;  %v6819_v47 = vld [vmem:[%s9901_s4 + $0x248] ss:$16 sps:$4 sm:$0xff]   ;;  %v6827_v49 = vld [vmem:[%s9901_s4 + $0x22c] ss:$16 sps:$4 sm:$0xff]  }
 0x11d   :  { %2321 = vmatprep.subr.bf16.mxu0 %v6764_v50  ;;  %2362 = vmatprep.subr.bf16.mxu1 %v6767_v52  ;;  %v6822_v50 = vld [vmem:[%s9901_s4 + $0x28] ss:$16 sps:$4 sm:$0xff]   ;;  %v6830_v52 = vld [vmem:[%s9901_s4 + $0xc] ss:$16 sps:$4 sm:$0xff]  }
 0x120   :  { %2322 = vmatpush2.bf16.msra.mxu0 %v6762_v51  ;;  %2363 = vmatpush2.bf16.msra.mxu1 %v6765_v54  ;;  %v6825_v51 = vld [vmem:[%s9901_s4 + $0x228] ss:$16 sps:$4 sm:$0xff]   ;;  %v6833_v54 = vld [vmem:[%s9901_s4 + $0x20c] ss:$16 sps:$4 sm:$0xff]  }
 0x121   :  { %2323 = vmatprep.subr.bf16.mxu0 %v6770_v56  ;;  %2364 = vmatprep.subr.bf16.mxu1 %v6773_v58 }
 0x124   :  { %2324 = vmatpush2.bf16.msra.mxu0 %v6768_v57  ;;  %2365 = vmatpush2.bf16.msra.mxu1 %v6771_v62 }
 0x125   :  { %2325 = vmatprep.subr.bf16.mxu0 %v6776_v0  ;;  %2366 = vmatprep.subr.bf16.mxu1 %v6779_v2 }
 0x128   :  { %2326 = vmatpush2.bf16.msra.mxu0 %v6774_v1  ;;  %2367 = vmatpush2.bf16.msra.mxu1 %v6777_v4 }
 0x129   :  { %2327 = vmatprep.subr.bf16.mxu0 %v6782_v6  ;;  %2368 = vmatprep.subr.bf16.mxu1 %v6785_v16 }
 0x12c   :  { %2328 = vmatpush2.bf16.msra.mxu0 %v6780_v7  ;;  %2369 = vmatpush2.bf16.msra.mxu1 %v6783_v5 }
 0x12d   :  { %2379 = vmatprep.subr.bf16.mxu0 %v6788_v18  ;;  %2420 = vmatprep.subr.bf16.mxu1 %v6791_v19 }
 0x12f   :  { %2330 = vmatmul.mubr.bf16.vlgmr.msra.gmra.mxu0 %v8202_v24  ;;  %2371 = vmatmul.mubr.bf16.vlgmr.msra.gmra.mxu1 %v8197_v22 }
 0x130   :  { %2380 = vmatpush1.bf16.msra.mxu0 %v6786_v20  ;;  %2411 = vmatprep.mubr.bf16.mxu0 %v7970_v38  ;;  %v6809_v38 = vld [vmem:[%s9901_s4 + $0x28c] ss:$16 sps:$4 sm:$0xff]  }
 0x131   :  { %2421 = vmatpush1.bf16.msra.mxu1 %v6789_v21  ;;  %2452 = vmatprep.mubr.bf16.mxu1 %v7977_v42  ;;  %v6804_v42 = vld [vmem:[%s9901_s4 + $0x88] ss:$16 sps:$4 sm:$0xff]  }
 0x132   :  { %2381 = vmatprep.subr.bf16.mxu0 %v6794_v23  ;;  %2422 = vmatprep.subr.bf16.mxu1 %v6797_v25 }
 0x134   :  { %2382 = vmatpush1.bf16.msra.mxu0 %v6792_v26 }
 0x135   :  { %2423 = vmatpush1.bf16.msra.mxu1 %v6795_v27  ;;  %2383 = vmatprep.subr.bf16.mxu0 %v6800_v28 }
 0x136   :  { %2424 = vmatprep.subr.bf16.mxu1 %v6803_v29 }
 0x138   :  { %2384 = vmatpush1.bf16.msra.mxu0 %v6798_v31 }
 0x139   :  { %2425 = vmatpush1.bf16.msra.mxu1 %v6801_v32  ;;  %2385 = vmatprep.subr.bf16.mxu0 %v6806_v33 }
 0x13a   :  { %2426 = vmatprep.subr.bf16.mxu1 %v6809_v38 }
 0x13c   :  { %2386 = vmatpush1.bf16.msra.mxu0 %v6804_v42 }
 0x13d   :  { %2427 = vmatpush1.bf16.msra.mxu1 %v6807_v35  ;;  %2387 = vmatprep.subr.bf16.mxu0 %v6812_v36 }
 0x13e   :  { %2428 = vmatprep.subr.bf16.mxu1 %v6815_v39 }
 0x140   :  { %2388 = vmatpush1.bf16.msra.mxu0 %v6810_v40 }
 0x141   :  { %2429 = vmatpush1.bf16.msra.mxu1 %v6813_v43  ;;  %2389 = vmatprep.subr.bf16.mxu0 %v6818_v44 }
 0x142   :  { %2430 = vmatprep.subr.bf16.mxu1 %v6821_v45 }
 0x144   :  { %2390 = vmatpush1.bf16.msra.mxu0 %v6816_v46 }
 0x145   :  { %2431 = vmatpush1.bf16.msra.mxu1 %v6819_v47  ;;  %2391 = vmatprep.subr.bf16.mxu0 %v6824_v48 }
 0x146   :  { %2432 = vmatprep.subr.bf16.mxu1 %v6827_v49 }
 0x147   :  { %19 = vsyncpa [#allocation3], 0  ;;  %v6828_v56 = vld [vmem:[%s9901_s4 + $0x8] ss:$16 sps:$4 sm:$0xff]   ;;  %v6836_v58 = vld [vmem:[%s9901_s4 + $0x1ec] ss:$16 sps:$4 sm:$0xff]  }
 0x148   :  { %2392 = vmatpush1.bf16.msra.mxu0 %v6822_v50  ;;  %v6831_v57 = vld [vmem:[%s9901_s4 + $0x208] ss:$16 sps:$4 sm:$0xff]   ;;  %v6839_v59 = vld [vmem:[%s9901_s4 + $0x3ec] ss:$16 sps:$4 sm:$0xff]   ;;  %vm5780_vm0 = vcmask 57344  }
 0x149   :  { %2433 = vmatpush1.bf16.msra.mxu1 %v6825_v51  ;;  %2393 = vmatprep.subr.bf16.mxu0 %v6830_v52  ;;  %v6834_v61 = vld [vmem:[%s9901_s4 + $0x1e8] ss:$16 sps:$4 sm:$0xff]   ;;  %v6842_v0 = vld [vmem:[%s9901_s4 + $0x1cc] ss:$16 sps:$4 sm:$0xff]  }
 0x14a   :  { %2434 = vmatprep.subr.bf16.mxu1 %v6833_v54  ;;  %v6837_v62 = vld [vmem:[%s9901_s4 + $0x3e8] ss:$16 sps:$4 sm:$0xff]   ;;  %v6845_v1 = vld [vmem:[%s9901_s4 + $0x3cc] ss:$16 sps:$4 sm:$0xff]  }
 0x14b   :  { %v6840_v2 = vld [vmem:[%s9901_s4 + $0x1c8] ss:$16 sps:$4 sm:$0xff]   ;;  %v6848_v3 = vld [vmem:[%s9901_s4 + $0x1ac] ss:$16 sps:$4 sm:$0xff]  }
 0x14c   :  { %2394 = vmatpush1.bf16.msra.mxu0 %v6828_v56  ;;  %v6843_v10 = vld [vmem:[%s9901_s4 + $0x3c8] ss:$16 sps:$4 sm:$0xff]   ;;  %v6851_v4 = vld [vmem:[%s9901_s4 + $0x3ac] ss:$16 sps:$4 sm:$0xff]  }
 0x14d   :  { %2435 = vmatpush1.bf16.msra.mxu1 %v6831_v57  ;;  %2395 = vmatprep.subr.bf16.mxu0 %v6836_v58  ;;  %v6846_v6 = vld [vmem:[%s9901_s4 + $0x1a8] ss:$16 sps:$4 sm:$0xff]   ;;  %v6854_v16 = vld [vmem:[%s9901_s4 + $0x18c] ss:$16 sps:$4 sm:$0xff]  }
 0x14e   :  { %2436 = vmatprep.subr.bf16.mxu1 %v6839_v59  ;;  %v6849_v7 = vld [vmem:[%s9901_s4 + $0x3a8] ss:$16 sps:$4 sm:$0xff]   ;;  %v6857_v5 = vld [vmem:[%s9901_s4 + $0x38c] ss:$16 sps:$4 sm:$0xff]  }
 0x14f   :  { %v6852_v17 = vld [vmem:[%s9901_s4 + $0x188] ss:$16 sps:$4 sm:$0xff]   ;;  %v6860_v18 = vld [vmem:[%s9901_s4 + $0x16c] ss:$16 sps:$4 sm:$0xff]  }
 0x150   :  { %2396 = vmatpush2.bf16.msra.mxu0 %v6834_v61  ;;  %v6855_v12 = vld [vmem:[%s9901_s4 + $0x388] ss:$16 sps:$4 sm:$0xff]   ;;  %v6863_v19 = vld [vmem:[%s9901_s4 + $0x36c] ss:$16 sps:$4 sm:$0xff]  }
 0x151   :  { %2437 = vmatpush2.bf16.msra.mxu1 %v6837_v62  ;;  %2397 = vmatprep.subr.bf16.mxu0 %v6842_v0  ;;  %v6858_v20 = vld [vmem:[%s9901_s4 + $0x168] ss:$16 sps:$4 sm:$0xff]   ;;  %v6866_v23 = vld [vmem:[%s9901_s4 + $0x14c] ss:$16 sps:$4 sm:$0xff]  }
 0x152   :  { %2438 = vmatprep.subr.bf16.mxu1 %v6845_v1  ;;  %v6861_v21 = vld [vmem:[%s9901_s4 + $0x368] ss:$16 sps:$4 sm:$0xff]   ;;  %v6869_v25 = vld [vmem:[%s9901_s4 + $0x34c] ss:$16 sps:$4 sm:$0xff]  }
 0x153   :  { %v6864_v26 = vld [vmem:[%s9901_s4 + $0x148] ss:$16 sps:$4 sm:$0xff]   ;;  %v6872_v28 = vld [vmem:[%s9901_s4 + $0x12c] ss:$16 sps:$4 sm:$0xff]  }
 0x154   :  { %2398 = vmatpush2.bf16.msra.mxu0 %v6840_v2  ;;  %v6867_v27 = vld [vmem:[%s9901_s4 + $0x348] ss:$16 sps:$4 sm:$0xff]   ;;  %v6875_v29 = vld [vmem:[%s9901_s4 + $0x32c] ss:$16 sps:$4 sm:$0xff]  }
 0x155   :  { %2439 = vmatpush2.bf16.msra.mxu1 %v6843_v10  ;;  %2399 = vmatprep.subr.bf16.mxu0 %v6848_v3  ;;  %v6870_v31 = vld [vmem:[%s9901_s4 + $0x128] ss:$16 sps:$4 sm:$0xff]   ;;  %v6878_v33 = vld [vmem:[%s9901_s4 + $0x10c] ss:$16 sps:$4 sm:$0xff]  }
 0x156   :  { %2440 = vmatprep.subr.bf16.mxu1 %v6851_v4  ;;  %v6873_v32 = vld [vmem:[%s9901_s4 + $0x328] ss:$16 sps:$4 sm:$0xff]   ;;  %v6881_v38 = vld [vmem:[%s9901_s4 + $0x30c] ss:$16 sps:$4 sm:$0xff]  }
 0x157   :  { %v6876_v42 = vld [vmem:[%s9901_s4 + $0x108] ss:$16 sps:$4 sm:$0xff]   ;;  %v6884_v36 = vld [vmem:[%s9901_s4 + $0x4ec] ss:$16 sps:$4 sm:$0xff]  }
 0x158   :  { %2400 = vmatpush2.bf16.msra.mxu0 %v6846_v6  ;;  %v6879_v35 = vld [vmem:[%s9901_s4 + $0x308] ss:$16 sps:$4 sm:$0xff]   ;;  %v6887_v39 = vld [vmem:[%s9901_s4 + $0x6ec] ss:$16 sps:$4 sm:$0xff]  }
 0x159   :  { %2441 = vmatpush2.bf16.msra.mxu1 %v6849_v7  ;;  %2401 = vmatprep.subr.bf16.mxu0 %v6854_v16  ;;  %v6882_v40 = vld [vmem:[%s9901_s4 + $0x4e8] ss:$16 sps:$4 sm:$0xff]   ;;  %v6890_v44 = vld [vmem:[%s9901_s4 + $0x4cc] ss:$16 sps:$4 sm:$0xff]  }
 0x15a   :  { %2442 = vmatprep.subr.bf16.mxu1 %v6857_v5  ;;  %v6885_v43 = vld [vmem:[%s9901_s4 + $0x6e8] ss:$16 sps:$4 sm:$0xff]   ;;  %v6893_v45 = vld [vmem:[%s9901_s4 + $0x6cc] ss:$16 sps:$4 sm:$0xff]  }
 0x15b   :  { %v6888_v46 = vld [vmem:[%s9901_s4 + $0x4c8] ss:$16 sps:$4 sm:$0xff]   ;;  %v6905_v49 = vld [vmem:[%s9901_s4 + $0x68c] ss:$16 sps:$4 sm:$0xff]  }
 0x15c   :  { %2402 = vmatpush2.bf16.msra.mxu0 %v6852_v17  ;;  %v6891_v47 = vld [vmem:[%s9901_s4 + $0x6c8] ss:$16 sps:$4 sm:$0xff]   ;;  %v6908_v52 = vld [vmem:[%s9901_s4 + $0x46c] ss:$16 sps:$4 sm:$0xff]  }
 0x15d   :  { %2443 = vmatpush2.bf16.msra.mxu1 %v6855_v12  ;;  %2403 = vmatprep.subr.bf16.mxu0 %v6860_v18  ;;  %v6897_v48 = vld [vmem:[%s9901_s4 + $0x6a8] ss:$16 sps:$4 sm:$0xff]   ;;  %v6911_v54 = vld [vmem:[%s9901_s4 + $0x66c] ss:$16 sps:$4 sm:$0xff]  }
 0x15e   :  { %2444 = vmatprep.subr.bf16.mxu1 %v6863_v19  ;;  %v6900_v50 = vld [vmem:[%s9901_s4 + $0x488] ss:$16 sps:$4 sm:$0xff]   ;;  %v6914_v58 = vld [vmem:[%s9901_s4 + $0x44c] ss:$16 sps:$4 sm:$0xff]  }
 0x15f   :  { %v6903_v51 = vld [vmem:[%s9901_s4 + $0x688] ss:$16 sps:$4 sm:$0xff]   ;;  %v6917_v59 = vld [vmem:[%s9901_s4 + $0x64c] ss:$16 sps:$4 sm:$0xff]  }
 0x160   :  { %2404 = vmatpush2.bf16.msra.mxu0 %v6858_v20  ;;  %v6906_v56 = vld [vmem:[%s9901_s4 + $0x468] ss:$16 sps:$4 sm:$0xff]   ;;  %v6920_v0 = vld [vmem:[%s9901_s4 + $0x42c] ss:$16 sps:$4 sm:$0xff]  }
 0x161   :  { %2445 = vmatpush2.bf16.msra.mxu1 %v6861_v21  ;;  %2405 = vmatprep.subr.bf16.mxu0 %v6866_v23  ;;  %v6909_v57 = vld [vmem:[%s9901_s4 + $0x668] ss:$16 sps:$4 sm:$0xff]   ;;  %v6923_v1 = vld [vmem:[%s9901_s4 + $0x62c] ss:$16 sps:$4 sm:$0xff]  }
 0x162   :  { %2446 = vmatprep.subr.bf16.mxu1 %v6869_v25  ;;  %v6912_v61 = vld [vmem:[%s9901_s4 + $0x448] ss:$16 sps:$4 sm:$0xff]   ;;  %v6926_v3 = vld [vmem:[%s9901_s4 + $0x40c] ss:$16 sps:$4 sm:$0xff]  }
 0x163   :  { %v6915_v62 = vld [vmem:[%s9901_s4 + $0x648] ss:$16 sps:$4 sm:$0xff]   ;;  %v6929_v4 = vld [vmem:[%s9901_s4 + $0x60c] ss:$16 sps:$4 sm:$0xff]  }
 0x164   :  { %2406 = vmatpush2.bf16.msra.mxu0 %v6864_v26  ;;  %v6918_v2 = vld [vmem:[%s9901_s4 + $0x428] ss:$16 sps:$4 sm:$0xff]   ;;  %v6932_v16 = vld [vmem:[%s9901_s4 + $0x5ec] ss:$16 sps:$4 sm:$0xff]  }
 0x165   :  { %2447 = vmatpush2.bf16.msra.mxu1 %v6867_v27  ;;  %2407 = vmatprep.subr.bf16.mxu0 %v6872_v28  ;;  %v6921_v10 = vld [vmem:[%s9901_s4 + $0x628] ss:$16 sps:$4 sm:$0xff]   ;;  %v6935_v5 = vld [vmem:[%s9901_s4 + $0x7ec] ss:$16 sps:$4 sm:$0xff]  }
 0x166   :  { %2448 = vmatprep.subr.bf16.mxu1 %v6875_v29  ;;  %v6924_v6 = vld [vmem:[%s9901_s4 + $0x408] ss:$16 sps:$4 sm:$0xff]   ;;  %v6938_v18 = vld [vmem:[%s9901_s4 + $0x5cc] ss:$16 sps:$4 sm:$0xff]  }
 0x167   :  { %v6927_v7 = vld [vmem:[%s9901_s4 + $0x608] ss:$16 sps:$4 sm:$0xff]   ;;  %v6941_v19 = vld [vmem:[%s9901_s4 + $0x7cc] ss:$16 sps:$4 sm:$0xff]  }
 0x168   :  { %2408 = vmatpush2.bf16.msra.mxu0 %v6870_v31  ;;  %v6930_v17 = vld [vmem:[%s9901_s4 + $0x5e8] ss:$16 sps:$4 sm:$0xff]   ;;  %v6944_v23 = vld [vmem:[%s9901_s4 + $0x5ac] ss:$16 sps:$4 sm:$0xff]  }
 0x169   :  { %2449 = vmatpush2.bf16.msra.mxu1 %v6873_v32  ;;  %2409 = vmatprep.subr.bf16.mxu0 %v6878_v33  ;;  %v6933_v12 = vld [vmem:[%s9901_s4 + $0x7e8] ss:$16 sps:$4 sm:$0xff]   ;;  %v6947_v25 = vld [vmem:[%s9901_s4 + $0x7ac] ss:$16 sps:$4 sm:$0xff]  }
 0x16a   :  { %2450 = vmatprep.subr.bf16.mxu1 %v6881_v38  ;;  %v6936_v20 = vld [vmem:[%s9901_s4 + $0x5c8] ss:$16 sps:$4 sm:$0xff]   ;;  %v6950_v28 = vld [vmem:[%s9901_s4 + $0x58c] ss:$16 sps:$4 sm:$0xff]  }
 0x16b   :  { %v6939_v21 = vld [vmem:[%s9901_s4 + $0x7c8] ss:$16 sps:$4 sm:$0xff]   ;;  %v6953_v29 = vld [vmem:[%s9901_s4 + $0x78c] ss:$16 sps:$4 sm:$0xff]  }
 0x16c   :  { %2410 = vmatpush2.bf16.msra.mxu0 %v6876_v42  ;;  %v6942_v26 = vld [vmem:[%s9901_s4 + $0x5a8] ss:$16 sps:$4 sm:$0xff]   ;;  %v6956_v33 = vld [vmem:[%s9901_s4 + $0x56c] ss:$16 sps:$4 sm:$0xff]  }
 0x16d   :  { %2451 = vmatpush2.bf16.msra.mxu1 %v6879_v35  ;;  %2461 = vmatprep.subr.bf16.mxu0 %v6884_v36  ;;  %v6945_v27 = vld [vmem:[%s9901_s4 + $0x7a8] ss:$16 sps:$4 sm:$0xff]   ;;  %v6959_v38 = vld [vmem:[%s9901_s4 + $0x76c] ss:$16 sps:$4 sm:$0xff]  }
 0x16e   :  { %2502 = vmatprep.subr.bf16.mxu1 %v6887_v39  ;;  %v6948_v31 = vld [vmem:[%s9901_s4 + $0x588] ss:$16 sps:$4 sm:$0xff]   ;;  %v6962_v36 = vld [vmem:[%s9901_s4 + $0x54c] ss:$16 sps:$4 sm:$0xff]  }
 0x16f   :  { %2412 = vmatmul.mubr.bf16.vlgmr.msra.gmra.mxu0 %v7975_v41  ;;  %v6896_v41 = vld [vmem:[%s9901_s4 + $0x4ac] ss:$16 sps:$4 sm:$0xff]   ;;  %v6951_v32 = vld [vmem:[%s9901_s4 + $0x788] ss:$16 sps:$4 sm:$0xff]  }
 0x170   :  { %2453 = vmatmul.mubr.bf16.vlgmr.msra.gmra.mxu1 %v7968_v37  ;;  %2462 = vmatpush1.bf16.msra.mxu0 %v6882_v40  ;;  %v6899_v37 = vld [vmem:[%s9901_s4 + $0x6ac] ss:$16 sps:$4 sm:$0xff]   ;;  %v6954_v42 = vld [vmem:[%s9901_s4 + $0x568] ss:$16 sps:$4 sm:$0xff]  }
 0x171   :  { %2493 = vmatprep.mubr.bf16.mxu0 %v8082_v30  ;;  %2503 = vmatpush1.bf16.msra.mxu1 %v6885_v43  ;;  %v6894_v30 = vld [vmem:[%s9901_s4 + $0x4a8] ss:$16 sps:$4 sm:$0xff]   ;;  %v6965_v39 = vld [vmem:[%s9901_s4 + $0x74c] ss:$16 sps:$4 sm:$0xff]  }
 0x172   :  { %2534 = vmatprep.mubr.bf16.mxu1 %v8090_v34  ;;  %2463 = vmatprep.subr.bf16.mxu0 %v6890_v44  ;;  %v6902_v34 = vld [vmem:[%s9901_s4 + $0x48c] ss:$16 sps:$4 sm:$0xff]   ;;  %v6957_v35 = vld [vmem:[%s9901_s4 + $0x768] ss:$16 sps:$4 sm:$0xff]  }
 0x173   :  { %2504 = vmatprep.subr.bf16.mxu1 %v6893_v45  ;;  %v6960_v40 = vld [vmem:[%s9901_s4 + $0x548] ss:$16 sps:$4 sm:$0xff]   ;;  %v6968_v44 = vld [vmem:[%s9901_s4 + $0x52c] ss:$16 sps:$4 sm:$0xff]  }
 0x174   :  { %2464 = vmatpush1.bf16.msra.mxu0 %v6888_v46  ;;  %v6963_v43 = vld [vmem:[%s9901_s4 + $0x748] ss:$16 sps:$4 sm:$0xff]   ;;  %v6971_v45 = vld [vmem:[%s9901_s4 + $0x72c] ss:$16 sps:$4 sm:$0xff]  }
 0x175   :  { %2505 = vmatpush1.bf16.msra.mxu1 %v6891_v47  ;;  %2465 = vmatprep.subr.bf16.mxu0 %v6896_v41  ;;  %v6966_v46 = vld [vmem:[%s9901_s4 + $0x528] ss:$16 sps:$4 sm:$0xff]   ;;  %v6974_v41 = vld [vmem:[%s9901_s4 + $0x50c] ss:$16 sps:$4 sm:$0xff]  }
 0x176   :  { %2506 = vmatprep.subr.bf16.mxu1 %v6899_v37  ;;  %v6969_v47 = vld [vmem:[%s9901_s4 + $0x728] ss:$16 sps:$4 sm:$0xff]   ;;  %v6977_v37 = vld [vmem:[%s9901_s4 + $0x70c] ss:$16 sps:$4 sm:$0xff]  }
 0x177   :  { %v7289_v9 = vld [vmem:[%s9907_s10 + $0x528] ss:$16 sps:$4 sm:$0xff]  }
 0x178   :  { %2466 = vmatpush1.bf16.msra.mxu0 %v6894_v30  ;;  %v6972_v30 = vld [vmem:[%s9901_s4 + $0x508] ss:$16 sps:$4 sm:$0xff]  }
 0x179   :  { %2507 = vmatpush1.bf16.msra.mxu1 %v6897_v48  ;;  %2467 = vmatprep.subr.bf16.mxu0 %v6902_v34  ;;  %v6975_v48 = vld [vmem:[%s9901_s4 + $0x708] ss:$16 sps:$4 sm:$0xff]  }
 0x17a   :  { %2508 = vmatprep.subr.bf16.mxu1 %v6905_v49  ;;  %v6978_v34 = vld [vmem:[%s9903_s6 + $0x78] sm:$0xff]  }
 0x17b   :  { %v6979_v49 = vld [vmem:[%s9903_s6 + $0x38] sm:$0xff]  }
 0x17c   :  { %2468 = vmatpush1.bf16.msra.mxu0 %v6900_v50  ;;  %v6980_v50 = vld [vmem:[%s9903_s6 + $0x70] sm:$0xff]  }
 0x17d   :  { %2509 = vmatpush1.bf16.msra.mxu1 %v6903_v51  ;;  %2469 = vmatprep.subr.bf16.mxu0 %v6908_v52 }
 0x17e   :  { %2510 = vmatprep.subr.bf16.mxu1 %v6911_v54  ;;  %v6981_v54 = vld [vmem:[%s9903_s6 + $0x30] sm:$0xff]  }
 0x180   :  { %2470 = vmatpush1.bf16.msra.mxu0 %v6906_v56 }
 0x181   :  { %2511 = vmatpush1.bf16.msra.mxu1 %v6909_v57  ;;  %2471 = vmatprep.subr.bf16.mxu0 %v6914_v58  ;;  %v6982_v57 = vld [vmem:[%s9903_s6 + $0x68] sm:$0xff]  }
 0x182   :  { %2512 = vmatprep.subr.bf16.mxu1 %v6917_v59 }
 0x184   :  { %2472 = vmatpush1.bf16.msra.mxu0 %v6912_v61 }
 0x185   :  { %2513 = vmatpush1.bf16.msra.mxu1 %v6915_v62  ;;  %2473 = vmatprep.subr.bf16.mxu0 %v6920_v0  ;;  %v6984_v62 = vld [vmem:[%s9903_s6 + $0x60] sm:$0xff]  }
 0x186   :  { %2514 = vmatprep.subr.bf16.mxu1 %v6923_v1  ;;  %v6985_v1 = vld [vmem:[%s9903_s6 + $0x20] sm:$0xff]  }
 0x188   :  { %2474 = vmatpush1.bf16.msra.mxu0 %v6918_v2  ;;  %v6986_v2 = vld [vmem:[%s9903_s6 + $0x58] sm:$0xff]  }
 0x189   :  { %2515 = vmatpush1.bf16.msra.mxu1 %v6921_v10  ;;  %2475 = vmatprep.subr.bf16.mxu0 %v6926_v3  ;;  %v6994_v10 = vld [vmem:[%s9903_s6 + $0xf8] sm:$0xff]  }
 0x18a   :  { %2516 = vmatprep.subr.bf16.mxu1 %v6929_v4  ;;  %v6995_v3 = vld [vmem:[%s9903_s6 + $0xb8] sm:$0xff]  }
 0x18b   :  { %v6987_v4 = vld [vmem:[%s9903_s6 + $0x18] sm:$0xff]  }
 0x18c   :  { %2476 = vmatpush1.bf16.msra.mxu0 %v6924_v6  ;;  %v6996_v6 = vld [vmem:[%s9903_s6 + $0xf0] sm:$0xff]  }
 0x18d   :  { %2517 = vmatpush1.bf16.msra.mxu1 %v6927_v7  ;;  %2477 = vmatprep.subr.bf16.mxu0 %v6932_v16  ;;  %v6988_v7 = vld [vmem:[%s9903_s6 + $0x50] sm:$0xff]  }
 0x18e   :  { %2518 = vmatprep.subr.bf16.mxu1 %v6935_v5  ;;  %v6997_v16 = vld [vmem:[%s9903_s6 + $0xb0] sm:$0xff]   ;;  %v6998_v5 = vld [vmem:[%s9903_s6 + $0xe8] sm:$0xff]  }
 0x190   :  { %2478 = vmatpush2.bf16.msra.mxu0 %v6930_v17  ;;  %v6989_v17 = vld [vmem:[%s9903_s6 + $0x10] sm:$0xff]  }
 0x191   :  { %2519 = vmatpush2.bf16.msra.mxu1 %v6933_v12  ;;  %2479 = vmatprep.subr.bf16.mxu0 %v6938_v18  ;;  %v6990_v12 = vld [vmem:[%s9903_s6 + $0x48] sm:$0xff]  }
 0x192   :  { %2520 = vmatprep.subr.bf16.mxu1 %v6941_v19  ;;  %v6999_v18 = vld [vmem:[%s9903_s6 + $0xa8] sm:$0xff]   ;;  %v7000_v19 = vld [vmem:[%s9903_s6 + $0xe0] sm:$0xff]  }
 0x194   :  { %2480 = vmatpush2.bf16.msra.mxu0 %v6936_v20  ;;  %v6991_v20 = vld [vmem:[%s9903_s6 + $0x8] sm:$0xff]  }
 0x195   :  { %2521 = vmatpush2.bf16.msra.mxu1 %v6939_v21  ;;  %2481 = vmatprep.subr.bf16.mxu0 %v6944_v23  ;;  %v6992_v21 = vld [vmem:[%s9903_s6 + $0x40] sm:$0xff]  }
 0x196   :  { %2522 = vmatprep.subr.bf16.mxu1 %v6947_v25  ;;  %v8658_v23 = vld [vmem:[%s9905_s8 + $0x1c0] sm:$0xff] }
 0x197   :  { %v2956_v25 = vld [vmem:[%s9905_s8 + $0x1e0] sm:$0xff] }
 0x198   :  { %2482 = vmatpush2.bf16.msra.mxu0 %v6942_v26  ;;  %v7001_v26 = vld [vmem:[%s9903_s6 + $0xa0] sm:$0xff]  }
 0x199   :  { %2523 = vmatpush2.bf16.msra.mxu1 %v6945_v27  ;;  %2483 = vmatprep.subr.bf16.mxu0 %v6950_v28  ;;  %v7002_v27 = vld [vmem:[%s9903_s6 + $0xd8] sm:$0xff]   ;;  %v6993_v28 = vld [vmem:[%s9903_s6] sm:$0xff]  }
 0x19a   :  { %2524 = vmatprep.subr.bf16.mxu1 %v6953_v29  ;;  %v6206_v29 = vcombine.high %v8658_v23, %v2956_v25 }
 0x19c   :  { %2484 = vmatpush2.bf16.msra.mxu0 %v6948_v31  ;;  %v7003_v31 = vld [vmem:[%s9903_s6 + $0x98] sm:$0xff]  }
 0x19d   :  { %2525 = vmatpush2.bf16.msra.mxu1 %v6951_v32  ;;  %2485 = vmatprep.subr.bf16.mxu0 %v6956_v33  ;;  %v7004_v32 = vld [vmem:[%s9903_s6 + $0xd0] sm:$0xff]   ;;  %v8682_v33 = vld [vmem:[%s9902_s5] sm:$0xf] }
 0x19e   :  { %2526 = vmatprep.subr.bf16.mxu1 %v6959_v38  ;;  %v918_v38 = vrot.slane %v8682_v33, %v7940_v11 }
 0x1a0   :  { %2486 = vmatpush2.bf16.msra.mxu0 %v6954_v42  ;;  %v922_v42 = vrot.slane %v8682_v33, %v7946_v14 }
 0x1a1   :  { %2527 = vmatpush2.bf16.msra.mxu1 %v6957_v35  ;;  %2487 = vmatprep.subr.bf16.mxu0 %v6962_v36 }
 0x1a2   :  { %2528 = vmatprep.subr.bf16.mxu1 %v6965_v39 }
 0x1a4   :  { %2488 = vmatpush2.bf16.msra.mxu0 %v6960_v40 }
 0x1a5   :  { %2529 = vmatpush2.bf16.msra.mxu1 %v6963_v43  ;;  %2489 = vmatprep.subr.bf16.mxu0 %v6968_v44  ;;  %v7005_v43 = vld [vmem:[%s9903_s6 + $0x90] sm:$0xff]  }
 0x1a6   :  { %2530 = vmatprep.subr.bf16.mxu1 %v6971_v45 }
 0x1a8   :  { %2490 = vmatpush2.bf16.msra.mxu0 %v6966_v46 }
 0x1a9   :  { %2531 = vmatpush2.bf16.msra.mxu1 %v6969_v47  ;;  %2491 = vmatprep.subr.bf16.mxu0 %v6974_v41 }
 0x1aa   :  { %2532 = vmatprep.subr.bf16.mxu1 %v6977_v37 }
 0x1ac   :  { %2492 = vmatpush2.bf16.msra.mxu0 %v6972_v30 }
 0x1ad   :  { %2533 = vmatpush2.bf16.msra.mxu1 %v6975_v48  ;;  %6503 = vmatprep.subr.bf16.mxu0 %v6978_v34  ;;  %v7006_v48 = vld [vmem:[%s9903_s6 + $0xc8] sm:$0xff]  }
 0x1ae   :  { %6525 = vmatprep.subr.bf16.mxu1 %v6994_v10  ;;  %v8721_v10 = vld [vmem:[%s9905_s8 + $0x1e8] sm:$0xff] }
 0x1af   :  { %2494 = vmatmul.mubr.bf16.vlgmr.msra.gmra.mxu0 %v8202_v24  ;;  %v8591_v51 = vpop.f32.mrf.mxu0  ;;  %v8594_v52 = vpop.f32.mrf.mxu1 }
 0x1b0   :  { %2535 = vmatmul.mubr.bf16.vlgmr.msra.gmra.mxu1 %v8197_v22  ;;  %6504 = vmatpush3.bf16.msra.mxu0 %v6979_v49  ;;  %v6983_v22 = vld [vmem:[%s9903_s6 + $0x28] sm:$0xff]   ;;  %v2250_v35 = vadd.f32 %v8591_v51, %v918_v38 }
 0x1b1   :  { %v2251_v56 = vpop.f32.mrf.mxu0  ;;  %6505 = vmatprep.subr.bf16.mxu0 %v6980_v50  ;;  %v8602_v58 = vpop.f32.mrf.mxu1  ;;  %6526 = vmatpush3.bf16.msra.mxu1 %v6995_v3  ;;  %v7007_v49 = vld [vmem:[%s9903_s6 + $0x88] sm:$0xff]   ;;  %v2936_v3 = vld [vmem:[%s9905_s8 + $0x140] sm:$0xff] }
 0x1b2   :  { %6527 = vmatprep.subr.bf16.mxu1 %v6996_v6  ;;  %v2252_v36 = vadd.f32 %v2251_v56, %v922_v42  ;;  %v2291_v39 = vadd.f32 %v8594_v52, %v2250_v35  ;;  %v2896_v35 = vld [vmem:[%s9905_s8] sm:$0xff] }
 0x1b3   :  { %v2253_v24 = vpop.f32.mrf.mxu0  ;;  %v2294_v59 = vpop.f32.mrf.mxu1 }
 0x1b4   :  { %6506 = vmatpush3.bf16.msra.mxu0 %v6981_v54  ;;  %v2293_v44 = vadd.f32 %v8602_v58, %v2252_v36  ;;  %v2944_v58 = vld [vmem:[%s9905_s8 + $0x180] sm:$0xff] }
 0x1b5   :  { %v2254_v61 = vpop.f32.mrf.mxu0  ;;  %6507 = vmatprep.subr.bf16.mxu0 %v6982_v57  ;;  %v2295_v0 = vpop.f32.mrf.mxu1  ;;  %6528 = vmatpush3.bf16.msra.mxu1 %v6997_v16  ;;  %v2948_v24 = vld [vmem:[%s9905_s8 + $0x1a0] sm:$0xff] }
 0x1b6   :  { %6529 = vmatprep.subr.bf16.mxu1 %v6998_v5  ;;  %v7008_v59 = vld [vmem:[%s9903_s6 + $0xc0] sm:$0xff]   ;;  %v6197_v16 = vcombine.low %v2944_v58, %v2948_v24 }
 0x1b7   :  { %v2900_v36 = vld [vmem:[%s9905_s8 + $0x20] sm:$0xff] }
 0x1b8   :  { %6508 = vmatpush3.bf16.msra.mxu0 %v6983_v22  ;;  %v7009_v22 = vld [vmem:[%s9903_s6 + $0x80] sm:$0xff]   ;;  %s7453_s6 = smov [#allocation2]  }
 0x1b9   :  { %6509 = vmatprep.subr.bf16.mxu0 %v6984_v62  ;;  %6530 = vmatpush3.bf16.msra.mxu1 %v6999_v18  ;;  %v6205_v62 = vcombine.low %v8658_v23, %v2956_v25 }
 0x1ba   :  { %6531 = vmatprep.subr.bf16.mxu1 %v7000_v19 }
 0x1bc   :  { %6510 = vmatpush3.bf16.msra.mxu0 %v6985_v1  ;;  %v6198_v1 = vcombine.high %v2944_v58, %v2948_v24  ;;  %v2922_v24 = vld [vmem:[%s9905_s8 + $0xd0] sm:$0xff] }
 0x1bd   :  { %6511 = vmatprep.subr.bf16.mxu0 %v6986_v2  ;;  %6532 = vmatpush3.bf16.msra.mxu1 %v7001_v26  ;;  %v8716_v2 = vld [vmem:[%s9905_s8 + $0x1c8] sm:$0xff]  ;;  %v2912_v26 = vld [vmem:[%s9905_s8 + $0x80] sm:$0xff] }
 0x1be   :  { %6533 = vmatprep.subr.bf16.mxu1 %v7002_v27  ;;  %v6207_v6 = vcombine.low %v8716_v2, %v8721_v10  ;;  %v2916_v27 = vld [vmem:[%s9905_s8 + $0xa0] sm:$0xff] }
 0x1bf   :  { %v6165_v38 = vcombine.low %v2912_v26, %v2916_v27 }
 0x1c0   :  { %6512 = vmatpush3.bf16.msra.mxu0 %v6987_v4  ;;  %v2940_v4 = vld [vmem:[%s9905_s8 + $0x160] sm:$0xff] }
 0x1c1   :  { %6513 = vmatprep.subr.bf16.mxu0 %v6988_v7  ;;  %6534 = vmatpush3.bf16.msra.mxu1 %v7003_v31  ;;  %v6208_v7 = vcombine.high %v8716_v2, %v8721_v10  ;;  %v6190_v5 = vcombine.high %v2936_v3, %v2940_v4  ;;  %v6189_v18 = vcombine.low %v2936_v3, %v2940_v4  ;;  %v2904_v31 = vld [vmem:[%s9905_s8 + $0x40] sm:$0xff]  ;;  %v2906_v4 = vld [vmem:[%s9905_s8 + $0x50] sm:$0xff]  ;;  %v2921_v2 = vld [vmem:[%s9905_s8 + $0xc8] sm:$0xff] }
 0x1c2   :  { %6535 = vmatprep.subr.bf16.mxu1 %v7004_v32  ;;  %v2908_v32 = vld [vmem:[%s9905_s8 + $0x60] sm:$0xff]  ;;  %v2925_v10 = vld [vmem:[%s9905_s8 + $0xe8] sm:$0xff] }
 0x1c3   :  { %v6158_v42 = vcombine.high %v2904_v31, %v2908_v32 }
 0x1c4   :  { %6514 = vmatpush3.bf16.msra.mxu0 %v6989_v17  ;;  %v2928_v17 = vld [vmem:[%s9905_s8 + $0x100] sm:$0xff] }
 0x1c5   :  { %6515 = vmatprep.subr.bf16.mxu0 %v6990_v12  ;;  %6536 = vmatpush3.bf16.msra.mxu1 %v7005_v43  ;;  %v2932_v12 = vld [vmem:[%s9905_s8 + $0x120] sm:$0xff]  ;;  %v2954_v43 = vld [vmem:[%s9905_s8 + $0x1d0] sm:$0xff] }
 0x1c6   :  { %6537 = vmatprep.subr.bf16.mxu1 %v7006_v48  ;;  %v6182_v19 = vcombine.high %v2928_v17, %v2932_v12  ;;  %v6181_v23 = vcombine.low %v2928_v17, %v2932_v12  ;;  %v2898_v17 = vld [vmem:[%s9905_s8 + $0x10] sm:$0xff] }
 0x1c7   :  { %v2902_v12 = vld [vmem:[%s9905_s8 + $0x30] sm:$0xff] }
 0x1c8   :  { %6516 = vmatpush3.bf16.msra.mxu0 %v6991_v20  ;;  %v2920_v20 = vld [vmem:[%s9905_s8 + $0xc0] sm:$0xff] }
 0x1c9   :  { %6517 = vmatprep.subr.bf16.mxu0 %v6992_v21  ;;  %6538 = vmatpush3.bf16.msra.mxu1 %v7007_v49  ;;  %v2924_v21 = vld [vmem:[%s9905_s8 + $0xe0] sm:$0xff]  ;;  %v2938_v49 = vld [vmem:[%s9905_s8 + $0x150] sm:$0xff] }
 0x1ca   :  { %6539 = vmatprep.subr.bf16.mxu1 %v7008_v59  ;;  %v6174_v25 = vcombine.high %v2920_v20, %v2924_v21  ;;  %v2926_v59 = vld [vmem:[%s9905_s8 + $0xf0] sm:$0xff] }
 0x1cc   :  { %6518 = vmatpush3.bf16.msra.mxu0 %v6993_v28  ;;  %v6173_v28 = vcombine.low %v2920_v20, %v2924_v21 }
 0x1cd   :  { %3322 = vmatprep.subr.bf16.mxu0 %v6206_v29  ;;  %6540 = vmatpush3.bf16.msra.mxu1 %v7009_v22  ;;  %v6166_v29 = vcombine.high %v2912_v26, %v2916_v27 }
 0x1ce   :  { %3363 = vmatprep.subr.bf16.mxu1 %v6208_v7  ;;  %v2910_v7 = vld [vmem:[%s9905_s8 + $0x70] sm:$0xff] }
 0x1cf   :  { %v6161_v20 = vcombine.low %v2906_v4, %v2910_v7 }
 0x1ef   :  { %v2331_v40 = vpop.f32.mrf.mxu0  ;;  %v2372_v46 = vpop.f32.mrf.mxu1 }
 0x1f0   :  { %v2332_v45 = vadd.f32 %v2331_v40, %v2291_v39  ;;  %v6157_v39 = vcombine.low %v2904_v31, %v2908_v32  ;;  %v6150_v40 = vcombine.high %v2896_v35, %v2900_v36  ;;  %v7012_v31 = vld [vmem:[%s9907_s10 + $0xe4] ss:$16 sps:$4 sm:$0xff]  }
 0x1f1   :  { %v2333_v47 = vpop.f32.mrf.mxu0  ;;  %v2374_v30 = vpop.f32.mrf.mxu1 }
 0x1f2   :  { %v2373_v41 = vadd.f32 %v2372_v46, %v2332_v45  ;;  %v2334_v37 = vadd.f32 %v2333_v47, %v2293_v44  ;;  %v2958_v44 = vld [vmem:[%s9905_s8 + $0x1f0] sm:$0xff]  ;;  %v6149_v45 = vcombine.low %v2896_v35, %v2900_v36  ;;  %v2894_v46 = vld [vmem:[%s9898_s1] sm:$0xff] }
 0x1f3   :  { %v2335_v34 = vpop.f32.mrf.mxu0  ;;  %v2376_v51 = vpop.f32.mrf.mxu1  ;;  %v6210_v47 = vcombine.high %v2954_v43, %v2958_v44  ;;  %v6209_v48 = vcombine.low %v2954_v43, %v2958_v44  ;;  %v7013_v35 = vld [vmem:[%s9907_s10 + $0xc0] ss:$16 sps:$4 sm:$0xff]   ;;  %v7018_v36 = vld [vmem:[%s9907_s10 + $0xa4] ss:$16 sps:$4 sm:$0xff]  }
 0x1f4   :  { %v2375_v50 = vadd.f32 %v2374_v30, %v2334_v37  ;;  %v2543_v52 = vmax.f32 %v2373_v41, 0.0  ;;  %v2946_v41 = vld [vmem:[%s9905_s8 + $0x190] sm:$0xff]  ;;  %v8779_v30 = vpack.c.bf16 %v2894_v46, %v2894_v46 }
 0x1f5   :  { %v2336_v54 = vpop.f32.mrf.mxu0  ;;  %v2377_v57 = vpop.f32.mrf.mxu1  ;;  %v2950_v37 = vld [vmem:[%s9905_s8 + $0x1b0] sm:$0xff] }
 0x1f6   :  { %v2544_v56 = vmax.f32 %v2375_v50, 0.0  ;;  %v2547_v0 = vpack.c.bf16 %v2543_v52, %v2543_v52  ;;  %v6202_v34 = vcombine.high %v2946_v41, %v2950_v37  ;;  %v2942_v50 = vld [vmem:[%s9905_s8 + $0x170] sm:$0xff]  ;;  %v6201_v51 = vcombine.low %v2946_v41, %v2950_v37 }
 0x1f7   :  { %v6194_v52 = vcombine.high %v2938_v49, %v2942_v50  ;;  %v2930_v54 = vld [vmem:[%s9905_s8 + $0x110] sm:$0xff]  ;;  %v6193_v57 = vcombine.low %v2938_v49, %v2942_v50 }
 0x1f8   :  { %v2548_v61 = vpack.c.bf16 %v2544_v56, %v2544_v56  ;;  %v2934_v56 = vld [vmem:[%s9905_s8 + $0x130] sm:$0xff] }
 0x1f9   :  { %v6186_v58 = vcombine.high %v2930_v54, %v2934_v56  ;;  %v6185_v22 = vcombine.low %v2930_v54, %v2934_v56  ;;  %v7019_v43 = vld [vmem:[%s9907_s10 + $0x80] ss:$16 sps:$4 sm:$0xff]   ;;  %v7024_v44 = vld [vmem:[%s9907_s10 + $0x64] ss:$16 sps:$4 sm:$0xff]  }
 0x1fa   :  { %2846 = vmatprep.mubr.bf16.mxu0 %v2548_v61  ;;  %v6178_v61 = vcombine.high %v2922_v24, %v2926_v59  ;;  %v7027_v46 = vld [vmem:[%s9907_s10 + $0x44] ss:$16 sps:$4 sm:$0xff]   ;;  %v7028_v37 = vld [vmem:[%s9907_s10 + $0x20] ss:$16 sps:$4 sm:$0xff]  }
 0x1fb   :  { %2847 = vmatmul.mubr.bf16.vlgmr.msra.gmra.mxu0 %v2547_v0  ;;  %v2918_v0 = vld [vmem:[%s9905_s8 + $0xb0] sm:$0xff] }
 0x1fc   :  { %3323 = vmatpush1.bf16.msra.mxu0 %v6205_v62  ;;  %3354 = vmatprep.mubr.bf16.mxu0 %v7452_v8  ;;  %v2914_v62 = vld [vmem:[%s9905_s8 + $0x90] sm:$0xff] }
 0x1fd   :  { %3324 = vmatprep.subr.bf16.mxu0 %v6198_v1  ;;  %v6177_v1 = vcombine.low %v2922_v24, %v2926_v59  ;;  %v6170_v3 = vcombine.high %v2914_v62, %v2918_v0  ;;  %v7030_v41 = vld [vmem:[%s9907_s10 + $0x24] ss:$16 sps:$4 sm:$0xff]   ;;  %v7034_v50 = vld [vmem:[%s9907_s10 + $0x1e0] ss:$16 sps:$4 sm:$0xff]   ;;  %v926_v59 = vrot.slane %v8682_v33, %v7943_v13 }
 0x1fe   :  { %v7036_v49 = vld [vmem:[%s9907_s10 + $0x1e4] ss:$16 sps:$4 sm:$0xff]   ;;  %v7040_v56 = vld [vmem:[%s9907_s10 + $0x1a0] ss:$16 sps:$4 sm:$0xff]  }
 0x1ff   :  { %v7042_v54 = vld [vmem:[%s9907_s10 + $0x1a4] ss:$16 sps:$4 sm:$0xff]  }
 0x200   :  { %3325 = vmatpush1.bf16.msra.mxu0 %v6197_v16  ;;  %v6169_v16 = vcombine.low %v2914_v62, %v2918_v0  ;;  %v7048_v24 = vld [vmem:[%s9907_s10 + $0x164] ss:$16 sps:$4 sm:$0xff]  }
 0x201   :  { %3326 = vmatprep.subr.bf16.mxu0 %v6190_v5  ;;  %v6162_v5 = vcombine.high %v2906_v4, %v2910_v7  ;;  %v7051_v62 = vld [vmem:[%s9907_s10 + $0x144] ss:$16 sps:$4 sm:$0xff]  }
 0x204   :  { %3327 = vmatpush1.bf16.msra.mxu0 %v6189_v18 }
 0x205   :  { %3328 = vmatprep.subr.bf16.mxu0 %v6182_v19 }
 0x208   :  { %3329 = vmatpush1.bf16.msra.mxu0 %v6181_v23  ;;  %v6154_v23 = vcombine.high %v2898_v17, %v2902_v12 }
 0x209   :  { %3330 = vmatprep.subr.bf16.mxu0 %v6174_v25 }
 0x20c   :  { %3331 = vmatpush1.bf16.msra.mxu0 %v6173_v28  ;;  %v6153_v28 = vcombine.low %v2898_v17, %v2902_v12  ;;  %v7052_v12 = vld [vmem:[%s9907_s10 + $0x120] ss:$16 sps:$4 sm:$0xff]  }
 0x20d   :  { %3332 = vmatprep.subr.bf16.mxu0 %v6166_v29 }
 0x210   :  { %3333 = vmatpush1.bf16.msra.mxu0 %v6165_v38  ;;  %v7010_v38 = vld [vmem:[%s9907_s10 + $0xe0] ss:$16 sps:$4 sm:$0xff]  }
 0x211   :  { %3334 = vmatprep.subr.bf16.mxu0 %v6158_v42  ;;  %v7015_v42 = vld [vmem:[%s9907_s10 + $0xc4] ss:$16 sps:$4 sm:$0xff]  }
 0x214   :  { %3335 = vmatpush1.bf16.msra.mxu0 %v6157_v39  ;;  %v7016_v39 = vld [vmem:[%s9907_s10 + $0xa0] ss:$16 sps:$4 sm:$0xff]  }
 0x215   :  { %3336 = vmatprep.subr.bf16.mxu0 %v6150_v40  ;;  %v7021_v40 = vld [vmem:[%s9907_s10 + $0x84] ss:$16 sps:$4 sm:$0xff]  }
 0x218   :  { %3337 = vmatpush1.bf16.msra.mxu0 %v6149_v45  ;;  %v7022_v45 = vld [vmem:[%s9907_s10 + $0x60] ss:$16 sps:$4 sm:$0xff]  }
 0x219   :  { %3404 = vmatprep.subr.bf16.mxu0 %v6210_v47  ;;  %v7025_v47 = vld [vmem:[%s9907_s10 + $0x40] ss:$16 sps:$4 sm:$0xff]  }
 0x21b   :  { %3355 = vmatmul.mubr.bf16.vlgmr.msra.gmra.mxu0 %v8779_v30 }
 0x21c   :  { %3405 = vmatpush1.bf16.msra.mxu0 %v6209_v48  ;;  %3436 = vmatprep.mubr.bf16.mxu0 %v7452_v8  ;;  %v7033_v48 = vld [vmem:[%s9907_s10 + $0x4] ss:$16 sps:$4 sm:$0xff]  }
 0x21d   :  { %3406 = vmatprep.subr.bf16.mxu0 %v6202_v34  ;;  %v7031_v34 = vld [vmem:[%s9907_s10] ss:$16 sps:$4 sm:$0xff]  }
 0x220   :  { %3407 = vmatpush1.bf16.msra.mxu0 %v6201_v51  ;;  %v7039_v51 = vld [vmem:[%s9907_s10 + $0x1c4] ss:$16 sps:$4 sm:$0xff]  }
 0x221   :  { %3408 = vmatprep.subr.bf16.mxu0 %v6194_v52  ;;  %v7037_v52 = vld [vmem:[%s9907_s10 + $0x1c0] ss:$16 sps:$4 sm:$0xff]  }
 0x224   :  { %3409 = vmatpush1.bf16.msra.mxu0 %v6193_v57  ;;  %v7045_v57 = vld [vmem:[%s9907_s10 + $0x184] ss:$16 sps:$4 sm:$0xff]  }
 0x225   :  { %3410 = vmatprep.subr.bf16.mxu0 %v6186_v58  ;;  %v7043_v58 = vld [vmem:[%s9907_s10 + $0x180] ss:$16 sps:$4 sm:$0xff]  }
 0x228   :  { %3411 = vmatpush1.bf16.msra.mxu0 %v6185_v22  ;;  %v930_v22 = vrot.slane %v8682_v33, %v7949_v15  ;;  %v7054_v33 = vld [vmem:[%s9907_s10 + $0x124] ss:$16 sps:$4 sm:$0xff]  }
 0x229   :  { %3412 = vmatprep.subr.bf16.mxu0 %v6178_v61  ;;  %v7046_v61 = vld [vmem:[%s9907_s10 + $0x160] ss:$16 sps:$4 sm:$0xff]  }
 0x22c   :  { %3413 = vmatpush1.bf16.msra.mxu0 %v6177_v1 }
 0x22d   :  { %3414 = vmatprep.subr.bf16.mxu0 %v6170_v3  ;;  %v7049_v3 = vld [vmem:[%s9907_s10 + $0x140] ss:$16 sps:$4 sm:$0xff]  }
 0x22f   :  { %v8819_v18 = vpop.f32.mrf.mxu0 }
 0x230   :  { %v8821_v19 = vpop.f32.mrf.mxu1  ;;  %3415 = vmatpush1.bf16.msra.mxu0 %v6169_v16  ;;  %v2414_v0 = vadd.f32 %v8819_v18, %v926_v59  ;;  %v2897_v59 = vld [vmem:[%s9905_s8 + $0x8] sm:$0xff] }
 0x231   :  { %v8823_v21 = vpop.f32.mrf.mxu0  ;;  %3416 = vmatprep.subr.bf16.mxu0 %v6162_v5 }
 0x232   :  { %v8825_v25 = vpop.f32.mrf.mxu1  ;;  %v2416_v1 = vadd.f32 %v8823_v21, %v930_v22  ;;  %v2455_v4 = vadd.f32 %v8821_v19, %v2414_v0  ;;  %v2901_v22 = vld [vmem:[%s9905_s8 + $0x28] sm:$0xff]  ;;  %v2955_v0 = vld [vmem:[%s9905_s8 + $0x1d8] sm:$0xff] }
 0x233   :  { %v2417_v26 = vpop.f32.mrf.mxu0 }
 0x234   :  { %v2458_v27 = vpop.f32.mrf.mxu1  ;;  %3417 = vmatpush1.bf16.msra.mxu0 %v6161_v20  ;;  %v2457_v16 = vadd.f32 %v8825_v25, %v2416_v1  ;;  %v7057_v20 = vld [vmem:[%s9907_s10 + $0x104] ss:$16 sps:$4 sm:$0xff]   ;;  %v7055_v25 = vld [vmem:[%s9907_s10 + $0x100] ss:$16 sps:$4 sm:$0xff]   ;;  %v2959_v1 = vld [vmem:[%s9905_s8 + $0x1f8] sm:$0xff] }
 0x235   :  { %v2418_v29 = vpop.f32.mrf.mxu0  ;;  %3418 = vmatprep.subr.bf16.mxu0 %v6154_v23 }
 0x236   :  { %v2459_v32 = vpop.f32.mrf.mxu1 }
 0x237   :  { %v7060_v32 = vld [vmem:[%s9907_s10 + $0x4e4] ss:$16 sps:$4 sm:$0xff]  }
 0x238   :  { %3419 = vmatpush1.bf16.msra.mxu0 %v6153_v28 }
 0x239   :  { %5060 = vmatprep.subr.bf16.mxu0 %v7012_v31 }
 0x23b   :  { %3437 = vmatmul.mubr.bf16.vlgmr.msra.gmra.mxu0 %v8779_v30 }
 0x23c   :  { %5061 = vmatpush1.bf16.msra.mxu0 %v7010_v38 }
 0x23d   :  { %5062 = vmatprep.subr.bf16.mxu0 %v7015_v42 }
 0x240   :  { %5063 = vmatpush1.bf16.msra.mxu0 %v7013_v35  ;;  %v2945_v35 = vld [vmem:[%s9905_s8 + $0x188] sm:$0xff] }
 0x241   :  { %5064 = vmatprep.subr.bf16.mxu0 %v7018_v36  ;;  %v2949_v36 = vld [vmem:[%s9905_s8 + $0x1a8] sm:$0xff] }
 0x244   :  { %5065 = vmatpush1.bf16.msra.mxu0 %v7016_v39 }
 0x245   :  { %5066 = vmatprep.subr.bf16.mxu0 %v7021_v40 }
 0x248   :  { %5067 = vmatpush1.bf16.msra.mxu0 %v7019_v43  ;;  %v6200_v43 = vcombine.high %v2945_v35, %v2949_v36 }
 0x249   :  { %5068 = vmatprep.subr.bf16.mxu0 %v7024_v44  ;;  %v2937_v44 = vld [vmem:[%s9905_s8 + $0x148] sm:$0xff] }
 0x24c   :  { %5069 = vmatpush1.bf16.msra.mxu0 %v7022_v45  ;;  %v2941_v45 = vld [vmem:[%s9905_s8 + $0x168] sm:$0xff] }
 0x24d   :  { %5070 = vmatprep.subr.bf16.mxu0 %v7027_v46  ;;  %v6199_v46 = vcombine.low %v2945_v35, %v2949_v36  ;;  %v2911_v35 = vld [vmem:[%s9905_s8 + $0x78] sm:$0xff] }
 0x250   :  { %5071 = vmatpush1.bf16.msra.mxu0 %v7025_v47  ;;  %v6192_v47 = vcombine.high %v2937_v44, %v2941_v45 }
 0x251   :  { %5072 = vmatprep.subr.bf16.mxu0 %v7030_v41  ;;  %v2929_v41 = vld [vmem:[%s9905_s8 + $0x108] sm:$0xff] }
 0x254   :  { %5073 = vmatpush1.bf16.msra.mxu0 %v7028_v37  ;;  %v2933_v37 = vld [vmem:[%s9905_s8 + $0x128] sm:$0xff] }
 0x255   :  { %5074 = vmatprep.subr.bf16.mxu0 %v7033_v48  ;;  %v6191_v48 = vcombine.low %v2937_v44, %v2941_v45 }
 0x258   :  { %5075 = vmatpush1.bf16.msra.mxu0 %v7031_v34  ;;  %v6184_v34 = vcombine.high %v2929_v41, %v2933_v37 }
 0x259   :  { %5076 = vmatprep.subr.bf16.mxu0 %v7036_v49  ;;  %v6176_v49 = vcombine.high %v2921_v2, %v2925_v10 }
 0x25c   :  { %5077 = vmatpush2.bf16.msra.mxu0 %v7034_v50  ;;  %v2913_v50 = vld [vmem:[%s9905_s8 + $0x88] sm:$0xff] }
 0x25d   :  { %5078 = vmatprep.subr.bf16.mxu0 %v7039_v51  ;;  %v2917_v51 = vld [vmem:[%s9905_s8 + $0xa8] sm:$0xff] }
 0x260   :  { %5079 = vmatpush2.bf16.msra.mxu0 %v7037_v52  ;;  %v6175_v52 = vcombine.low %v2921_v2, %v2925_v10  ;;  %v7120_v10 = vld [vmem:[%s9907_s10 + $0x2a4] ss:$16 sps:$4 sm:$0xff]  }
 0x261   :  { %5080 = vmatprep.subr.bf16.mxu0 %v7042_v54  ;;  %v6168_v54 = vcombine.high %v2913_v50, %v2917_v51 }
 0x264   :  { %5081 = vmatpush2.bf16.msra.mxu0 %v7040_v56  ;;  %v2905_v56 = vld [vmem:[%s9905_s8 + $0x48] sm:$0xff] }
 0x265   :  { %5082 = vmatprep.subr.bf16.mxu0 %v7045_v57  ;;  %v2909_v57 = vld [vmem:[%s9905_s8 + $0x68] sm:$0xff] }
 0x268   :  { %5083 = vmatpush2.bf16.msra.mxu0 %v7043_v58  ;;  %v6167_v58 = vcombine.low %v2913_v50, %v2917_v51  ;;  %v7118_v50 = vld [vmem:[%s9907_s10 + $0x2a0] ss:$16 sps:$4 sm:$0xff]   ;;  %v7126_v51 = vld [vmem:[%s9907_s10 + $0x284] ss:$16 sps:$4 sm:$0xff]  }
 0x269   :  { %5084 = vmatprep.subr.bf16.mxu0 %v7048_v24  ;;  %v6160_v24 = vcombine.high %v2905_v56, %v2909_v57 }
 0x26c   :  { %5085 = vmatpush2.bf16.msra.mxu0 %v7046_v61  ;;  %v6159_v61 = vcombine.low %v2905_v56, %v2909_v57  ;;  %v7130_v56 = vld [vmem:[%s9907_s10 + $0x260] ss:$16 sps:$4 sm:$0xff]   ;;  %v7138_v57 = vld [vmem:[%s9907_s10 + $0x244] ss:$16 sps:$4 sm:$0xff]  }
 0x26d   :  { %5086 = vmatprep.subr.bf16.mxu0 %v7051_v62  ;;  %v6152_v62 = vcombine.high %v2897_v59, %v2901_v22 }
 0x26f   :  { %v2495_v7 = vpop.f32.mrf.mxu0 }
 0x270   :  { %v2496_v5 = vadd.f32 %v2495_v7, %v2455_v4  ;;  %v2536_v17 = vpop.f32.mrf.mxu1  ;;  %5087 = vmatpush2.bf16.msra.mxu0 %v7049_v3  ;;  %v6151_v3 = vcombine.low %v2897_v59, %v2901_v22  ;;  %v2947_v4 = vld [vmem:[%s9905_s8 + $0x198] sm:$0xff]  ;;  %v7142_v59 = vld [vmem:[%s9907_s10 + $0x220] ss:$16 sps:$4 sm:$0xff]   ;;  %v7150_v22 = vld [vmem:[%s9907_s10 + $0x204] ss:$16 sps:$4 sm:$0xff]  }
 0x271   :  { %v2497_v18 = vpop.f32.mrf.mxu0  ;;  %5088 = vmatprep.subr.bf16.mxu0 %v7054_v33  ;;  %v6212_v33 = vcombine.high %v2955_v0, %v2959_v1  ;;  %v2951_v7 = vld [vmem:[%s9905_s8 + $0x1b8] sm:$0xff] }
 0x272   :  { %v2537_v21 = vadd.f32 %v2536_v17, %v2496_v5  ;;  %v2498_v23 = vadd.f32 %v2497_v18, %v2457_v16  ;;  %v2538_v26 = vpop.f32.mrf.mxu1  ;;  %v6211_v16 = vcombine.low %v2955_v0, %v2959_v1  ;;  %v6204_v5 = vcombine.high %v2947_v4, %v2951_v7  ;;  %v2939_v17 = vld [vmem:[%s9905_s8 + $0x158] sm:$0xff]  ;;  %v7156_v0 = vld [vmem:[%s9907_s10 + $0x3e4] ss:$16 sps:$4 sm:$0xff]  }
 0x273   :  { %v2499_v19 = vpop.f32.mrf.mxu0  ;;  %v6203_v18 = vcombine.low %v2947_v4, %v2951_v7 }
 0x274   :  { %v2539_v27 = vadd.f32 %v2538_v26, %v2498_v23  ;;  %v2540_v28 = vpop.f32.mrf.mxu1  ;;  %5089 = vmatpush2.bf16.msra.mxu0 %v7052_v12  ;;  %v2545_v29 = vmax.f32 %v2537_v21, 0.0  ;;  %v2943_v12 = vld [vmem:[%s9905_s8 + $0x178] sm:$0xff] }
 0x275   :  { %v2500_v31 = vpop.f32.mrf.mxu0  ;;  %5090 = vmatprep.subr.bf16.mxu0 %v7057_v20  ;;  %v6196_v20 = vcombine.high %v2939_v17, %v2943_v12  ;;  %v2931_v21 = vld [vmem:[%s9905_s8 + $0x118] sm:$0xff]  ;;  %v6195_v26 = vcombine.low %v2939_v17, %v2943_v12  ;;  %v7168_v12 = vld [vmem:[%s9907_s10 + $0x3a4] ss:$16 sps:$4 sm:$0xff]  }
 0x276   :  { %v2546_v38 = vmax.f32 %v2539_v27, 0.0  ;;  %v2541_v42 = vpop.f32.mrf.mxu1  ;;  %v2549_v40 = vpack.c.bf16 %v2545_v29, %v2545_v29  ;;  %v2935_v23 = vld [vmem:[%s9905_s8 + $0x138] sm:$0xff] }
 0x277   :  { %v6188_v19 = vcombine.high %v2931_v21, %v2935_v23  ;;  %v2923_v27 = vld [vmem:[%s9905_s8 + $0xd8] sm:$0xff]  ;;  %v6187_v28 = vcombine.low %v2931_v21, %v2935_v23 }
 0x278   :  { %v2550_v39 = vpack.c.bf16 %v2546_v38, %v2546_v38  ;;  %5091 = vmatpush2.bf16.msra.mxu0 %v7055_v25  ;;  %v2915_v29 = vld [vmem:[%s9905_s8 + $0x98] sm:$0xff] }
 0x279   :  { %5142 = vmatprep.subr.bf16.mxu0 %v7060_v32  ;;  %v2919_v31 = vld [vmem:[%s9905_s8 + $0xb8] sm:$0xff] }
 0x27a   :  { %2886 = vmatprep.mubr.bf16.mxu1 %v2550_v39  ;;  %v6172_v38 = vcombine.high %v2915_v29, %v2919_v31  ;;  %v2907_v42 = vld [vmem:[%s9905_s8 + $0x58] sm:$0xff]  ;;  %v6171_v36 = vcombine.low %v2915_v29, %v2919_v31  ;;  %v7063_v29 = vld [vmem:[%s9907_s10 + $0x4c4] ss:$16 sps:$4 sm:$0xff]   ;;  %v7172_v31 = vld [vmem:[%s9907_s10 + $0x380] ss:$16 sps:$4 sm:$0xff]  }
 0x27b   :  { %2887 = vmatmul.mubr.bf16.vlgmr.msra.gmra.mxu1 %v2549_v40  ;;  %v6164_v39 = vcombine.high %v2907_v42, %v2911_v35  ;;  %v2899_v40 = vld [vmem:[%s9905_s8 + $0x18] sm:$0xff]  ;;  %v6163_v44 = vcombine.low %v2907_v42, %v2911_v35  ;;  %v7066_v42 = vld [vmem:[%s9907_s10 + $0x4a4] ss:$16 sps:$4 sm:$0xff]   ;;  %v7178_v35 = vld [vmem:[%s9907_s10 + $0x360] ss:$16 sps:$4 sm:$0xff]  }
 0x27c   :  { %3364 = vmatpush1.bf16.msra.mxu1 %v6207_v6  ;;  %3395 = vmatprep.mubr.bf16.mxu1 %v7452_v8  ;;  %v6183_v6 = vcombine.low %v2929_v41, %v2933_v37  ;;  %v7106_v41 = vld [vmem:[%s9907_s10 + $0x2e0] ss:$16 sps:$4 sm:$0xff]   ;;  %v7114_v37 = vld [vmem:[%s9907_s10 + $0x2c4] ss:$16 sps:$4 sm:$0xff]  }
 0x27d   :  { %3365 = vmatprep.subr.bf16.mxu1 %v6200_v43  ;;  %v2903_v43 = vld [vmem:[%s9905_s8 + $0x38] sm:$0xff] }
 0x27e   :  { %v6156_v45 = vcombine.high %v2899_v40, %v2903_v43 }
 0x280   :  { %3366 = vmatpush1.bf16.msra.mxu1 %v6199_v46  ;;  %v6155_v46 = vcombine.low %v2899_v40, %v2903_v43  ;;  %v7069_v40 = vld [vmem:[%s9907_s10 + $0x484] ss:$16 sps:$4 sm:$0xff]   ;;  %v7184_v43 = vld [vmem:[%s9907_s10 + $0x340] ss:$16 sps:$4 sm:$0xff]  }
 0x281   :  { %3367 = vmatprep.subr.bf16.mxu1 %v6192_v47  ;;  %v7108_v47 = vld [vmem:[%s9907_s10 + $0x2e4] ss:$16 sps:$4 sm:$0xff]  }
 0x284   :  { %3368 = vmatpush1.bf16.msra.mxu1 %v6191_v48 }
 0x285   :  { %3369 = vmatprep.subr.bf16.mxu1 %v6184_v34  ;;  %v7112_v34 = vld [vmem:[%s9907_s10 + $0x2c0] ss:$16 sps:$4 sm:$0xff]  }
 0x288   :  { %3370 = vmatpush1.bf16.msra.mxu1 %v6183_v6 }
 0x289   :  { %3371 = vmatprep.subr.bf16.mxu1 %v6176_v49 }
 0x28c   :  { %3372 = vmatpush1.bf16.msra.mxu1 %v6175_v52  ;;  %v7124_v52 = vld [vmem:[%s9907_s10 + $0x280] ss:$16 sps:$4 sm:$0xff]  }
 0x28d   :  { %3373 = vmatprep.subr.bf16.mxu1 %v6168_v54  ;;  %v7132_v54 = vld [vmem:[%s9907_s10 + $0x264] ss:$16 sps:$4 sm:$0xff]  }
 0x290   :  { %3374 = vmatpush1.bf16.msra.mxu1 %v6167_v58  ;;  %v7136_v58 = vld [vmem:[%s9907_s10 + $0x240] ss:$16 sps:$4 sm:$0xff]  }
 0x291   :  { %3375 = vmatprep.subr.bf16.mxu1 %v6160_v24  ;;  %v7144_v24 = vld [vmem:[%s9907_s10 + $0x224] ss:$16 sps:$4 sm:$0xff]  }
 0x294   :  { %3376 = vmatpush1.bf16.msra.mxu1 %v6159_v61  ;;  %v7148_v61 = vld [vmem:[%s9907_s10 + $0x200] ss:$16 sps:$4 sm:$0xff]  }
 0x295   :  { %3377 = vmatprep.subr.bf16.mxu1 %v6152_v62  ;;  %v9085_v62 = vld [vmem:[%s9906_s9] sm:$0xff] }
 0x296   :  { %v2965_v1 = vrot.slane %v9085_v62, %v7940_v11  ;;  %v2969_v4 = vrot.slane %v9085_v62, %v7946_v14 }
 0x298   :  { %3378 = vmatpush1.bf16.msra.mxu1 %v6151_v3  ;;  %v7154_v3 = vld [vmem:[%s9907_s10 + $0x3e0] ss:$16 sps:$4 sm:$0xff]  }
 0x299   :  { %3445 = vmatprep.subr.bf16.mxu1 %v6212_v33  ;;  %v7162_v33 = vld [vmem:[%s9907_s10 + $0x3c4] ss:$16 sps:$4 sm:$0xff]  }
 0x29b   :  { %3396 = vmatmul.mubr.bf16.vlgmr.msra.gmra.mxu1 %v8779_v30 }
 0x29c   :  { %3446 = vmatpush1.bf16.msra.mxu1 %v6211_v16  ;;  %3477 = vmatprep.mubr.bf16.mxu1 %v7452_v8  ;;  %v2927_v8 = vld [vmem:[%s9905_s8 + $0xf8] sm:$0xff] }
 0x29d   :  { %3447 = vmatprep.subr.bf16.mxu1 %v6204_v5  ;;  %v6180_v25 = vcombine.high %v2923_v27, %v2927_v8  ;;  %v6179_v32 = vcombine.low %v2923_v27, %v2927_v8  ;;  %v7160_v5 = vld [vmem:[%s9907_s10 + $0x3c0] ss:$16 sps:$4 sm:$0xff]   ;;  %v7174_v8 = vld [vmem:[%s9907_s10 + $0x384] ss:$16 sps:$4 sm:$0xff]  }
 0x2a0   :  { %3448 = vmatpush1.bf16.msra.mxu1 %v6203_v18 }
 0x2a1   :  { %3449 = vmatprep.subr.bf16.mxu1 %v6196_v20 }
 0x2a4   :  { %3450 = vmatpush1.bf16.msra.mxu1 %v6195_v26  ;;  %v7166_v26 = vld [vmem:[%s9907_s10 + $0x3a0] ss:$16 sps:$4 sm:$0xff]  }
 0x2a5   :  { %3451 = vmatprep.subr.bf16.mxu1 %v6188_v19 }
 0x2a8   :  { %3452 = vmatpush1.bf16.msra.mxu1 %v6187_v28 }
 0x2a9   :  { %3453 = vmatprep.subr.bf16.mxu1 %v6180_v25  ;;  %v7058_v25 = vld [vmem:[%s9907_s10 + $0x4e0] ss:$16 sps:$4 sm:$0xff]  }
 0x2ac   :  { %3454 = vmatpush1.bf16.msra.mxu1 %v6179_v32  ;;  %v7180_v32 = vld [vmem:[%s9907_s10 + $0x364] ss:$16 sps:$4 sm:$0xff]  }
 0x2ad   :  { %3455 = vmatprep.subr.bf16.mxu1 %v6172_v38  ;;  %v7061_v38 = vld [vmem:[%s9907_s10 + $0x4c0] ss:$16 sps:$4 sm:$0xff]  }
 0x2b0   :  { %3456 = vmatpush1.bf16.msra.mxu1 %v6171_v36  ;;  %v7186_v36 = vld [vmem:[%s9907_s10 + $0x344] ss:$16 sps:$4 sm:$0xff]  }
 0x2b1   :  { %3457 = vmatprep.subr.bf16.mxu1 %v6164_v39  ;;  %v7064_v39 = vld [vmem:[%s9907_s10 + $0x4a0] ss:$16 sps:$4 sm:$0xff]  }
 0x2b4   :  { %3458 = vmatpush1.bf16.msra.mxu1 %v6163_v44  ;;  %v7192_v44 = vld [vmem:[%s9907_s10 + $0x324] ss:$16 sps:$4 sm:$0xff]  }
 0x2b5   :  { %3459 = vmatprep.subr.bf16.mxu1 %v6156_v45  ;;  %v7067_v45 = vld [vmem:[%s9907_s10 + $0x480] ss:$16 sps:$4 sm:$0xff]  }
 0x2b8   :  { %3460 = vmatpush1.bf16.msra.mxu1 %v6155_v46  ;;  %v7072_v46 = vld [vmem:[%s9907_s10 + $0x464] ss:$16 sps:$4 sm:$0xff]  }
 0x2b9   :  { %5101 = vmatprep.subr.bf16.mxu1 %v7108_v47  ;;  %v7190_v47 = vld [vmem:[%s9907_s10 + $0x320] ss:$16 sps:$4 sm:$0xff]  }
 0x2bb   :  { %v6519_v48 = vpop.f32.mrf.mxu0  ;;  %3478 = vmatmul.mubr.bf16.vlgmr.msra.gmra.mxu1 %v8779_v30 }
 0x2bc   :  { %5102 = vmatpush1.bf16.msra.mxu1 %v7106_v41  ;;  %v7198_v41 = vld [vmem:[%s9907_s10 + $0x304] ss:$16 sps:$4 sm:$0xff]  }
 0x2bd   :  { %v6520_v2 = vpop.f32.mrf.mxu0  ;;  %5103 = vmatprep.subr.bf16.mxu1 %v7114_v37  ;;  %v7070_v37 = vld [vmem:[%s9907_s10 + $0x460] ss:$16 sps:$4 sm:$0xff]  }
 0x2be   :  { %v9047_v6 = vadd.f32 %v6520_v2, %v6519_v48  ;;  %v7075_v48 = vld [vmem:[%s9907_s10 + $0x444] ss:$16 sps:$4 sm:$0xff]  }
 0x2bf   :  { %v6522_v49 = vpop.f32.mrf.mxu0  ;;  %v7204_v2 = vld [vmem:[%s9907_s10 + $0x6e4] ss:$16 sps:$4 sm:$0xff]  }
 0x2c0   :  { %5104 = vmatpush1.bf16.msra.mxu1 %v7112_v34  ;;  %v7196_v34 = vld [vmem:[%s9907_s10 + $0x300] ss:$16 sps:$4 sm:$0xff]   ;;  %v7078_v49 = vld [vmem:[%s9907_s10 + $0x424] ss:$16 sps:$4 sm:$0xff]  }
 0x2c1   :  { %v6523_v30 = vpop.f32.mrf.mxu0  ;;  %5105 = vmatprep.subr.bf16.mxu1 %v7120_v10  ;;  %v7073_v10 = vld [vmem:[%s9907_s10 + $0x440] ss:$16 sps:$4 sm:$0xff]  }
 0x2c2   :  { %v2985_v30 = vrot.slane %v9085_v62, %v139_v60 }
 0x2c4   :  { %5106 = vmatpush1.bf16.msra.mxu1 %v7118_v50  ;;  %v7076_v50 = vld [vmem:[%s9907_s10 + $0x420] ss:$16 sps:$4 sm:$0xff]  }
 0x2c5   :  { %5107 = vmatprep.subr.bf16.mxu1 %v7126_v51  ;;  %v7081_v51 = vld [vmem:[%s9907_s10 + $0x404] ss:$16 sps:$4 sm:$0xff]  }
 0x2c8   :  { %5108 = vmatpush1.bf16.msra.mxu1 %v7124_v52 }
 0x2c9   :  { %5109 = vmatprep.subr.bf16.mxu1 %v7132_v54 }
 0x2cc   :  { %5110 = vmatpush1.bf16.msra.mxu1 %v7130_v56  ;;  %v7079_v56 = vld [vmem:[%s9907_s10 + $0x400] ss:$16 sps:$4 sm:$0xff]  }
 0x2cd   :  { %5111 = vmatprep.subr.bf16.mxu1 %v7138_v57 }
 0x2d0   :  { %5112 = vmatpush1.bf16.msra.mxu1 %v7136_v58  ;;  %v7084_v58 = vld [vmem:[%s9907_s10 + $0x5e4] ss:$16 sps:$4 sm:$0xff]  }
 0x2d1   :  { %5113 = vmatprep.subr.bf16.mxu1 %v7144_v24 }
 0x2d4   :  { %5114 = vmatpush1.bf16.msra.mxu1 %v7142_v59 }
 0x2d5   :  { %5115 = vmatprep.subr.bf16.mxu1 %v7150_v22  ;;  %v7082_v22 = vld [vmem:[%s9907_s10 + $0x5e0] ss:$16 sps:$4 sm:$0xff]  }
 0x2d8   :  { %5116 = vmatpush1.bf16.msra.mxu1 %v7148_v61 }
 0x2d9   :  { %5117 = vmatprep.subr.bf16.mxu1 %v7156_v0  ;;  %v7087_v0 = vld [vmem:[%s9907_s10 + $0x5c4] ss:$16 sps:$4 sm:$0xff]  }
 0x2db   :  { %v3356_v7 = vpop.f32.mrf.mxu0 }
 0x2dc   :  { %v3357_v16 = vadd.f32 %v3356_v7, %v2965_v1  ;;  %5118 = vmatpush2.bf16.msra.mxu1 %v7154_v3  ;;  %v7085_v1 = vld [vmem:[%s9907_s10 + $0x5c0] ss:$16 sps:$4 sm:$0xff]   ;;  %v7090_v3 = vld [vmem:[%s9907_s10 + $0x5a4] ss:$16 sps:$4 sm:$0xff]  }
 0x2dd   :  { %v3358_v17 = vpop.f32.mrf.mxu0  ;;  %5119 = vmatprep.subr.bf16.mxu1 %v7162_v33  ;;  %v7088_v33 = vld [vmem:[%s9907_s10 + $0x5a0] ss:$16 sps:$4 sm:$0xff]  }
 0x2de   :  { %v3486_v18 = vmax.f32 %v3357_v16, 0.0  ;;  %v3359_v20 = vadd.f32 %v3358_v17, %v2969_v4  ;;  %v7093_v4 = vld [vmem:[%s9907_s10 + $0x584] ss:$16 sps:$4 sm:$0xff]   ;;  %v7091_v7 = vld [vmem:[%s9907_s10 + $0x580] ss:$16 sps:$4 sm:$0xff]  }
 0x2df   :  { %v3360_v21 = vpop.f32.mrf.mxu0  ;;  %v7096_v16 = vld [vmem:[%s9907_s10 + $0x564] ss:$16 sps:$4 sm:$0xff]  }
 0x2e0   :  { %v3487_v23 = vmax.f32 %v3359_v20, 0.0  ;;  %5120 = vmatpush2.bf16.msra.mxu1 %v7160_v5  ;;  %v9109_v19 = vpack.c.bf16 %v3486_v18, %v3486_v18  ;;  %v7094_v5 = vld [vmem:[%s9907_s10 + $0x560] ss:$16 sps:$4 sm:$0xff]   ;;  %v7099_v17 = vld [vmem:[%s9907_s10 + $0x544] ss:$16 sps:$4 sm:$0xff]  }
 0x2e1   :  { %v3361_v27 = vpop.f32.mrf.mxu0  ;;  %5121 = vmatprep.subr.bf16.mxu1 %v7168_v12  ;;  %v2981_v12 = vrot.slane %v9085_v62, %v135_v55  ;;  %v7097_v18 = vld [vmem:[%s9907_s10 + $0x540] ss:$16 sps:$4 sm:$0xff]   ;;  %v7102_v20 = vld [vmem:[%s9907_s10 + $0x524] ss:$16 sps:$4 sm:$0xff]  }
 0x2e2   :  { %v9114_v28 = vpack.c.bf16 %v3487_v23, %v3487_v23  ;;  %v7100_v23 = vld [vmem:[%s9907_s10 + $0x520] ss:$16 sps:$4 sm:$0xff]   ;;  %v7105_v55 = vld [vmem:[%s9907_s10 + $0x504] ss:$16 sps:$4 sm:$0xff]  }
 0x2e3   :  { %v7103_v27 = vld [vmem:[%s9907_s10 + $0x500] ss:$16 sps:$4 sm:$0xff]  }
 0x2e4   :  { %5092 = vmatprep.mubr.bf16.mxu0 %v9114_v28  ;;  %5122 = vmatpush2.bf16.msra.mxu1 %v7166_v26 }
 0x2e5   :  { %5093 = vmatmul.mubr.bf16.vlgmr.msra.gmra.mxu0 %v9109_v19  ;;  %5123 = vmatprep.subr.bf16.mxu1 %v7174_v8  ;;  %v7111_v8 = vld [vmem:[%s9907_s10 + $0xec] ss:$16 sps:$4 sm:$0xff]  }
 0x2e6   :  { %5143 = vmatpush1.bf16.msra.mxu0 %v7058_v25 }
 0x2e7   :  { %5144 = vmatprep.subr.bf16.mxu0 %v7063_v29  ;;  %v7109_v29 = vld [vmem:[%s9907_s10 + $0xe8] ss:$16 sps:$4 sm:$0xff]  }
 0x2e8   :  { %5124 = vmatpush2.bf16.msra.mxu1 %v7172_v31  ;;  %v7117_v31 = vld [vmem:[%s9907_s10 + $0xcc] ss:$16 sps:$4 sm:$0xff]  }
 0x2e9   :  { %5125 = vmatprep.subr.bf16.mxu1 %v7180_v32  ;;  %v7115_v32 = vld [vmem:[%s9907_s10 + $0xc8] ss:$16 sps:$4 sm:$0xff]  }
 0x2ea   :  { %5145 = vmatpush1.bf16.msra.mxu0 %v7061_v38  ;;  %v7123_v38 = vld [vmem:[%s9907_s10 + $0xac] ss:$16 sps:$4 sm:$0xff]  }
 0x2eb   :  { %5146 = vmatprep.subr.bf16.mxu0 %v7066_v42  ;;  %v7121_v42 = vld [vmem:[%s9907_s10 + $0xa8] ss:$16 sps:$4 sm:$0xff]  }
 0x2ec   :  { %5126 = vmatpush2.bf16.msra.mxu1 %v7178_v35  ;;  %v7129_v35 = vld [vmem:[%s9907_s10 + $0x8c] ss:$16 sps:$4 sm:$0xff]  }
 0x2ed   :  { %5127 = vmatprep.subr.bf16.mxu1 %v7186_v36  ;;  %v7135_v36 = vld [vmem:[%s9907_s10 + $0x6c] ss:$16 sps:$4 sm:$0xff]  }
 0x2ee   :  { %5147 = vmatpush1.bf16.msra.mxu0 %v7064_v39  ;;  %v7133_v39 = vld [vmem:[%s9907_s10 + $0x68] ss:$16 sps:$4 sm:$0xff]  }
 0x2ef   :  { %5148 = vmatprep.subr.bf16.mxu0 %v7069_v40  ;;  %v7141_v40 = vld [vmem:[%s9907_s10 + $0x4c] ss:$16 sps:$4 sm:$0xff]  }
 0x2f0   :  { %5128 = vmatpush2.bf16.msra.mxu1 %v7184_v43  ;;  %v7139_v43 = vld [vmem:[%s9907_s10 + $0x48] ss:$16 sps:$4 sm:$0xff]  }
 0x2f1   :  { %5129 = vmatprep.subr.bf16.mxu1 %v7192_v44  ;;  %v7147_v44 = vld [vmem:[%s9907_s10 + $0x2c] ss:$16 sps:$4 sm:$0xff]  }
 0x2f2   :  { %5149 = vmatpush1.bf16.msra.mxu0 %v7067_v45  ;;  %v7145_v45 = vld [vmem:[%s9907_s10 + $0x28] ss:$16 sps:$4 sm:$0xff]  }
 0x2f3   :  { %5150 = vmatprep.subr.bf16.mxu0 %v7072_v46  ;;  %v6116_v46 = vld [vmem:[%s9904_s7] ss:$0 sm:$0xff] }
 0x2f4   :  { %5130 = vmatpush2.bf16.msra.mxu1 %v7190_v47 }
 0x2f5   :  { %5131 = vmatprep.subr.bf16.mxu1 %v7198_v41  ;;  %v7153_v41 = vld [vmem:[%s9907_s10 + $0xc] ss:$16 sps:$4 sm:$0xff]  }
 0x2f6   :  { %5151 = vmatpush1.bf16.msra.mxu0 %v7070_v37 }
 0x2f7   :  { %5152 = vmatprep.subr.bf16.mxu0 %v7075_v48  ;;  %v2849_v48 = vadd.f32 %v9047_v6, %v6116_v46  ;;  %v7157_v6 = vld [vmem:[%s9907_s10 + $0x1e8] ss:$16 sps:$4 sm:$0xff]   ;;  %v7226_v46 = vld [vmem:[%s9907_s10 + $0x660] ss:$16 sps:$4 sm:$0xff]  }
 0x2f8   :  { %5132 = vmatpush2.bf16.msra.mxu1 %v7196_v34 }
 0x2f9   :  { %5183 = vmatprep.subr.bf16.mxu1 %v7204_v2  ;;  %v7151_v2 = vld [vmem:[%s9907_s10 + $0x8] ss:$16 sps:$4 sm:$0xff]  }
 0x2fa   :  { %5153 = vmatpush1.bf16.msra.mxu0 %v7073_v10 }
 0x2fb   :  { %5154 = vmatprep.subr.bf16.mxu0 %v7078_v49  ;;  %v3438_v52 = vpop.f32.mrf.mxu0  ;;  %v7159_v49 = vld [vmem:[%s9907_s10 + $0x1ec] ss:$16 sps:$4 sm:$0xff]  }
 0x2fc   :  { %v3439_v21 = vadd.f32 %v3438_v52, %v2981_v12  ;;  %v7163_v52 = vld [vmem:[%s9907_s10 + $0x1c8] ss:$16 sps:$4 sm:$0xff]  }
 0x2fd   :  { %v3440_v54 = vpop.f32.mrf.mxu0  ;;  %v7199_v12 = vld [vmem:[%s9907_s10 + $0x108] ss:$16 sps:$4 sm:$0xff]  }
 0x2fe   :  { %5155 = vmatpush1.bf16.msra.mxu0 %v7076_v50  ;;  %v3441_v57 = vadd.f32 %v3440_v54, %v2985_v30  ;;  %v3490_v26 = vmax.f32 %v3439_v21, 0.0  ;;  %v7171_v54 = vld [vmem:[%s9907_s10 + $0x1ac] ss:$16 sps:$4 sm:$0xff]  }
 0x2ff   :  { %5156 = vmatprep.subr.bf16.mxu0 %v7081_v51  ;;  %v3442_v24 = vpop.f32.mrf.mxu0  ;;  %v7165_v51 = vld [vmem:[%s9907_s10 + $0x1cc] ss:$16 sps:$4 sm:$0xff]  }
 0x300   :  { %v3491_v60 = vmax.f32 %v3441_v57, 0.0  ;;  %v9253_v25 = vpack.c.bf16 %v3490_v26, %v3490_v26  ;;  %v7177_v57 = vld [vmem:[%s9907_s10 + $0x18c] ss:$16 sps:$4 sm:$0xff]  }
 0x301   :  { %v3443_v59 = vpop.f32.mrf.mxu0  ;;  %v7183_v24 = vld [vmem:[%s9907_s10 + $0x16c] ss:$16 sps:$4 sm:$0xff]  }
 0x302   :  { %5157 = vmatpush1.bf16.msra.mxu0 %v7079_v56  ;;  %v9202_v61 = vpack.c.bf16 %v3491_v60, %v3491_v60  ;;  %v7169_v56 = vld [vmem:[%s9907_s10 + $0x1a8] ss:$16 sps:$4 sm:$0xff]   ;;  %v7189_v59 = vld [vmem:[%s9907_s10 + $0x14c] ss:$16 sps:$4 sm:$0xff]  }
 0x303   :  { %5158 = vmatprep.subr.bf16.mxu0 %v7084_v58  ;;  %v7175_v58 = vld [vmem:[%s9907_s10 + $0x188] ss:$16 sps:$4 sm:$0xff]   ;;  %v7207_v21 = vld [vmem:[%s9907_s10 + $0x4ec] ss:$16 sps:$4 sm:$0xff]  }
 0x304   :  { %5174 = vmatprep.mubr.bf16.mxu0 %v9202_v61  ;;  %v7181_v60 = vld [vmem:[%s9907_s10 + $0x168] ss:$16 sps:$4 sm:$0xff]  }
 0x306   :  { %5159 = vmatpush2.bf16.msra.mxu0 %v7082_v22  ;;  %v7187_v22 = vld [vmem:[%s9907_s10 + $0x148] ss:$16 sps:$4 sm:$0xff]  }
 0x307   :  { %5160 = vmatprep.subr.bf16.mxu0 %v7087_v0  ;;  %v7195_v0 = vld [vmem:[%s9907_s10 + $0x12c] ss:$16 sps:$4 sm:$0xff]  }
 0x30a   :  { %5161 = vmatpush2.bf16.msra.mxu0 %v7085_v1  ;;  %v2973_v1 = vrot.slane %v9085_v62, %v7943_v13 }
 0x30b   :  { %5162 = vmatprep.subr.bf16.mxu0 %v7090_v3  ;;  %v7193_v3 = vld [vmem:[%s9907_s10 + $0x128] ss:$16 sps:$4 sm:$0xff]  }
 0x30e   :  { %5163 = vmatpush2.bf16.msra.mxu0 %v7088_v33  ;;  %v2977_v33 = vrot.slane %v9085_v62, %v7949_v15 }
 0x30f   :  { %5164 = vmatprep.subr.bf16.mxu0 %v7093_v4 }
 0x312   :  { %5165 = vmatpush2.bf16.msra.mxu0 %v7091_v7  ;;  %v7201_v7 = vld [vmem:[%s9907_s10 + $0x10c] ss:$16 sps:$4 sm:$0xff]  }
 0x313   :  { %5166 = vmatprep.subr.bf16.mxu0 %v7096_v16 }
 0x316   :  { %5167 = vmatpush2.bf16.msra.mxu0 %v7094_v5 }
 0x317   :  { %5168 = vmatprep.subr.bf16.mxu0 %v7099_v17 }
 0x31a   :  { %5169 = vmatpush2.bf16.msra.mxu0 %v7097_v18 }
 0x31b   :  { %5170 = vmatprep.subr.bf16.mxu0 %v7102_v20 }
 0x31e   :  { %5171 = vmatpush2.bf16.msra.mxu0 %v7100_v23 }
 0x31f   :  { %5172 = vmatprep.subr.bf16.mxu0 %v7105_v55 }
 0x322   :  { %5173 = vmatpush2.bf16.msra.mxu0 %v7103_v27  ;;  %v7202_v27 = vld [vmem:[%s9907_s10 + $0x6e0] ss:$16 sps:$4 sm:$0xff]  }
 0x323   :  { %5224 = vmatprep.subr.bf16.mxu0 %v7111_v8  ;;  %v7205_v8 = vld [vmem:[%s9907_s10 + $0x4e8] ss:$16 sps:$4 sm:$0xff]  }
 0x325   :  { %5175 = vmatmul.mubr.bf16.vlgmr.msra.gmra.mxu0 %v9253_v25 }
 0x326   :  { %5225 = vmatpush1.bf16.msra.mxu0 %v7109_v29  ;;  %5256 = vmatprep.mubr.bf16.mxu0 %v9114_v28  ;;  %v7127_v28 = vld [vmem:[%s9907_s10 + $0x88] ss:$16 sps:$4 sm:$0xff]  }
 0x327   :  { %5226 = vmatprep.subr.bf16.mxu0 %v7117_v31  ;;  %v7210_v31 = vld [vmem:[%s9907_s10 + $0x6c4] ss:$16 sps:$4 sm:$0xff]  }
 0x32a   :  { %5227 = vmatpush1.bf16.msra.mxu0 %v7115_v32  ;;  %v7213_v32 = vld [vmem:[%s9907_s10 + $0x4cc] ss:$16 sps:$4 sm:$0xff]  }
 0x32b   :  { %5228 = vmatprep.subr.bf16.mxu0 %v7123_v38  ;;  %v7208_v38 = vld [vmem:[%s9907_s10 + $0x6c0] ss:$16 sps:$4 sm:$0xff]  }
 0x32e   :  { %5229 = vmatpush1.bf16.msra.mxu0 %v7121_v42  ;;  %v7211_v42 = vld [vmem:[%s9907_s10 + $0x4c8] ss:$16 sps:$4 sm:$0xff]  }
 0x32f   :  { %5230 = vmatprep.subr.bf16.mxu0 %v7129_v35  ;;  %v7216_v35 = vld [vmem:[%s9907_s10 + $0x6a4] ss:$16 sps:$4 sm:$0xff]  }
 0x332   :  { %5231 = vmatpush1.bf16.msra.mxu0 %v7127_v28  ;;  %v7214_v28 = vld [vmem:[%s9907_s10 + $0x6a0] ss:$16 sps:$4 sm:$0xff]  }
 0x333   :  { %5232 = vmatprep.subr.bf16.mxu0 %v7135_v36  ;;  %v7217_v36 = vld [vmem:[%s9907_s10 + $0x4a8] ss:$16 sps:$4 sm:$0xff]  }
 0x336   :  { %5233 = vmatpush1.bf16.msra.mxu0 %v7133_v39  ;;  %v7222_v39 = vld [vmem:[%s9907_s10 + $0x684] ss:$16 sps:$4 sm:$0xff]  }
 0x337   :  { %5234 = vmatprep.subr.bf16.mxu0 %v7141_v40  ;;  %v7220_v40 = vld [vmem:[%s9907_s10 + $0x680] ss:$16 sps:$4 sm:$0xff]  }
 0x33a   :  { %5235 = vmatpush1.bf16.msra.mxu0 %v7139_v43  ;;  %v7223_v43 = vld [vmem:[%s9907_s10 + $0x488] ss:$16 sps:$4 sm:$0xff]  }
 0x33b   :  { %v6541_v47 = vpop.f32.mrf.mxu1  ;;  %5236 = vmatprep.subr.bf16.mxu0 %v7147_v44  ;;  %v7228_v44 = vld [vmem:[%s9907_s10 + $0x664] ss:$16 sps:$4 sm:$0xff]  }
 0x33d   :  { %v6542_v37 = vpop.f32.mrf.mxu1 }
 0x33e   :  { %5237 = vmatpush1.bf16.msra.mxu0 %v7145_v45  ;;  %v6543_v34 = vadd.f32 %v6542_v37, %v6541_v47  ;;  %v7231_v45 = vld [vmem:[%s9907_s10 + $0x46c] ss:$16 sps:$4 sm:$0xff]   ;;  %v7229_v47 = vld [vmem:[%s9907_s10 + $0x468] ss:$16 sps:$4 sm:$0xff]  }
 0x33f   :  { %v6544_v10 = vpop.f32.mrf.mxu1  ;;  %5238 = vmatprep.subr.bf16.mxu0 %v7153_v41  ;;  %v7234_v41 = vld [vmem:[%s9907_s10 + $0x644] ss:$16 sps:$4 sm:$0xff]   ;;  %v7237_v37 = vld [vmem:[%s9907_s10 + $0x44c] ss:$16 sps:$4 sm:$0xff]  }
 0x340   :  { %v9309_v50 = vadd.f32 %v6543_v34, %v2849_v48  ;;  %v7232_v48 = vld [vmem:[%s9907_s10 + $0x640] ss:$16 sps:$4 sm:$0xff]   ;;  %v7235_v34 = vld [vmem:[%s9907_s10 + $0x448] ss:$16 sps:$4 sm:$0xff]   ;;  %v7243_v10 = vld [vmem:[%s9907_s10 + $0x42c] ss:$16 sps:$4 sm:$0xff]  }
 0x341   :  { %v6545_v30 = vpop.f32.mrf.mxu1 }
 0x342   :  { %5239 = vmatpush1.bf16.msra.mxu0 %v7151_v2  ;;  %v7240_v2 = vld [vmem:[%s9907_s10 + $0x624] ss:$16 sps:$4 sm:$0xff]   ;;  %v7241_v30 = vld [vmem:[%s9907_s10 + $0x428] ss:$16 sps:$4 sm:$0xff]  }
 0x343   :  { %5240 = vmatprep.subr.bf16.mxu0 %v7159_v49  ;;  %v7238_v49 = vld [vmem:[%s9907_s10 + $0x620] ss:$16 sps:$4 sm:$0xff]  }
 0x346   :  { %5241 = vmatpush2.bf16.msra.mxu0 %v7157_v6  ;;  %v2993_v6 = vrot.slane %v9085_v62, %v147_v63  ;;  %v7247_v63 = vld [vmem:[%s9907_s10 + $0x408] ss:$16 sps:$4 sm:$0xff]  }
 0x347   :  { %5242 = vmatprep.subr.bf16.mxu0 %v7165_v51  ;;  %v7246_v51 = vld [vmem:[%s9907_s10 + $0x604] ss:$16 sps:$4 sm:$0xff]  }
 0x34a   :  { %5243 = vmatpush2.bf16.msra.mxu0 %v7163_v52  ;;  %v7249_v52 = vld [vmem:[%s9907_s10 + $0x40c] ss:$16 sps:$4 sm:$0xff]  }
 0x34b   :  { %5244 = vmatprep.subr.bf16.mxu0 %v7171_v54 }
 0x34e   :  { %5245 = vmatpush2.bf16.msra.mxu0 %v7169_v56 }
 0x34f   :  { %5246 = vmatprep.subr.bf16.mxu0 %v7177_v57  ;;  %v7244_v57 = vld [vmem:[%s9907_s10 + $0x600] ss:$16 sps:$4 sm:$0xff]  }
 0x352   :  { %5247 = vmatpush2.bf16.msra.mxu0 %v7175_v58 }
 0x353   :  { %5248 = vmatprep.subr.bf16.mxu0 %v7183_v24  ;;  %v7252_v24 = vld [vmem:[%s9907_s10 + $0x7e4] ss:$16 sps:$4 sm:$0xff]  }
 0x356   :  { %5249 = vmatpush2.bf16.msra.mxu0 %v7181_v60  ;;  %v7255_v60 = vld [vmem:[%s9907_s10 + $0x5ec] ss:$16 sps:$4 sm:$0xff]  }
 0x357   :  { %5250 = vmatprep.subr.bf16.mxu0 %v7189_v59 }
 0x35a   :  { %5251 = vmatpush2.bf16.msra.mxu0 %v7187_v22 }
 0x35b   :  { %v3397_v4 = vpop.f32.mrf.mxu1  ;;  %5252 = vmatprep.subr.bf16.mxu0 %v7195_v0 }
 0x35c   :  { %v3398_v16 = vadd.f32 %v3397_v4, %v2973_v1  ;;  %v7250_v1 = vld [vmem:[%s9907_s10 + $0x7e0] ss:$16 sps:$4 sm:$0xff]   ;;  %v7258_v4 = vld [vmem:[%s9907_s10 + $0x7c4] ss:$16 sps:$4 sm:$0xff]  }
 0x35d   :  { %v3399_v5 = vpop.f32.mrf.mxu1 }
 0x35e   :  { %v3400_v17 = vadd.f32 %v3399_v5, %v2977_v33  ;;  %5253 = vmatpush2.bf16.msra.mxu0 %v7193_v3  ;;  %v3488_v18 = vmax.f32 %v3398_v16, 0.0  ;;  %v7253_v3 = vld [vmem:[%s9907_s10 + $0x5e8] ss:$16 sps:$4 sm:$0xff]   ;;  %v7256_v16 = vld [vmem:[%s9907_s10 + $0x7c0] ss:$16 sps:$4 sm:$0xff]  }
 0x35f   :  { %v3401_v20 = vpop.f32.mrf.mxu1  ;;  %5254 = vmatprep.subr.bf16.mxu0 %v7201_v7  ;;  %v7261_v7 = vld [vmem:[%s9907_s10 + $0x5cc] ss:$16 sps:$4 sm:$0xff]   ;;  %v7259_v5 = vld [vmem:[%s9907_s10 + $0x5c8] ss:$16 sps:$4 sm:$0xff]  }
 0x360   :  { %v3489_v23 = vmax.f32 %v3400_v17, 0.0  ;;  %v9371_v29 = vpack.c.bf16 %v3488_v18, %v3488_v18  ;;  %v7264_v17 = vld [vmem:[%s9907_s10 + $0x7a4] ss:$16 sps:$4 sm:$0xff]   ;;  %v7262_v18 = vld [vmem:[%s9907_s10 + $0x7a0] ss:$16 sps:$4 sm:$0xff]  }
 0x361   :  { %v3402_v55 = vpop.f32.mrf.mxu1  ;;  %v7265_v20 = vld [vmem:[%s9907_s10 + $0x5a8] ss:$16 sps:$4 sm:$0xff]  }
 0x362   :  { %v9363_v26 = vpack.c.bf16 %v3489_v23, %v3489_v23  ;;  %5255 = vmatpush2.bf16.msra.mxu0 %v7199_v12  ;;  %v7267_v12 = vld [vmem:[%s9907_s10 + $0x5ac] ss:$16 sps:$4 sm:$0xff]   ;;  %v7268_v55 = vld [vmem:[%s9907_s10 + $0x780] ss:$16 sps:$4 sm:$0xff]  }
 0x363   :  { %5306 = vmatprep.subr.bf16.mxu0 %v7207_v21  ;;  %v7270_v21 = vld [vmem:[%s9907_s10 + $0x784] ss:$16 sps:$4 sm:$0xff]   ;;  %v7273_v23 = vld [vmem:[%s9907_s10 + $0x58c] ss:$16 sps:$4 sm:$0xff]  }
 0x364   :  { %5133 = vmatprep.mubr.bf16.mxu1 %v9363_v26 }
 0x365   :  { %5257 = vmatmul.mubr.bf16.vlgmr.msra.gmra.mxu0 %v9109_v19  ;;  %5134 = vmatmul.mubr.bf16.vlgmr.msra.gmra.mxu1 %v9371_v29  ;;  %v7219_v19 = vld [vmem:[%s9907_s10 + $0x4ac] ss:$16 sps:$4 sm:$0xff]  }
 0x366   :  { %5184 = vmatpush1.bf16.msra.mxu1 %v7202_v27  ;;  %5307 = vmatpush1.bf16.msra.mxu0 %v7205_v8  ;;  %v7271_v27 = vld [vmem:[%s9907_s10 + $0x588] ss:$16 sps:$4 sm:$0xff]   ;;  %v7276_v8 = vld [vmem:[%s9907_s10 + $0x764] ss:$16 sps:$4 sm:$0xff]  }
 0x367   :  { %5185 = vmatprep.subr.bf16.mxu1 %v7210_v31  ;;  %5308 = vmatprep.subr.bf16.mxu0 %v7213_v32  ;;  %v7279_v31 = vld [vmem:[%s9907_s10 + $0x56c] ss:$16 sps:$4 sm:$0xff]   ;;  %v7274_v32 = vld [vmem:[%s9907_s10 + $0x760] ss:$16 sps:$4 sm:$0xff]  }
 0x368   :  { %5338 = vmatprep.mubr.bf16.mxu0 %v9202_v61  ;;  %v7225_v61 = vld [vmem:[%s9907_s10 + $0x48c] ss:$16 sps:$4 sm:$0xff]  }
 0x36a   :  { %5186 = vmatpush1.bf16.msra.mxu1 %v7208_v38  ;;  %5309 = vmatpush1.bf16.msra.mxu0 %v7211_v42  ;;  %v7277_v38 = vld [vmem:[%s9907_s10 + $0x568] ss:$16 sps:$4 sm:$0xff]   ;;  %v7282_v42 = vld [vmem:[%s9907_s10 + $0x744] ss:$16 sps:$4 sm:$0xff]  }
 0x36b   :  { %5187 = vmatprep.subr.bf16.mxu1 %v7216_v35  ;;  %5310 = vmatprep.subr.bf16.mxu0 %v7219_v19  ;;  %v7285_v35 = vld [vmem:[%s9907_s10 + $0x54c] ss:$16 sps:$4 sm:$0xff]   ;;  %v7280_v19 = vld [vmem:[%s9907_s10 + $0x740] ss:$16 sps:$4 sm:$0xff]  }
 0x36e   :  { %5188 = vmatpush1.bf16.msra.mxu1 %v7214_v28  ;;  %5311 = vmatpush1.bf16.msra.mxu0 %v7217_v36  ;;  %v7283_v28 = vld [vmem:[%s9907_s10 + $0x548] ss:$16 sps:$4 sm:$0xff]   ;;  %v2989_v36 = vrot.slane %v9085_v62, %v143_v53  ;;  %v7294_v62 = vld [vmem:[%s9907_s10 + $0x704] ss:$16 sps:$4 sm:$0xff]  }
 0x36f   :  { %5189 = vmatprep.subr.bf16.mxu1 %v7222_v39  ;;  %5312 = vmatprep.subr.bf16.mxu0 %v7225_v61  ;;  %v7288_v39 = vld [vmem:[%s9907_s10 + $0x724] ss:$16 sps:$4 sm:$0xff]   ;;  %v7291_v61 = vld [vmem:[%s9907_s10 + $0x52c] ss:$16 sps:$4 sm:$0xff]  }
 0x372   :  { %5190 = vmatpush1.bf16.msra.mxu1 %v7220_v40  ;;  %5313 = vmatpush1.bf16.msra.mxu0 %v7223_v43  ;;  %v7286_v40 = vld [vmem:[%s9907_s10 + $0x720] ss:$16 sps:$4 sm:$0xff]   ;;  %v7297_v43 = vld [vmem:[%s9907_s10 + $0x50c] ss:$16 sps:$4 sm:$0xff]  }
 0x373   :  { %5191 = vmatprep.subr.bf16.mxu1 %v7228_v44  ;;  %5314 = vmatprep.subr.bf16.mxu0 %v7231_v45  ;;  %v7292_v44 = vld [vmem:[%s9907_s10 + $0x700] ss:$16 sps:$4 sm:$0xff]   ;;  %v7295_v45 = vld [vmem:[%s9907_s10 + $0x508] ss:$16 sps:$4 sm:$0xff]  }
 0x376   :  { %5192 = vmatpush1.bf16.msra.mxu1 %v7226_v46  ;;  %5315 = vmatpush1.bf16.msra.mxu0 %v7229_v47  ;;  %v7300_v47 = vld [vmem:[%s9907_s10 + $0x2ec] ss:$16 sps:$4 sm:$0xff]  }
 0x377   :  { %5193 = vmatprep.subr.bf16.mxu1 %v7234_v41  ;;  %5316 = vmatprep.subr.bf16.mxu0 %v7237_v37  ;;  %v7298_v41 = vld [vmem:[%s9907_s10 + $0x2e8] ss:$16 sps:$4 sm:$0xff]  }
 0x37a   :  { %5194 = vmatpush1.bf16.msra.mxu1 %v7232_v48  ;;  %5317 = vmatpush1.bf16.msra.mxu0 %v7235_v34  ;;  %v7303_v48 = vld [vmem:[%s9907_s10 + $0x2cc] ss:$16 sps:$4 sm:$0xff]  }
 0x37b   :  { %5195 = vmatprep.subr.bf16.mxu1 %v7240_v2  ;;  %5318 = vmatprep.subr.bf16.mxu0 %v7243_v10  ;;  %v9458_v54 = vpop.f32.mrf.mxu1  ;;  %v7301_v2 = vld [vmem:[%s9907_s10 + $0x2c8] ss:$16 sps:$4 sm:$0xff]   ;;  %v7306_v10 = vld [vmem:[%s9907_s10 + $0x2ac] ss:$16 sps:$4 sm:$0xff]  }
 0x37c   :  { %v3480_v53 = vadd.f32 %v9458_v54, %v2989_v36  ;;  %v7396_v54 = vld [vmem:[%s9909_s12 + $0x70] sm:$0xff]   ;;  %v7340_v36 = vld [vmem:[%s9907_s10 + $0x328] ss:$16 sps:$4 sm:$0xff]  }
 0x37d   :  { %v3481_v56 = vpop.f32.mrf.mxu1 }
 0x37e   :  { %5196 = vmatpush1.bf16.msra.mxu1 %v7238_v49  ;;  %5319 = vmatpush1.bf16.msra.mxu0 %v7241_v30  ;;  %v3482_v58 = vadd.f32 %v3481_v56, %v2993_v6  ;;  %v3492_v46 = vmax.f32 %v3480_v53, 0.0  ;;  %v7307_v56 = vld [vmem:[%s9907_s10 + $0x288] ss:$16 sps:$4 sm:$0xff]   ;;  %v7351_v53 = vld [vmem:[%s9907_s10 + $0x6cc] ss:$16 sps:$4 sm:$0xff]  }
 0x37f   :  { %5197 = vmatprep.subr.bf16.mxu1 %v7246_v51  ;;  %5320 = vmatprep.subr.bf16.mxu0 %v7249_v52  ;;  %v3483_v59 = vpop.f32.mrf.mxu1  ;;  %v7394_v51 = vld [vmem:[%s9909_s12 + $0x78] sm:$0xff]  }
 0x380   :  { %v3493_v22 = vmax.f32 %v3482_v58, 0.0  ;;  %v9575_v37 = vpack.c.bf16 %v3492_v46, %v3492_v46  ;;  %v7395_v52 = vld [vmem:[%s9909_s12 + $0x38] sm:$0xff]   ;;  %v7398_v58 = vld [vmem:[%s9909_s12 + $0x68] sm:$0xff]  }
 0x381   :  { %v3484_v0 = vpop.f32.mrf.mxu1  ;;  %v7315_v59 = vld [vmem:[%s9907_s10 + $0x24c] ss:$16 sps:$4 sm:$0xff]  }
 0x382   :  { %5198 = vmatpush1.bf16.msra.mxu1 %v7244_v57  ;;  %5321 = vmatpush1.bf16.msra.mxu0 %v7247_v63  ;;  %v9478_v33 = vpack.c.bf16 %v3493_v22, %v3493_v22  ;;  %v7397_v57 = vld [vmem:[%s9909_s12 + $0x30] sm:$0xff]   ;;  %v7312_v63 = vld [vmem:[%s9907_s10 + $0x26c] ss:$16 sps:$4 sm:$0xff]   ;;  %v7400_v22 = vld [vmem:[%s9909_s12 + $0x60] sm:$0xff]  }
 0x383   :  { %5199 = vmatprep.subr.bf16.mxu1 %v7252_v24  ;;  %5322 = vmatprep.subr.bf16.mxu0 %v7255_v60  ;;  %v7310_v24 = vld [vmem:[%s9907_s10 + $0x268] ss:$16 sps:$4 sm:$0xff]  }
 0x384   :  { %5215 = vmatprep.mubr.bf16.mxu1 %v9478_v33  ;;  %v7399_v60 = vld [vmem:[%s9909_s12 + $0x28] sm:$0xff]  }
 0x385   :  { %v7313_v0 = vld [vmem:[%s9907_s10 + $0x248] ss:$16 sps:$4 sm:$0xff]  }
 0x386   :  { %5200 = vmatpush2.bf16.msra.mxu1 %v7250_v1  ;;  %5323 = vmatpush2.bf16.msra.mxu0 %v7253_v3  ;;  %v7401_v1 = vld [vmem:[%s9909_s12 + $0x20] sm:$0xff]   ;;  %v7318_v3 = vld [vmem:[%s9907_s10 + $0x22c] ss:$16 sps:$4 sm:$0xff]  }
 0x387   :  { %5201 = vmatprep.subr.bf16.mxu1 %v7258_v4  ;;  %5324 = vmatprep.subr.bf16.mxu0 %v7261_v7  ;;  %v7402_v4 = vld [vmem:[%s9909_s12 + $0x58] sm:$0xff]  }
 0x388   :  { %v7316_v7 = vld [vmem:[%s9907_s10 + $0x228] ss:$16 sps:$4 sm:$0xff]  }
 0x38a   :  { %5202 = vmatpush2.bf16.msra.mxu1 %v7256_v16  ;;  %5325 = vmatpush2.bf16.msra.mxu0 %v7259_v5  ;;  %v7403_v16 = vld [vmem:[%s9909_s12 + $0x18] sm:$0xff]  }
 0x38b   :  { %5203 = vmatprep.subr.bf16.mxu1 %v7264_v17  ;;  %5326 = vmatprep.subr.bf16.mxu0 %v7267_v12  ;;  %v7321_v5 = vld [vmem:[%s9907_s10 + $0x20c] ss:$16 sps:$4 sm:$0xff]   ;;  %v7404_v17 = vld [vmem:[%s9909_s12 + $0x50] sm:$0xff]   ;;  %v7319_v12 = vld [vmem:[%s9907_s10 + $0x208] ss:$16 sps:$4 sm:$0xff]  }
 0x38e   :  { %5204 = vmatpush2.bf16.msra.mxu1 %v7262_v18  ;;  %5327 = vmatpush2.bf16.msra.mxu0 %v7265_v20  ;;  %v7405_v18 = vld [vmem:[%s9909_s12 + $0x10] sm:$0xff]   ;;  %v7324_v20 = vld [vmem:[%s9907_s10 + $0x3ec] ss:$16 sps:$4 sm:$0xff]  }
 0x38f   :  { %5205 = vmatprep.subr.bf16.mxu1 %v7270_v21  ;;  %5328 = vmatprep.subr.bf16.mxu0 %v7273_v23  ;;  %v7322_v21 = vld [vmem:[%s9907_s10 + $0x3e8] ss:$16 sps:$4 sm:$0xff]   ;;  %v7327_v23 = vld [vmem:[%s9907_s10 + $0x3cc] ss:$16 sps:$4 sm:$0xff]  }
 0x392   :  { %5206 = vmatpush2.bf16.msra.mxu1 %v7268_v55  ;;  %5329 = vmatpush2.bf16.msra.mxu0 %v7271_v27  ;;  %v7325_v55 = vld [vmem:[%s9907_s10 + $0x3c8] ss:$16 sps:$4 sm:$0xff]   ;;  %v7330_v27 = vld [vmem:[%s9907_s10 + $0x3ac] ss:$16 sps:$4 sm:$0xff]  }
 0x393   :  { %5207 = vmatprep.subr.bf16.mxu1 %v7276_v8  ;;  %5330 = vmatprep.subr.bf16.mxu0 %v7279_v31  ;;  %v7328_v8 = vld [vmem:[%s9907_s10 + $0x3a8] ss:$16 sps:$4 sm:$0xff]   ;;  %v7333_v31 = vld [vmem:[%s9907_s10 + $0x38c] ss:$16 sps:$4 sm:$0xff]  }
 0x396   :  { %5208 = vmatpush2.bf16.msra.mxu1 %v7274_v32  ;;  %5331 = vmatpush2.bf16.msra.mxu0 %v7277_v38  ;;  %v7331_v32 = vld [vmem:[%s9907_s10 + $0x388] ss:$16 sps:$4 sm:$0xff]   ;;  %v7336_v38 = vld [vmem:[%s9907_s10 + $0x36c] ss:$16 sps:$4 sm:$0xff]  }
 0x397   :  { %5209 = vmatprep.subr.bf16.mxu1 %v7282_v42  ;;  %5332 = vmatprep.subr.bf16.mxu0 %v7285_v35  ;;  %v7334_v42 = vld [vmem:[%s9907_s10 + $0x368] ss:$16 sps:$4 sm:$0xff]   ;;  %v7339_v35 = vld [vmem:[%s9907_s10 + $0x34c] ss:$16 sps:$4 sm:$0xff]  }
 0x39a   :  { %5210 = vmatpush2.bf16.msra.mxu1 %v7280_v19  ;;  %5333 = vmatpush2.bf16.msra.mxu0 %v7283_v28  ;;  %v7337_v19 = vld [vmem:[%s9907_s10 + $0x348] ss:$16 sps:$4 sm:$0xff]   ;;  %v7342_v28 = vld [vmem:[%s9907_s10 + $0x32c] ss:$16 sps:$4 sm:$0xff]  }
 0x39b   :  { %5211 = vmatprep.subr.bf16.mxu1 %v7288_v39  ;;  %5334 = vmatprep.subr.bf16.mxu0 %v7291_v61  ;;  %v7345_v39 = vld [vmem:[%s9907_s10 + $0x30c] ss:$16 sps:$4 sm:$0xff]   ;;  %v7343_v61 = vld [vmem:[%s9907_s10 + $0x308] ss:$16 sps:$4 sm:$0xff]  }
 0x39e   :  { %5212 = vmatpush2.bf16.msra.mxu1 %v7286_v40  ;;  %5335 = vmatpush2.bf16.msra.mxu0 %v7289_v9  ;;  %v7348_v40 = vld [vmem:[%s9907_s10 + $0x6ec] ss:$16 sps:$4 sm:$0xff]   ;;  %v7346_v9 = vld [vmem:[%s9907_s10 + $0x6e8] ss:$16 sps:$4 sm:$0xff]  }
 0x39f   :  { %5213 = vmatprep.subr.bf16.mxu1 %v7294_v62  ;;  %5336 = vmatprep.subr.bf16.mxu0 %v7297_v43  ;;  %v7406_v43 = vld [vmem:[%s9909_s12 + $0x48] sm:$0xff]  }
 0x3a2   :  { %5214 = vmatpush2.bf16.msra.mxu1 %v7292_v44  ;;  %5337 = vmatpush2.bf16.msra.mxu0 %v7295_v45  ;;  %v7349_v44 = vld [vmem:[%s9907_s10 + $0x6c8] ss:$16 sps:$4 sm:$0xff]  }
 0x3a3   :  { %5265 = vmatprep.subr.bf16.mxu1 %v7300_v47  ;;  %6547 = vmatprep.subr.bf16.mxu0 %v7394_v51  ;;  %v7407_v45 = vld [vmem:[%s9909_s12 + $0x8] sm:$0xff]  }
 0x3a4   :  { %v7361_v51 = vld [vmem:[%s9907_s10 + $0x648] ss:$16 sps:$4 sm:$0xff]  }
 0x3a5   :  { %5216 = vmatmul.mubr.bf16.vlgmr.msra.gmra.mxu1 %v9575_v37  ;;  %5339 = vmatmul.mubr.bf16.vlgmr.msra.gmra.mxu0 %v9253_v25  ;;  %v9582_v34 = vpop.f32.mrf.mxu0  ;;  %v7304_v25 = vld [vmem:[%s9907_s10 + $0x2a8] ss:$16 sps:$4 sm:$0xff]  }
 0x3a6   :  { %5266 = vmatpush1.bf16.msra.mxu1 %v7298_v41  ;;  %5297 = vmatprep.mubr.bf16.mxu1 %v9363_v26  ;;  %v7309_v26 = vld [vmem:[%s9907_s10 + $0x28c] ss:$16 sps:$4 sm:$0xff]   ;;  %v7352_v41 = vld [vmem:[%s9907_s10 + $0x6a8] ss:$16 sps:$4 sm:$0xff]  }
 0x3a7   :  { %5267 = vmatprep.subr.bf16.mxu1 %v7303_v48  ;;  %v9591_v49 = vpop.f32.mrf.mxu0  ;;  %6548 = vmatpush3.bf16.msra.mxu0 %v7395_v52  ;;  %v7409_v48 = vld [vmem:[%s9909_s12] sm:$0xff]   ;;  %v7366_v52 = vld [vmem:[%s9907_s10 + $0x62c] ss:$16 sps:$4 sm:$0xff]  }
 0x3a8   :  { %6549 = vmatprep.subr.bf16.mxu0 %v7396_v54  ;;  %v7364_v54 = vld [vmem:[%s9907_s10 + $0x628] ss:$16 sps:$4 sm:$0xff]  }
 0x3a9   :  { %v5098_v30 = vpop.f32.mrf.mxu0 }
 0x3aa   :  { %5268 = vmatpush1.bf16.msra.mxu1 %v7301_v2  ;;  %v7357_v2 = vld [vmem:[%s9907_s10 + $0x68c] ss:$16 sps:$4 sm:$0xff]   ;;  %v7355_v30 = vld [vmem:[%s9907_s10 + $0x688] ss:$16 sps:$4 sm:$0xff]  }
 0x3ab   :  { %5269 = vmatprep.subr.bf16.mxu1 %v7306_v10  ;;  %v5099_v6 = vpop.f32.mrf.mxu0  ;;  %6550 = vmatpush3.bf16.msra.mxu0 %v7397_v57  ;;  %v7367_v57 = vld [vmem:[%s9907_s10 + $0x608] ss:$16 sps:$4 sm:$0xff]  }
 0x3ac   :  { %6551 = vmatprep.subr.bf16.mxu0 %v7398_v58  ;;  %v7363_v6 = vld [vmem:[%s9907_s10 + $0x64c] ss:$16 sps:$4 sm:$0xff]   ;;  %v7370_v58 = vld [vmem:[%s9907_s10 + $0x7e8] ss:$16 sps:$4 sm:$0xff]  }
 0x3ae   :  { %5270 = vmatpush1.bf16.msra.mxu1 %v7304_v25  ;;  %v7360_v25 = vld [vmem:[%s9907_s10 + $0x66c] ss:$16 sps:$4 sm:$0xff]  }
 0x3af   :  { %5271 = vmatprep.subr.bf16.mxu1 %v7309_v26  ;;  %6552 = vmatpush3.bf16.msra.mxu0 %v7399_v60  ;;  %v7358_v26 = vld [vmem:[%s9907_s10 + $0x668] ss:$16 sps:$4 sm:$0xff]  }
 0x3b0   :  { %6553 = vmatprep.subr.bf16.mxu0 %v7400_v22  ;;  %v7373_v60 = vld [vmem:[%s9907_s10 + $0x7c8] ss:$16 sps:$4 sm:$0xff]  }
 0x3b1   :  { %v7376_v22 = vld [vmem:[%s9907_s10 + $0x7a8] ss:$16 sps:$4 sm:$0xff]  }
 0x3b2   :  { %5272 = vmatpush1.bf16.msra.mxu1 %v7307_v56  ;;  %v7369_v56 = vld [vmem:[%s9907_s10 + $0x60c] ss:$16 sps:$4 sm:$0xff]  }
 0x3b3   :  { %5273 = vmatprep.subr.bf16.mxu1 %v7312_v63  ;;  %6554 = vmatpush3.bf16.msra.mxu0 %v7401_v1  ;;  %v7372_v63 = vld [vmem:[%s9907_s10 + $0x7ec] ss:$16 sps:$4 sm:$0xff]   ;;  %v7379_v1 = vld [vmem:[%s9907_s10 + $0x788] ss:$16 sps:$4 sm:$0xff]  }
 0x3b4   :  { %6555 = vmatprep.subr.bf16.mxu0 %v7402_v4  ;;  %v7382_v4 = vld [vmem:[%s9907_s10 + $0x768] ss:$16 sps:$4 sm:$0xff]  }
 0x3b6   :  { %5274 = vmatpush1.bf16.msra.mxu1 %v7310_v24  ;;  %v7375_v24 = vld [vmem:[%s9907_s10 + $0x7cc] ss:$16 sps:$4 sm:$0xff]  }
 0x3b7   :  { %5275 = vmatprep.subr.bf16.mxu1 %v7315_v59  ;;  %6556 = vmatpush3.bf16.msra.mxu0 %v7403_v16  ;;  %v7378_v59 = vld [vmem:[%s9907_s10 + $0x7ac] ss:$16 sps:$4 sm:$0xff]   ;;  %v7385_v16 = vld [vmem:[%s9907_s10 + $0x748] ss:$16 sps:$4 sm:$0xff]  }
 0x3b8   :  { %6557 = vmatprep.subr.bf16.mxu0 %v7404_v17  ;;  %v7388_v17 = vld [vmem:[%s9907_s10 + $0x728] ss:$16 sps:$4 sm:$0xff]  }
 0x3ba   :  { %5276 = vmatpush1.bf16.msra.mxu1 %v7313_v0  ;;  %v7381_v0 = vld [vmem:[%s9907_s10 + $0x78c] ss:$16 sps:$4 sm:$0xff]  }
 0x3bb   :  { %5277 = vmatprep.subr.bf16.mxu1 %v7318_v3  ;;  %6558 = vmatpush3.bf16.msra.mxu0 %v7405_v18  ;;  %v7384_v3 = vld [vmem:[%s9907_s10 + $0x76c] ss:$16 sps:$4 sm:$0xff]   ;;  %v7391_v18 = vld [vmem:[%s9907_s10 + $0x708] ss:$16 sps:$4 sm:$0xff]  }
 0x3bc   :  { %6559 = vmatprep.subr.bf16.mxu0 %v7406_v43  ;;  %v7419_v43 = vld [vmem:[%s9909_s12 + $0x98] sm:$0xff]  }
 0x3be   :  { %5278 = vmatpush1.bf16.msra.mxu1 %v7316_v7  ;;  %v7387_v7 = vld [vmem:[%s9907_s10 + $0x74c] ss:$16 sps:$4 sm:$0xff]  }
 0x3bf   :  { %5279 = vmatprep.subr.bf16.mxu1 %v7321_v5  ;;  %6560 = vmatpush3.bf16.msra.mxu0 %v7407_v45  ;;  %v7390_v5 = vld [vmem:[%s9907_s10 + $0x72c] ss:$16 sps:$4 sm:$0xff]   ;;  %v7421_v45 = vld [vmem:[%s9909_s12 + $0x90] sm:$0xff]  }
 0x3c2   :  { %5280 = vmatpush1.bf16.msra.mxu1 %v7319_v12  ;;  %v7393_v12 = vld [vmem:[%s9907_s10 + $0x70c] ss:$16 sps:$4 sm:$0xff]  }
 0x3c3   :  { %5281 = vmatprep.subr.bf16.mxu1 %v7324_v20  ;;  %v3758_v20 = vld [vmem:[%s9908_s11] sm:$0xf] }
 0x3c6   :  { %5282 = vmatpush2.bf16.msra.mxu1 %v7322_v21  ;;  %v3771_v21 = vrot.slane %v3758_v20, %v7943_v13  ;;  %v7410_v13 = vld [vmem:[%s9909_s12 + $0xf8] sm:$0xff]  }
 0x3c7   :  { %5283 = vmatprep.subr.bf16.mxu1 %v7327_v23  ;;  %v3775_v23 = vrot.slane %v3758_v20, %v7949_v15  ;;  %v7411_v15 = vld [vmem:[%s9909_s12 + $0xb8] sm:$0xff]  }
 0x3ca   :  { %5284 = vmatpush2.bf16.msra.mxu1 %v7325_v55 }
 0x3cb   :  { %5285 = vmatprep.subr.bf16.mxu1 %v7330_v27 }
 0x3ce   :  { %5286 = vmatpush2.bf16.msra.mxu1 %v7328_v8 }
 0x3cf   :  { %5287 = vmatprep.subr.bf16.mxu1 %v7333_v31 }
 0x3d2   :  { %5288 = vmatpush2.bf16.msra.mxu1 %v7331_v32 }
 0x3d3   :  { %5289 = vmatprep.subr.bf16.mxu1 %v7336_v38 }
 0x3d6   :  { %5290 = vmatpush2.bf16.msra.mxu1 %v7334_v42 }
 0x3d7   :  { %5291 = vmatprep.subr.bf16.mxu1 %v7339_v35 }
 0x3da   :  { %5292 = vmatpush2.bf16.msra.mxu1 %v7337_v19 }
 0x3db   :  { %5293 = vmatprep.subr.bf16.mxu1 %v7342_v28 }
 0x3de   :  { %5294 = vmatpush2.bf16.msra.mxu1 %v7340_v36  ;;  %v7413_v36 = vld [vmem:[%s9909_s12 + $0xb0] sm:$0xff]  }
 0x3df   :  { %5295 = vmatprep.subr.bf16.mxu1 %v7345_v39  ;;  %v7414_v39 = vld [vmem:[%s9909_s12 + $0xe8] sm:$0xff]  }
 0x3e2   :  { %5296 = vmatpush2.bf16.msra.mxu1 %v7343_v61  ;;  %v7415_v61 = vld [vmem:[%s9909_s12 + $0xa8] sm:$0xff]  }
 0x3e3   :  { %5347 = vmatprep.subr.bf16.mxu1 %v7348_v40  ;;  %v7416_v40 = vld [vmem:[%s9909_s12 + $0xe0] sm:$0xff]  }
 0x3e5   :  { %5298 = vmatmul.mubr.bf16.vlgmr.msra.gmra.mxu1 %v9371_v29  ;;  %v9720_v62 = vpop.f32.mrf.mxu0  ;;  %v7354_v29 = vld [vmem:[%s9907_s10 + $0x6ac] ss:$16 sps:$4 sm:$0xff]  }
 0x3e6   :  { %5348 = vmatpush1.bf16.msra.mxu1 %v7346_v9  ;;  %5379 = vmatprep.mubr.bf16.mxu1 %v9478_v33  ;;  %v7408_v33 = vld [vmem:[%s9909_s12 + $0x40] sm:$0xff]  }
 0x3e7   :  { %5349 = vmatprep.subr.bf16.mxu1 %v7351_v53  ;;  %v9735_v46 = vpop.f32.mrf.mxu0  ;;  %6561 = vmatprep.subr.bf16.mxu0 %v7408_v33  ;;  %v7417_v9 = vld [vmem:[%s9909_s12 + $0xa0] sm:$0xff]   ;;  %v7418_v53 = vld [vmem:[%s9909_s12 + $0xd8] sm:$0xff]  }
 0x3e8   :  { %6562 = vmatpush3.bf16.msra.mxu0 %v7409_v48 }
 0x3e9   :  { %v5180_v47 = vpop.f32.mrf.mxu0 }
 0x3ea   :  { %5350 = vmatpush1.bf16.msra.mxu1 %v7349_v44  ;;  %v7420_v44 = vld [vmem:[%s9909_s12 + $0xd0] sm:$0xff]   ;;  %v3767_v47 = vrot.slane %v3758_v20, %v7946_v14 }
 0x3eb   :  { %5351 = vmatprep.subr.bf16.mxu1 %v7354_v29  ;;  %v5181_v10 = vpop.f32.mrf.mxu0  ;;  %v3763_v29 = vrot.slane %v3758_v20, %v7940_v11  ;;  %v7423_v11 = vld [vmem:[%s9909_s12 + $0x88] sm:$0xff]  }
 0x3ed   :  { %v5095_v33 = vadd.f32 %v9582_v34, %v3763_v29 }
 0x3ee   :  { %5352 = vmatpush1.bf16.msra.mxu1 %v7352_v41  ;;  %v5097_v41 = vadd.f32 %v9591_v49, %v3767_v47 }
 0x3ef   :  { %5353 = vmatprep.subr.bf16.mxu1 %v7357_v2 }
 0x3f2   :  { %5354 = vmatpush1.bf16.msra.mxu1 %v7355_v30 }
 0x3f3   :  { %5355 = vmatprep.subr.bf16.mxu1 %v7360_v25 }
 0x3f6   :  { %5356 = vmatpush1.bf16.msra.mxu1 %v7358_v26  ;;  %v7422_v26 = vld [vmem:[%s9909_s12 + $0xc8] sm:$0xff]  }
 0x3f7   :  { %5357 = vmatprep.subr.bf16.mxu1 %v7363_v6 }
 0x3fa   :  { %5358 = vmatpush1.bf16.msra.mxu1 %v7361_v51 }
 0x3fb   :  { %5359 = vmatprep.subr.bf16.mxu1 %v7366_v52 }
 0x3fe   :  { %5360 = vmatpush1.bf16.msra.mxu1 %v7364_v54 }
 0x3ff   :  { %5361 = vmatprep.subr.bf16.mxu1 %v7369_v56  ;;  %v7424_v56 = vld [vmem:[%s9909_s12 + $0xc0] sm:$0xff]  }
 0x402   :  { %5362 = vmatpush1.bf16.msra.mxu1 %v7367_v57 }
 0x403   :  { %5363 = vmatprep.subr.bf16.mxu1 %v7372_v63 }
 0x406   :  { %5364 = vmatpush2.bf16.msra.mxu1 %v7370_v58 }
 0x407   :  { %5365 = vmatprep.subr.bf16.mxu1 %v7375_v24 }
 0x40a   :  { %5366 = vmatpush2.bf16.msra.mxu1 %v7373_v60 }
 0x40b   :  { %5367 = vmatprep.subr.bf16.mxu1 %v7378_v59 }
 0x40e   :  { %5368 = vmatpush2.bf16.msra.mxu1 %v7376_v22 }
 0x40f   :  { %5369 = vmatprep.subr.bf16.mxu1 %v7381_v0 }
 0x412   :  { %5370 = vmatpush2.bf16.msra.mxu1 %v7379_v1 }
 0x413   :  { %5371 = vmatprep.subr.bf16.mxu1 %v7384_v3 }
 0x416   :  { %5372 = vmatpush2.bf16.msra.mxu1 %v7382_v4 }
 0x417   :  { %5373 = vmatprep.subr.bf16.mxu1 %v7387_v7 }
 0x41a   :  { %5374 = vmatpush2.bf16.msra.mxu1 %v7385_v16 }
 0x41b   :  { %5375 = vmatprep.subr.bf16.mxu1 %v7390_v5 }
 0x41e   :  { %5376 = vmatpush2.bf16.msra.mxu1 %v7388_v17 }
 0x41f   :  { %5377 = vmatprep.subr.bf16.mxu1 %v7393_v12 }
 0x422   :  { %5378 = vmatpush2.bf16.msra.mxu1 %v7391_v18 }
 0x423   :  { %6569 = vmatprep.subr.bf16.mxu1 %v7410_v13 }
 0x425   :  { %v5258_v55 = vpop.f32.mrf.mxu0  ;;  %5380 = vmatmul.mubr.bf16.vlgmr.msra.gmra.mxu1 %v9575_v37  ;;  %v5135_v27 = vpop.f32.mrf.mxu1  ;;  %v7412_v37 = vld [vmem:[%s9909_s12 + $0xf0] sm:$0xff]  }
 0x426   :  { %v9830_v8 = vadd.f32 %v5258_v55, %v3771_v21  ;;  %6570 = vmatpush3.bf16.msra.mxu1 %v7411_v15  ;;  %v5136_v48 = vadd.f32 %v5135_v27, %v5095_v33 }
 0x427   :  { %v5260_v31 = vpop.f32.mrf.mxu0  ;;  %v5137_v32 = vpop.f32.mrf.mxu1  ;;  %6571 = vmatprep.subr.bf16.mxu1 %v7412_v37 }
 0x428   :  { %v9832_v38 = vadd.f32 %v5260_v31, %v3775_v23  ;;  %v5138_v2 = vadd.f32 %v5137_v32, %v5097_v41  ;;  %v5177_v10 = vadd.f32 %v9720_v62, %v5136_v48 }
 0x429   :  { %v5262_v42 = vpop.f32.mrf.mxu0  ;;  %v5139_v35 = vpop.f32.mrf.mxu1 }
 0x42a   :  { %6572 = vmatpush3.bf16.msra.mxu1 %v7413_v36  ;;  %v5179_v51 = vadd.f32 %v9735_v46, %v5138_v2  ;;  %v7425_v46 = vld [vmem:[%s9909_s12 + $0x80] sm:$0xff]  }
 0x42b   :  { %v5263_v19 = vpop.f32.mrf.mxu0  ;;  %v5140_v28 = vpop.f32.mrf.mxu1  ;;  %6573 = vmatprep.subr.bf16.mxu1 %v7414_v39 }
 0x42e   :  { %6574 = vmatpush3.bf16.msra.mxu1 %v7415_v61 }
 0x42f   :  { %6575 = vmatprep.subr.bf16.mxu1 %v7416_v40 }
 0x432   :  { %6576 = vmatpush3.bf16.msra.mxu1 %v7417_v9 }
 0x433   :  { %6577 = vmatprep.subr.bf16.mxu1 %v7418_v53 }
 0x436   :  { %6578 = vmatpush3.bf16.msra.mxu1 %v7419_v43 }
 0x437   :  { %6579 = vmatprep.subr.bf16.mxu1 %v7420_v44 }
 0x43a   :  { %6580 = vmatpush3.bf16.msra.mxu1 %v7421_v45 }
 0x43b   :  { %6581 = vmatprep.subr.bf16.mxu1 %v7422_v26 }
 0x43e   :  { %6582 = vmatpush3.bf16.msra.mxu1 %v7423_v11 }
 0x43f   :  { %6583 = vmatprep.subr.bf16.mxu1 %v7424_v56 }
 0x442   :  { %6584 = vmatpush3.bf16.msra.mxu1 %v7425_v46 }
 0x465   :  { %v5217_v30 = vpop.f32.mrf.mxu1  ;;  %v5340_v25 = vpop.f32.mrf.mxu0 }
 0x466   :  { %v5218_v6 = vadd.f32 %v5217_v30, %v5177_v10 }
 0x467   :  { %v5219_v14 = vpop.f32.mrf.mxu1  ;;  %v5342_v34 = vpop.f32.mrf.mxu0 }
 0x468   :  { %v5220_v49 = vadd.f32 %v5219_v14, %v5179_v51  ;;  %v5388_v52 = vmax.f32 %v5218_v6, 0.0 }
 0x469   :  { %v5221_v62 = vpop.f32.mrf.mxu1  ;;  %v5344_v54 = vpop.f32.mrf.mxu0 }
 0x46a   :  { %v5389_v57 = vmax.f32 %v5220_v49, 0.0  ;;  %v5392_v60 = vpack.c.bf16 %v5388_v52, %v5388_v52 }
 0x46b   :  { %v5222_v63 = vpop.f32.mrf.mxu1  ;;  %v5345_v58 = vpop.f32.mrf.mxu0 }
 0x46c   :  { %v5393_v24 = vpack.c.bf16 %v5389_v57, %v5389_v57 }
 0x46e   :  { %5691 = vmatprep.mubr.bf16.mxu0 %v5393_v24 }
 0x46f   :  { %5692 = vmatmul.mubr.bf16.vlgmr.msra.gmra.mxu0 %v5392_v60 }
 0x4a5   :  { %v5299_v59 = vpop.f32.mrf.mxu1 }
 0x4a6   :  { %v5300_v3 = vadd.f32 %v5299_v59, %v9830_v8 }
 0x4a7   :  { %v5301_v22 = vpop.f32.mrf.mxu1 }
 0x4a8   :  { %v5302_v4 = vadd.f32 %v5301_v22, %v9832_v38  ;;  %v5341_v7 = vadd.f32 %v5340_v25, %v5300_v3  ;;  %v6469_v38 = vld [vmem:[%s9910_s13] ss:$0 sm:$0xff]  ;;  %s5788_s13 = sshll.u32 %s7453_s6, 4  ;;  %s5789_s13 = int_to_ptr.vmem [resolvable:$true] %s5788_s13 }
 0x4a9   :  { %v5303_v0 = vpop.f32.mrf.mxu1  ;;  %s7430_s16 = scalar_lea.vmem %s5789_s13, 16  ;;  %s7434_s17 = scalar_lea.vmem %s5789_s13, 32 }
 0x4aa   :  { %v5343_v17 = vadd.f32 %v5342_v34, %v5302_v4  ;;  %p7431_p0 = scmp.ne.s32.totalorder %s5789_s13, %s7430_s16  ;;  %p7435_p1 = scmp.lt.s32.totalorder %s5789_s13, %s5789_s13 }
 0x4ab   :  { %v5304_v1 = vpop.f32.mrf.mxu1  ;;  %p7436_p2 = scmp.lt.s32.totalorder %s7434_s17, %s7430_s16 }
 0x4ad   :  { %p7437_p3 = por %p7436_p2, %p7435_p1 }
 0x4af   :  { %p7438_p4 = pnand %p7437_p3, %p7431_p0 }
 0x4e5   :  { %v5381_v16 = vpop.f32.mrf.mxu1 }
 0x4e6   :  { %v5382_v5 = vadd.f32 %v5381_v16, %v5341_v7 }
 0x4e7   :  { %v5383_v12 = vpop.f32.mrf.mxu1 }
 0x4e8   :  { %v5384_v18 = vadd.f32 %v5383_v12, %v5343_v17  ;;  %v5390_v20 = vmax.f32 %v5382_v5, 0.0 }
 0x4e9   :  { %v5385_v21 = vpop.f32.mrf.mxu1 }
 0x4ea   :  { %v5391_v23 = vmax.f32 %v5384_v18, 0.0  ;;  %v5394_v31 = vpack.c.bf16 %v5390_v20, %v5390_v20 }
 0x4eb   :  { %v5386_v55 = vpop.f32.mrf.mxu1 }
 0x4ec   :  { %v5395_v27 = vpack.c.bf16 %v5391_v23, %v5391_v23 }
 0x4ee   :  { %5731 = vmatprep.mubr.bf16.mxu1 %v5395_v27 }
 0x4ef   :  { %5732 = vmatmul.mubr.bf16.vlgmr.msra.gmra.mxu1 %v5394_v31 }
 0x52f   :  { %v6563_v32 = vpop.f32.mrf.mxu0 }
 0x531   :  { %v6564_v42 = vpop.f32.mrf.mxu0 }
 0x532   :  { %v6565_v35 = vadd.f32 %v6564_v42, %v6563_v32 }
 0x533   :  { %v6566_v8 = vpop.f32.mrf.mxu0 }
 0x534   :  { %v5694_v15 = vadd.f32 %v6565_v35, %v6469_v38 }
 0x535   :  { %v6567_v19 = vpop.f32.mrf.mxu0 }
 0x5af   :  { %v6585_v28 = vpop.f32.mrf.mxu1 }
 0x5b1   :  { %v6586_v13 = vpop.f32.mrf.mxu1 }
 0x5b2   :  { %v6587_v37 = vadd.f32 %v6586_v13, %v6585_v28 }
 0x5b3   :  { %v6588_v36 = vpop.f32.mrf.mxu1 }
 0x5b4   :  { %v5734_v39 = vadd.f32 %v6587_v37, %v5694_v15 }
 0x5b5   :  { %v6589_v61 = vpop.f32.mrf.mxu1 }
 0x5b6   :  { %v5739_v40 = vmul.f32 %v5734_v39, %v9309_v50 }
 0x5b8   :  { %5740 = vadd.xlane.f32.xlu0 %v5739_v40 }
 0x641   :  { %v5741_v9 = vpop.xlane.xlu0 %5740 }
 0x642   :  { %v6502_v53 = vmul.f32 -1.442695, %v5741_v9 }
 0x644   :  { %7426 = vpow2.f32 %v6502_v53 }
 0x651   :  { %v7427_v43 = vpop.eup %7426 }
 0x652   :  { %v5745_v44 = vadd.f32 1.0, %v7427_v43 }
 0x654   :  { %7428 = vrcp.f32 %v5745_v44 }
 0x661   :  { %v7429_v45 = vpop.eup %7428 }
 0x662   :  { %5748 = vxpose.xlu0.b32.start.end [1/1] (short) (narrow) %v7429_v45, 8 }
 0x6de   :  { %v5764_v29 = vpop.trf.xlu0 }
 0x6df   :  { %5781 = vst.msk [vmem:[#allocation2] sm:$0x1] %vm5780_vm0, %v5764_v29 }
 0x6e0   :  { %7441 = shalt.err (!%p7438_p4)
}
 0x6e1   :  { %5791 = dma.vmem_to_hbm [thread:$0]  %s5789_s13, 16, %s9911_s14, [#allocation3]  }
 0x6e2   :  { %7450 = dma.done.wait [#allocation3], 16  }
 0x6e3   :  { %7451 = vsyncadd [#allocation3], 4294967280 }
 0x6e4   :  { %5795 = vsyncpa [#allocation3], 1 }

</bundles_post_ra>
